<compile_context>
chip_gen: v7x
topology: tpu7x:2x2x1
jax: 0.10.0
libtpu: 0.0.40
codegen_flags: <defaults>
</compile_context>

<pallas_src>
import jax
import jax.numpy as jnp
import numpy as np
from jax.experimental import pallas as pl
from jax.experimental.pallas import tpu as pltpu

EPS = 1e-5                         # nn.BatchNorm2d default
NEG_SLOPE = 0.01                   # nn.LeakyReLU default
_F32 = jax.lax.Precision.HIGHEST   # reference + tiny BN-stat dots only
_PAD_TOP = 8                       # zero rows above the image in the halo scratch;
                                   # = 8 so the bulk row store is sublane-aligned.


def _lrelu(x):
    return jnp.where(x > 0, x, NEG_SLOPE * x)


# -----------------------------------------------------------------------------
# One-time parameter packing into the kernel's lane-dense (w, c) layout.
# (In a real model this happens at init time, not per forward call.)
# -----------------------------------------------------------------------------
def _banded_conv_weight(w_hwio, W):
    """(KH, KW, Ci, Co) conv weight -> (KH, W*Ci, W*Co) block-banded matrices.

    With activations packed as rows=(n,h), lanes=(w,ci):
        conv3x3_SAME(x)  (packed rows=(n,h), lanes=(w,co))
          = sum_dy  row_shift(x, dy) @ B[dy]
    The dx taps and the zero padding along W are absorbed into the band.
    """
    KH, KW, Ci, Co = w_hwio.shape
    sel = np.zeros((KW, W, W), np.float32)          # sel[dx, w_src, w_out]
    for w in range(W):
        for dx in range(KW):
            ws_ = w + dx - (KW // 2)
            if 0 <= ws_ < W:
                sel[dx, ws_, w] = 1.0
    sel = jnp.asarray(sel)
    # B[dy, w_src, ci, w_out, co] = sum_dx sel[dx, w_src, w_out] * w[dy, dx, ci, co]
    prod = sel[None, :, :, None, :, None] * w_hwio[:, :, None, :, None, :]
    B = jnp.sum(prod, axis=1)                       # (KH, W, Ci, W, Co) -- exact f32
    return B.reshape(KH, W * Ci, W * Co)


def _blockdiag_1x1_weight(w_io, W):
    """(Ci, Co) 1x1-conv weight -> block-diagonal (W*Ci, W*Co)."""
    Ci, Co = w_io.shape
    eye = jnp.asarray(np.eye(W, dtype=np.float32))
    B = eye[:, None, :, None] * w_io[None, :, None, :]   # (W, Ci, W, Co)
    return B.reshape(W * Ci, W * Co)


def pack_params(p, W):
    """Pack ConvBlock params for the lane-dense kernel (done once, init time)."""
    Co = p['w1'].shape[-1]

    def lane(v):                     # (1, Co) -> (1, W*Co); lane index = w*Co + c
        return jnp.tile(v, (1, W))

    gsum = jnp.asarray(np.tile(np.eye(Co, dtype=np.float32), (W, 1)))  # (W*Co, Co)
    return dict(
        b1m=_banded_conv_weight(p['w1'], W),
        b2m=_banded_conv_weight(p['w2'], W),
        bsm=_blockdiag_1x1_weight(p['ws'][0, 0], W),
        bias1=lane(p['b1']), bias2=lane(p['b2']), biass=lane(p['bs']),
        g1=lane(p['g1']), be1=lane(p['be1']),
        g2=lane(p['g2']), be2=lane(p['be2']),
        gs=lane(p['gs']), bes=lane(p['bes']),
        gsum=gsum, gbc=gsum.T,
    )


# -----------------------------------------------------------------------------
# Fused kernel
# -----------------------------------------------------------------------------
def _make_kernel(N, H, W, Ci, Co):
    NH, WCi, WCo = N * H, W * Ci, W * Co
    inv_cnt = 1.0 / float(N * H * W)      # BN: elements per channel
    r0 = _PAD_TOP - 1                     # first scratch row read by the dy=0 tap

    def kernel(x_ref, b1m_ref, b2m_ref, bsm_ref,
               bias1_ref, bias2_ref, biass_ref,
               g1_ref, be1_ref, g2_ref, be2_ref, gs_ref, bes_ref,
               gsum_ref, gbc_ref,
               o_ref, xpad_ref, hpad_ref):

        def bn_train(v, gamma_l, beta_l):
            # BatchNorm2d, training mode (batch stats, biased variance), fused
            # into a single pass: per-lane sum / sum-of-squares, then a tiny
            # 0/1 matmul collapses the W groups packed along the lane axis
            # into per-channel stats.  Stat dots stay full f32 (negligible).
            s_lane = jnp.sum(v, axis=0, keepdims=True)             # (1, W*C)
            ss_lane = jnp.sum(v * v, axis=0, keepdims=True)        # (1, W*C)
            mean_c = jnp.dot(s_lane, gsum_ref[...], precision=_F32,
                             preferred_element_type=jnp.float32) * inv_cnt
            ex2_c = jnp.dot(ss_lane, gsum_ref[...], precision=_F32,
                            preferred_element_type=jnp.float32) * inv_cnt
            var_c = jnp.maximum(ex2_c - mean_c * mean_c, 0.0)
            inv_c = jax.lax.rsqrt(var_c + EPS)
            mean_l = jnp.dot(mean_c, gbc_ref[...], precision=_F32,
                             preferred_element_type=jnp.float32)   # (1, W*C)
            inv_l = jnp.dot(inv_c, gbc_ref[...], precision=_F32,
                            preferred_element_type=jnp.float32)    # (1, W*C)
            return (v - mean_l) * inv_l * gamma_l + beta_l

        def conv3x3(pad_ref, bmat_ref, k_lanes):
            # 3x3 SAME conv = 3 lane-dense MXU matmuls (one per dy tap); dx
            # taps + W zero-padding live in the block-banded weights.  Default
            # MXU precision (bf16 inputs, f32 accumulate).
            acc = jnp.zeros((NH, WCo), jnp.float32)
            for dy in range(3):
                a = pad_ref[:, r0 + dy:r0 + dy + H, :].reshape(NH, k_lanes)
                acc = acc + jnp.dot(a, bmat_ref[dy],
                                    preferred_element_type=jnp.float32)
            return acc

        x2 = x_ref[...]                                            # (N*H, W*Ci)

        # ---- skip path: Conv1x1 -> LeakyReLU -> BN --------------------------
        s = jnp.dot(x2, bsm_ref[...],
                    preferred_element_type=jnp.float32) + biass_ref[...]
        skip = bn_train(_lrelu(s), gs_ref[...], bes_ref[...])

        # ---- main path Conv_1: zero-filled row-halo scratch + banded matmuls
        xpad_ref[...] = jnp.zeros(xpad_ref.shape, jnp.float32)
        xpad_ref[:, _PAD_TOP:_PAD_TOP + H, :] = x2.reshape(N, H, WCi)
        a1 = conv3x3(xpad_ref, b1m_ref, WCi) + bias1_ref[...]
        h = bn_train(_lrelu(a1), g1_ref[...], be1_ref[...])

        # ---- Conv_2 on h: h (and its halo) never leaves VMEM ----------------
        hpad_ref[...] = jnp.zeros(hpad_ref.shape, jnp.float32)
        hpad_ref[:, _PAD_TOP:_PAD_TOP + H, :] = h.reshape(N, H, WCo)
        a2 = conv3x3(hpad_ref, b2m_ref, WCo) + bias2_ref[...]
        y = bn_train(a2, g2_ref[...], be2_ref[...])

        # ---- residual add + ReLU; lane-dense (W*Cout = 128) output store ----
        o_ref[...] = jnp.maximum(y + skip, 0.0)

    return kernel


def _full_spec(shape):
    return pl.BlockSpec(shape, lambda i: (0,) * len(shape))


@jax.jit
def conv_block_forward(x_nchw, pk):
    """ConvBlock.forward (last=False). x_nchw: (N, Cin, H, W) f32 -> (N, 2*Cin, H, W)."""
    # TODO(synk): when this block is stacked in a full model, keep activations
    # in the packed (N*H, W*C) layout between blocks so the NCHW<->NHWC layout
    # changes below are paid once at the model boundary, not per block.
    x = jnp.transpose(x_nchw, (0, 2, 3, 1)).astype(jnp.float32)     # NHWC
    N, H, W, Ci = x.shape
    WCo = pk['bias1'].shape[-1]
    Co = WCo // W
    x2 = x.reshape(N * H, W * Ci)      # free reshape: NHWC row-major == (N*H, W*Ci)

    kernel = _make_kernel(N, H, W, Ci, Co)
    hp = H + _PAD_TOP + 1

    args = (x2, pk['b1m'], pk['b2m'], pk['bsm'],
            pk['bias1'], pk['bias2'], pk['biass'],
            pk['g1'], pk['be1'], pk['g2'], pk['be2'], pk['gs'], pk['bes'],
            pk['gsum'], pk['gbc'])

    # TODO(synk): for large N*H*W, tile the row dimension with a sum/sum-sq BN
    # accumulator (stats pass + normalize pass) and mark that grid axis
    # "parallel" so v7x's second TensorCore is used; at these shapes the whole
    # working set is < 1 MiB of VMEM, so a single fused invocation is fastest.
    out2 = pl.pallas_call(
        kernel,
        grid=(1,),
        in_specs=[_full_spec(a.shape) for a in args],
        out_specs=_full_spec((N * H, WCo)),
        out_shape=jax.ShapeDtypeStruct((N * H, WCo), jnp.float32),
        scratch_shapes=[
            pltpu.VMEM((N, hp, W * Ci), jnp.float32),   # x + row halo (VMEM only)
            pltpu.VMEM((N, hp, WCo), jnp.float32),      # h + row halo (never hits HBM)
        ],
        compiler_params=pltpu.CompilerParams(
            dimension_semantics=("arbitrary",),
            vmem_limit_bytes=32 * 1024 * 1024,          # also fits v7x's smaller VMEM
        ),
    )(*args)

    out = out2.reshape(N, H, W, Co)                     # free reshape
    return jnp.transpose(out, (0, 3, 1, 2))             # -> NCHW (PyTorch layout)


# -----------------------------------------------------------------------------
# Synthetic parameters + pure-JAX reference (ground truth, strict f32)
# -----------------------------------------------------------------------------
def init_params(key, cin):
    """Deterministic synthetic parameters (shapes match ConvBlock.__init__, last=False)."""
    cout = 2 * cin
    ks = list(jax.random.split(key, 12))

    def conv_w(k, kh, kw, ci, co):
        bound = 1.0 / np.sqrt(ci * kh * kw)
        return jax.random.uniform(k, (kh, kw, ci, co), jnp.float32, -bound, bound)

    def vec(k, c, lo, hi):
        return jax.random.uniform(k, (1, c), jnp.float32, lo, hi)

    return dict(
        # Conv_1: (3,3) C -> 2C
        w1=conv_w(ks[0], 3, 3, cin, cout), b1=vec(ks[1], cout, -0.1, 0.1),
        g1=vec(ks[2], cout, 0.5, 1.5), be1=vec(ks[3], cout, -0.5, 0.5),
        # Conv_2: (3,3) 2C -> 2C
        w2=conv_w(ks[4], 3, 3, cout, cout), b2=vec(ks[5], cout, -0.1, 0.1),
        g2=vec(ks[6], cout, 0.5, 1.5), be2=vec(ks[7], cout, -0.5, 0.5),
        # Conv_skip_1: (1,1) C -> 2C
        ws=conv_w(ks[8], 1, 1, cin, cout), bs=vec(ks[9], cout, -0.1, 0.1),
        gs=vec(ks[10], cout, 0.5, 1.5), bes=vec(ks[11], cout, -0.5, 0.5),
    )


def reference_forward(x_nchw, p):
    """Pure-JAX reference of the same math (strict f32, for correctness check)."""
    x = jnp.transpose(x_nchw, (0, 2, 3, 1)).astype(jnp.float32)

    def conv(t, w, b):
        y = jax.lax.conv_general_dilated(
            t, w, window_strides=(1, 1), padding='SAME',
            dimension_numbers=('NHWC', 'HWIO', 'NHWC'), precision=_F32)
        return y + b.reshape(1, 1, 1, -1)

    def bn(t, g, be):
        m = jnp.mean(t, axis=(0, 1, 2), keepdims=True)
        v = jnp.mean((t - m) ** 2, axis=(0, 1, 2), keepdims=True)
        return (t - m) / jnp.sqrt(v + EPS) * g.reshape(1, 1, 1, -1) + be.reshape(1, 1, 1, -1)

    skip = bn(_lrelu(conv(x, p['ws'], p['bs'])), p['gs'], p['bes'])
    h = bn(_lrelu(conv(x, p['w1'], p['b1'])), p['g1'], p['be1'])
    y = bn(conv(h, p['w2'], p['b2']), p['g2'], p['be2'])
    out = jnp.maximum(y + skip, 0.0)
    return jnp.transpose(out, (0, 3, 1, 2))


if __name__ == "__main__":
    key = jax.random.PRNGKey(0)
    kp, kx = jax.random.split(key)

    input_channel = 4
    params = init_params(kp, input_channel)
    x = jax.random.normal(kx, (2, input_channel, 16, 16), jnp.float32)  # NCHW, like PyTorch

    W = x.shape[3]
    packed = pack_params(params, W)       # one-time weight packing (init time in a model)

    out = conv_block_forward(x, packed)
    out = jax.block_until_ready(out)

    ref = reference_forward(x, params)
    # The kernel uses the MXU's native bf16-input / f32-accumulate path
    # (default matmul precision) for the conv matmuls per the perf review;
    # vs. this strict-f32 reference that yields ~5e-3 RMS differences after the
    # BatchNorms' 1/std rescaling, hence the 3e-2 elementwise tolerance.
    # (Pass precision=HIGH to the conv dots if f32-faithful outputs are needed.)
    np.testing.assert_allclose(np.asarray(out), np.asarray(ref), atol=3e-2, rtol=3e-2)

    print("KERNEL_OK")
</pallas_src>

<mosaic_0001>
module attributes {stable_mosaic.version = 11 : i64} {
  func.func @kernel(%arg0: i32, %arg1: memref<32x64xf32, #tpu.memory_space<vmem>>, %arg2: memref<3x64x128xf32, #tpu.memory_space<vmem>>, %arg3: memref<3x128x128xf32, #tpu.memory_space<vmem>>, %arg4: memref<64x128xf32, #tpu.memory_space<vmem>>, %arg5: memref<1x128xf32, #tpu.memory_space<vmem>>, %arg6: memref<1x128xf32, #tpu.memory_space<vmem>>, %arg7: memref<1x128xf32, #tpu.memory_space<vmem>>, %arg8: memref<1x128xf32, #tpu.memory_space<vmem>>, %arg9: memref<1x128xf32, #tpu.memory_space<vmem>>, %arg10: memref<1x128xf32, #tpu.memory_space<vmem>>, %arg11: memref<1x128xf32, #tpu.memory_space<vmem>>, %arg12: memref<1x128xf32, #tpu.memory_space<vmem>>, %arg13: memref<1x128xf32, #tpu.memory_space<vmem>>, %arg14: memref<128x8xf32, #tpu.memory_space<vmem>>, %arg15: memref<8x128xf32, #tpu.memory_space<vmem>>, %arg16: memref<32x128xf32, #tpu.memory_space<vmem>>, %arg17: memref<2x25x64xf32, #tpu.memory_space<vmem>>, %arg18: memref<2x25x128xf32, #tpu.memory_space<vmem>>) attributes {dimension_semantics = [#tpu.dimension_semantics<arbitrary>], iteration_bounds = array<i64: 1>, scalar_prefetch = 0 : i64, scratch_operands = 2 : i64, tpu.core_type = #tpu.core_type<tc>, window_params = [{pipeline_mode = #tpu.pipeline_mode<synchronous>, transform_indices = @transform_0, window_bounds = array<i64: 32, 64>}, {pipeline_mode = #tpu.pipeline_mode<synchronous>, transform_indices = @transform_1, window_bounds = array<i64: 3, 64, 128>}, {pipeline_mode = #tpu.pipeline_mode<synchronous>, transform_indices = @transform_2, window_bounds = array<i64: 3, 128, 128>}, {pipeline_mode = #tpu.pipeline_mode<synchronous>, transform_indices = @transform_3, window_bounds = array<i64: 64, 128>}, {pipeline_mode = #tpu.pipeline_mode<synchronous>, transform_indices = @transform_4, window_bounds = array<i64: 1, 128>}, {pipeline_mode = #tpu.pipeline_mode<synchronous>, transform_indices = @transform_5, window_bounds = array<i64: 1, 128>}, {pipeline_mode = #tpu.pipeline_mode<synchronous>, transform_indices = @transform_6, window_bounds = array<i64: 1, 128>}, {pipeline_mode = #tpu.pipeline_mode<synchronous>, transform_indices = @transform_7, window_bounds = array<i64: 1, 128>}, {pipeline_mode = #tpu.pipeline_mode<synchronous>, transform_indices = @transform_8, window_bounds = array<i64: 1, 128>}, {pipeline_mode = #tpu.pipeline_mode<synchronous>, transform_indices = @transform_9, window_bounds = array<i64: 1, 128>}, {pipeline_mode = #tpu.pipeline_mode<synchronous>, transform_indices = @transform_10, window_bounds = array<i64: 1, 128>}, {pipeline_mode = #tpu.pipeline_mode<synchronous>, transform_indices = @transform_11, window_bounds = array<i64: 1, 128>}, {pipeline_mode = #tpu.pipeline_mode<synchronous>, transform_indices = @transform_12, window_bounds = array<i64: 1, 128>}, {pipeline_mode = #tpu.pipeline_mode<synchronous>, transform_indices = @transform_13, window_bounds = array<i64: 128, 8>}, {pipeline_mode = #tpu.pipeline_mode<synchronous>, transform_indices = @transform_14, window_bounds = array<i64: 8, 128>}, {pipeline_mode = #tpu.pipeline_mode<synchronous>, transform_indices = @transform_15, window_bounds = array<i64: 32, 128>}]} {
    %c0 = arith.constant 0 : index
    %c0_0 = arith.constant 0 : index
    %0 = vector.load %arg1[%c0, %c0_0] : memref<32x64xf32, #tpu.memory_space<vmem>>, vector<32x64xf32>
    %c0_1 = arith.constant 0 : index
    %c0_2 = arith.constant 0 : index
    %1 = vector.load %arg4[%c0_1, %c0_2] : memref<64x128xf32, #tpu.memory_space<vmem>>, vector<64x128xf32>
    %cst = arith.constant dense<0.000000e+00> : vector<32x128xf32>
    %2 = tpu.matmul %0, %1, %cst {dimension_numbers = #tpu.dot_dimension_numbers<[1], [0], [0], [1], [0, 0, 1, 1], [], []>} : vector<32x64xf32>, vector<64x128xf32>, vector<32x128xf32> -> vector<32x128xf32>
    %c0_3 = arith.constant 0 : index
    %c0_4 = arith.constant 0 : index
    %3 = vector.load %arg7[%c0_3, %c0_4] : memref<1x128xf32, #tpu.memory_space<vmem>>, vector<1x128xf32>
    %4 = vector.broadcast %3 : vector<1x128xf32> to vector<32x128xf32>
    %5 = arith.addf %2, %4 : vector<32x128xf32>
    %cst_5 = arith.constant 0.000000e+00 : f32
    %6 = vector.broadcast %cst_5 : f32 to vector<32x128xf32>
    %7 = arith.cmpf ogt, %5, %6 : vector<32x128xf32>
    %cst_6 = arith.constant 0.00999999977 : f32
    %8 = vector.broadcast %cst_6 : f32 to vector<32x128xf32>
    %9 = arith.mulf %8, %5 : vector<32x128xf32>
    %10 = arith.select %7, %5, %9 : vector<32x128xi1>, vector<32x128xf32>
    %c0_7 = arith.constant 0 : index
    %c0_8 = arith.constant 0 : index
    %11 = vector.load %arg12[%c0_7, %c0_8] : memref<1x128xf32, #tpu.memory_space<vmem>>, vector<1x128xf32>
    %c0_9 = arith.constant 0 : index
    %c0_10 = arith.constant 0 : index
    %12 = vector.load %arg13[%c0_9, %c0_10] : memref<1x128xf32, #tpu.memory_space<vmem>>, vector<1x128xf32>
    %cst_11 = arith.constant dense<0.000000e+00> : vector<128xf32>
    %13 = vector.multi_reduction <add>, %10, %cst_11 [0] : vector<32x128xf32> to vector<128xf32>
    %14 = vector.shape_cast %13 : vector<128xf32> to vector<1x128xf32>
    %15 = arith.mulf %10, %10 : vector<32x128xf32>
    %cst_12 = arith.constant dense<0.000000e+00> : vector<128xf32>
    %16 = vector.multi_reduction <add>, %15, %cst_12 [0] : vector<32x128xf32> to vector<128xf32>
    %17 = vector.shape_cast %16 : vector<128xf32> to vector<1x128xf32>
    %c0_13 = arith.constant 0 : index
    %c0_14 = arith.constant 0 : index
    %18 = vector.load %arg14[%c0_13, %c0_14] : memref<128x8xf32, #tpu.memory_space<vmem>>, vector<128x8xf32>
    %cst_15 = arith.constant dense<0.000000e+00> : vector<1x8xf32>
    %19 = tpu.matmul %14, %18, %cst_15 {dimension_numbers = #tpu.dot_dimension_numbers<[1], [0], [0], [1], [0, 0, 1, 1], [], []>, precision = #tpu.contract_precision<fp32>} : vector<1x128xf32>, vector<128x8xf32>, vector<1x8xf32> -> vector<1x8xf32>
    %cst_16 = arith.constant 0.001953125 : f32
    %20 = vector.broadcast %cst_16 : f32 to vector<1x8xf32>
    %21 = arith.mulf %19, %20 : vector<1x8xf32>
    %c0_17 = arith.constant 0 : index
    %c0_18 = arith.constant 0 : index
    %22 = vector.load %arg14[%c0_17, %c0_18] : memref<128x8xf32, #tpu.memory_space<vmem>>, vector<128x8xf32>
    %cst_19 = arith.constant dense<0.000000e+00> : vector<1x8xf32>
    %23 = tpu.matmul %17, %22, %cst_19 {dimension_numbers = #tpu.dot_dimension_numbers<[1], [0], [0], [1], [0, 0, 1, 1], [], []>, precision = #tpu.contract_precision<fp32>} : vector<1x128xf32>, vector<128x8xf32>, vector<1x8xf32> -> vector<1x8xf32>
    %cst_20 = arith.constant 0.001953125 : f32
    %24 = vector.broadcast %cst_20 : f32 to vector<1x8xf32>
    %25 = arith.mulf %23, %24 : vector<1x8xf32>
    %26 = arith.mulf %21, %21 : vector<1x8xf32>
    %27 = arith.subf %25, %26 : vector<1x8xf32>
    %cst_21 = arith.constant 0.000000e+00 : f32
    %28 = vector.broadcast %cst_21 : f32 to vector<1x8xf32>
    %29 = arith.maximumf %27, %28 : vector<1x8xf32>
    %cst_22 = arith.constant 9.99999974E-6 : f32
    %30 = vector.broadcast %cst_22 : f32 to vector<1x8xf32>
    %31 = arith.addf %29, %30 : vector<1x8xf32>
    %32 = math.rsqrt %31 : vector<1x8xf32>
    %c0_23 = arith.constant 0 : index
    %c0_24 = arith.constant 0 : index
    %33 = vector.load %arg15[%c0_23, %c0_24] : memref<8x128xf32, #tpu.memory_space<vmem>>, vector<8x128xf32>
    %cst_25 = arith.constant dense<0.000000e+00> : vector<1x128xf32>
    %34 = tpu.matmul %21, %33, %cst_25 {dimension_numbers = #tpu.dot_dimension_numbers<[1], [0], [0], [1], [0, 0, 1, 1], [], []>, precision = #tpu.contract_precision<fp32>} : vector<1x8xf32>, vector<8x128xf32>, vector<1x128xf32> -> vector<1x128xf32>
    %c0_26 = arith.constant 0 : index
    %c0_27 = arith.constant 0 : index
    %35 = vector.load %arg15[%c0_26, %c0_27] : memref<8x128xf32, #tpu.memory_space<vmem>>, vector<8x128xf32>
    %cst_28 = arith.constant dense<0.000000e+00> : vector<1x128xf32>
    %36 = tpu.matmul %32, %35, %cst_28 {dimension_numbers = #tpu.dot_dimension_numbers<[1], [0], [0], [1], [0, 0, 1, 1], [], []>, precision = #tpu.contract_precision<fp32>} : vector<1x8xf32>, vector<8x128xf32>, vector<1x128xf32> -> vector<1x128xf32>
    %37 = vector.broadcast %34 : vector<1x128xf32> to vector<32x128xf32>
    %38 = arith.subf %10, %37 : vector<32x128xf32>
    %39 = vector.broadcast %36 : vector<1x128xf32> to vector<32x128xf32>
    %40 = arith.mulf %38, %39 : vector<32x128xf32>
    %41 = vector.broadcast %11 : vector<1x128xf32> to vector<32x128xf32>
    %42 = arith.mulf %40, %41 : vector<32x128xf32>
    %43 = vector.broadcast %12 : vector<1x128xf32> to vector<32x128xf32>
    %44 = arith.addf %42, %43 : vector<32x128xf32>
    %cst_29 = arith.constant 0.000000e+00 : f32
    %45 = vector.broadcast %cst_29 : f32 to vector<2x25x64xf32>
    %c0_30 = arith.constant 0 : index
    %c0_31 = arith.constant 0 : index
    %c0_32 = arith.constant 0 : index
    %46 = vector.load %arg17[%c0_30, %c0_31, %c0_32] : memref<2x25x64xf32, #tpu.memory_space<vmem>>, vector<2x25x64xf32>
    tpu.vector_store %arg17[%c0_30, %c0_31, %c0_32], %45 {strides = array<i32>} : memref<2x25x64xf32, #tpu.memory_space<vmem>>, vector<2x25x64xf32>,
    %47 = vector.shape_cast %0 : vector<32x64xf32> to vector<2x16x64xf32>
    %c0_33 = arith.constant 0 : index
    %c8 = arith.constant 8 : index
    %c0_34 = arith.constant 0 : index
    %48 = vector.load %arg17[%c0_33, %c8, %c0_34] : memref<2x25x64xf32, #tpu.memory_space<vmem>>, vector<2x16x64xf32>
    tpu.vector_store %arg17[%c0_33, %c8, %c0_34], %47 {strides = array<i32>} : memref<2x25x64xf32, #tpu.memory_space<vmem>>, vector<2x16x64xf32>,
    %cst_35 = arith.constant 0.000000e+00 : f32
    %49 = vector.broadcast %cst_35 : f32 to vector<32x128xf32>
    %c0_36 = arith.constant 0 : index
    %c7 = arith.constant 7 : index
    %c0_37 = arith.constant 0 : index
    %50 = vector.load %arg17[%c0_36, %c7, %c0_37] : memref<2x25x64xf32, #tpu.memory_space<vmem>>, vector<2x16x64xf32>
    %51 = vector.shape_cast %50 : vector<2x16x64xf32> to vector<32x64xf32>
    %c0_38 = arith.constant 0 : index
    %c0_39 = arith.constant 0 : index
    %c0_40 = arith.constant 0 : index
    %52 = vector.load %arg2[%c0_38, %c0_39, %c0_40] : memref<3x64x128xf32, #tpu.memory_space<vmem>>, vector<1x64x128xf32>
    %53 = vector.shape_cast %52 : vector<1x64x128xf32> to vector<64x128xf32>
    %cst_41 = arith.constant dense<0.000000e+00> : vector<32x128xf32>
    %54 = tpu.matmul %51, %53, %cst_41 {dimension_numbers = #tpu.dot_dimension_numbers<[1], [0], [0], [1], [0, 0, 1, 1], [], []>} : vector<32x64xf32>, vector<64x128xf32>, vector<32x128xf32> -> vector<32x128xf32>
    %55 = arith.addf %49, %54 : vector<32x128xf32>
    %c0_42 = arith.constant 0 : index
    %c8_43 = arith.constant 8 : index
    %c0_44 = arith.constant 0 : index
    %56 = vector.load %arg17[%c0_42, %c8_43, %c0_44] : memref<2x25x64xf32, #tpu.memory_space<vmem>>, vector<2x16x64xf32>
    %57 = vector.shape_cast %56 : vector<2x16x64xf32> to vector<32x64xf32>
    %c1 = arith.constant 1 : index
    %c0_45 = arith.constant 0 : index
    %c0_46 = arith.constant 0 : index
    %58 = vector.load %arg2[%c1, %c0_45, %c0_46] : memref<3x64x128xf32, #tpu.memory_space<vmem>>, vector<1x64x128xf32>
    %59 = vector.shape_cast %58 : vector<1x64x128xf32> to vector<64x128xf32>
    %cst_47 = arith.constant dense<0.000000e+00> : vector<32x128xf32>
    %60 = tpu.matmul %57, %59, %cst_47 {dimension_numbers = #tpu.dot_dimension_numbers<[1], [0], [0], [1], [0, 0, 1, 1], [], []>} : vector<32x64xf32>, vector<64x128xf32>, vector<32x128xf32> -> vector<32x128xf32>
    %61 = arith.addf %55, %60 : vector<32x128xf32>
    %c0_48 = arith.constant 0 : index
    %c9 = arith.constant 9 : index
    %c0_49 = arith.constant 0 : index
    %62 = vector.load %arg17[%c0_48, %c9, %c0_49] : memref<2x25x64xf32, #tpu.memory_space<vmem>>, vector<2x16x64xf32>
    %63 = vector.shape_cast %62 : vector<2x16x64xf32> to vector<32x64xf32>
    %c2 = arith.constant 2 : index
    %c0_50 = arith.constant 0 : index
    %c0_51 = arith.constant 0 : index
    %64 = vector.load %arg2[%c2, %c0_50, %c0_51] : memref<3x64x128xf32, #tpu.memory_space<vmem>>, vector<1x64x128xf32>
    %65 = vector.shape_cast %64 : vector<1x64x128xf32> to vector<64x128xf32>
    %cst_52 = arith.constant dense<0.000000e+00> : vector<32x128xf32>
    %66 = tpu.matmul %63, %65, %cst_52 {dimension_numbers = #tpu.dot_dimension_numbers<[1], [0], [0], [1], [0, 0, 1, 1], [], []>} : vector<32x64xf32>, vector<64x128xf32>, vector<32x128xf32> -> vector<32x128xf32>
    %67 = arith.addf %61, %66 : vector<32x128xf32>
    %c0_53 = arith.constant 0 : index
    %c0_54 = arith.constant 0 : index
    %68 = vector.load %arg5[%c0_53, %c0_54] : memref<1x128xf32, #tpu.memory_space<vmem>>, vector<1x128xf32>
    %69 = vector.broadcast %68 : vector<1x128xf32> to vector<32x128xf32>
    %70 = arith.addf %67, %69 : vector<32x128xf32>
    %cst_55 = arith.constant 0.000000e+00 : f32
    %71 = vector.broadcast %cst_55 : f32 to vector<32x128xf32>
    %72 = arith.cmpf ogt, %70, %71 : vector<32x128xf32>
    %cst_56 = arith.constant 0.00999999977 : f32
    %73 = vector.broadcast %cst_56 : f32 to vector<32x128xf32>
    %74 = arith.mulf %73, %70 : vector<32x128xf32>
    %75 = arith.select %72, %70, %74 : vector<32x128xi1>, vector<32x128xf32>
    %c0_57 = arith.constant 0 : index
    %c0_58 = arith.constant 0 : index
    %76 = vector.load %arg8[%c0_57, %c0_58] : memref<1x128xf32, #tpu.memory_space<vmem>>, vector<1x128xf32>
    %c0_59 = arith.constant 0 : index
    %c0_60 = arith.constant 0 : index
    %77 = vector.load %arg9[%c0_59, %c0_60] : memref<1x128xf32, #tpu.memory_space<vmem>>, vector<1x128xf32>
    %cst_61 = arith.constant dense<0.000000e+00> : vector<128xf32>
    %78 = vector.multi_reduction <add>, %75, %cst_61 [0] : vector<32x128xf32> to vector<128xf32>
    %79 = vector.shape_cast %78 : vector<128xf32> to vector<1x128xf32>
    %80 = arith.mulf %75, %75 : vector<32x128xf32>
    %cst_62 = arith.constant dense<0.000000e+00> : vector<128xf32>
    %81 = vector.multi_reduction <add>, %80, %cst_62 [0] : vector<32x128xf32> to vector<128xf32>
    %82 = vector.shape_cast %81 : vector<128xf32> to vector<1x128xf32>
    %c0_63 = arith.constant 0 : index
    %c0_64 = arith.constant 0 : index
    %83 = vector.load %arg14[%c0_63, %c0_64] : memref<128x8xf32, #tpu.memory_space<vmem>>, vector<128x8xf32>
    %cst_65 = arith.constant dense<0.000000e+00> : vector<1x8xf32>
    %84 = tpu.matmul %79, %83, %cst_65 {dimension_numbers = #tpu.dot_dimension_numbers<[1], [0], [0], [1], [0, 0, 1, 1], [], []>, precision = #tpu.contract_precision<fp32>} : vector<1x128xf32>, vector<128x8xf32>, vector<1x8xf32> -> vector<1x8xf32>
    %cst_66 = arith.constant 0.001953125 : f32
    %85 = vector.broadcast %cst_66 : f32 to vector<1x8xf32>
    %86 = arith.mulf %84, %85 : vector<1x8xf32>
    %c0_67 = arith.constant 0 : index
    %c0_68 = arith.constant 0 : index
    %87 = vector.load %arg14[%c0_67, %c0_68] : memref<128x8xf32, #tpu.memory_space<vmem>>, vector<128x8xf32>
    %cst_69 = arith.constant dense<0.000000e+00> : vector<1x8xf32>
    %88 = tpu.matmul %82, %87, %cst_69 {dimension_numbers = #tpu.dot_dimension_numbers<[1], [0], [0], [1], [0, 0, 1, 1], [], []>, precision = #tpu.contract_precision<fp32>} : vector<1x128xf32>, vector<128x8xf32>, vector<1x8xf32> -> vector<1x8xf32>
    %cst_70 = arith.constant 0.001953125 : f32
    %89 = vector.broadcast %cst_70 : f32 to vector<1x8xf32>
    %90 = arith.mulf %88, %89 : vector<1x8xf32>
    %91 = arith.mulf %86, %86 : vector<1x8xf32>
    %92 = arith.subf %90, %91 : vector<1x8xf32>
    %cst_71 = arith.constant 0.000000e+00 : f32
    %93 = vector.broadcast %cst_71 : f32 to vector<1x8xf32>
    %94 = arith.maximumf %92, %93 : vector<1x8xf32>
    %cst_72 = arith.constant 9.99999974E-6 : f32
    %95 = vector.broadcast %cst_72 : f32 to vector<1x8xf32>
    %96 = arith.addf %94, %95 : vector<1x8xf32>
    %97 = math.rsqrt %96 : vector<1x8xf32>
    %c0_73 = arith.constant 0 : index
    %c0_74 = arith.constant 0 : index
    %98 = vector.load %arg15[%c0_73, %c0_74] : memref<8x128xf32, #tpu.memory_space<vmem>>, vector<8x128xf32>
    %cst_75 = arith.constant dense<0.000000e+00> : vector<1x128xf32>
    %99 = tpu.matmul %86, %98, %cst_75 {dimension_numbers = #tpu.dot_dimension_numbers<[1], [0], [0], [1], [0, 0, 1, 1], [], []>, precision = #tpu.contract_precision<fp32>} : vector<1x8xf32>, vector<8x128xf32>, vector<1x128xf32> -> vector<1x128xf32>
    %c0_76 = arith.constant 0 : index
    %c0_77 = arith.constant 0 : index
    %100 = vector.load %arg15[%c0_76, %c0_77] : memref<8x128xf32, #tpu.memory_space<vmem>>, vector<8x128xf32>
    %cst_78 = arith.constant dense<0.000000e+00> : vector<1x128xf32>
    %101 = tpu.matmul %97, %100, %cst_78 {dimension_numbers = #tpu.dot_dimension_numbers<[1], [0], [0], [1], [0, 0, 1, 1], [], []>, precision = #tpu.contract_precision<fp32>} : vector<1x8xf32>, vector<8x128xf32>, vector<1x128xf32> -> vector<1x128xf32>
    %102 = vector.broadcast %99 : vector<1x128xf32> to vector<32x128xf32>
    %103 = arith.subf %75, %102 : vector<32x128xf32>
    %104 = vector.broadcast %101 : vector<1x128xf32> to vector<32x128xf32>
    %105 = arith.mulf %103, %104 : vector<32x128xf32>
    %106 = vector.broadcast %76 : vector<1x128xf32> to vector<32x128xf32>
    %107 = arith.mulf %105, %106 : vector<32x128xf32>
    %108 = vector.broadcast %77 : vector<1x128xf32> to vector<32x128xf32>
    %109 = arith.addf %107, %108 : vector<32x128xf32>
    %cst_79 = arith.constant 0.000000e+00 : f32
    %110 = vector.broadcast %cst_79 : f32 to vector<2x25x128xf32>
    %c0_80 = arith.constant 0 : index
    %c0_81 = arith.constant 0 : index
    %c0_82 = arith.constant 0 : index
    %111 = vector.load %arg18[%c0_80, %c0_81, %c0_82] : memref<2x25x128xf32, #tpu.memory_space<vmem>>, vector<2x25x128xf32>
    tpu.vector_store %arg18[%c0_80, %c0_81, %c0_82], %110 {strides = array<i32>} : memref<2x25x128xf32, #tpu.memory_space<vmem>>, vector<2x25x128xf32>,
    %112 = vector.shape_cast %109 : vector<32x128xf32> to vector<2x16x128xf32>
    %c0_83 = arith.constant 0 : index
    %c8_84 = arith.constant 8 : index
    %c0_85 = arith.constant 0 : index
    %113 = vector.load %arg18[%c0_83, %c8_84, %c0_85] : memref<2x25x128xf32, #tpu.memory_space<vmem>>, vector<2x16x128xf32>
    tpu.vector_store %arg18[%c0_83, %c8_84, %c0_85], %112 {strides = array<i32>} : memref<2x25x128xf32, #tpu.memory_space<vmem>>, vector<2x16x128xf32>,
    %cst_86 = arith.constant 0.000000e+00 : f32
    %114 = vector.broadcast %cst_86 : f32 to vector<32x128xf32>
    %c0_87 = arith.constant 0 : index
    %c7_88 = arith.constant 7 : index
    %c0_89 = arith.constant 0 : index
    %115 = vector.load %arg18[%c0_87, %c7_88, %c0_89] : memref<2x25x128xf32, #tpu.memory_space<vmem>>, vector<2x16x128xf32>
    %116 = vector.shape_cast %115 : vector<2x16x128xf32> to vector<32x128xf32>
    %c0_90 = arith.constant 0 : index
    %c0_91 = arith.constant 0 : index
    %c0_92 = arith.constant 0 : index
    %117 = vector.load %arg3[%c0_90, %c0_91, %c0_92] : memref<3x128x128xf32, #tpu.memory_space<vmem>>, vector<1x128x128xf32>
    %118 = vector.shape_cast %117 : vector<1x128x128xf32> to vector<128x128xf32>
    %cst_93 = arith.constant dense<0.000000e+00> : vector<32x128xf32>
    %119 = tpu.matmul %116, %118, %cst_93 {dimension_numbers = #tpu.dot_dimension_numbers<[1], [0], [0], [1], [0, 0, 1, 1], [], []>} : vector<32x128xf32>, vector<128x128xf32>, vector<32x128xf32> -> vector<32x128xf32>
    %120 = arith.addf %114, %119 : vector<32x128xf32>
    %c0_94 = arith.constant 0 : index
    %c8_95 = arith.constant 8 : index
    %c0_96 = arith.constant 0 : index
    %121 = vector.load %arg18[%c0_94, %c8_95, %c0_96] : memref<2x25x128xf32, #tpu.memory_space<vmem>>, vector<2x16x128xf32>
    %122 = vector.shape_cast %121 : vector<2x16x128xf32> to vector<32x128xf32>
    %c1_97 = arith.constant 1 : index
    %c0_98 = arith.constant 0 : index
    %c0_99 = arith.constant 0 : index
    %123 = vector.load %arg3[%c1_97, %c0_98, %c0_99] : memref<3x128x128xf32, #tpu.memory_space<vmem>>, vector<1x128x128xf32>
    %124 = vector.shape_cast %123 : vector<1x128x128xf32> to vector<128x128xf32>
    %cst_100 = arith.constant dense<0.000000e+00> : vector<32x128xf32>
    %125 = tpu.matmul %122, %124, %cst_100 {dimension_numbers = #tpu.dot_dimension_numbers<[1], [0], [0], [1], [0, 0, 1, 1], [], []>} : vector<32x128xf32>, vector<128x128xf32>, vector<32x128xf32> -> vector<32x128xf32>
    %126 = arith.addf %120, %125 : vector<32x128xf32>
    %c0_101 = arith.constant 0 : index
    %c9_102 = arith.constant 9 : index
    %c0_103 = arith.constant 0 : index
    %127 = vector.load %arg18[%c0_101, %c9_102, %c0_103] : memref<2x25x128xf32, #tpu.memory_space<vmem>>, vector<2x16x128xf32>
    %128 = vector.shape_cast %127 : vector<2x16x128xf32> to vector<32x128xf32>
    %c2_104 = arith.constant 2 : index
    %c0_105 = arith.constant 0 : index
    %c0_106 = arith.constant 0 : index
    %129 = vector.load %arg3[%c2_104, %c0_105, %c0_106] : memref<3x128x128xf32, #tpu.memory_space<vmem>>, vector<1x128x128xf32>
    %130 = vector.shape_cast %129 : vector<1x128x128xf32> to vector<128x128xf32>
    %cst_107 = arith.constant dense<0.000000e+00> : vector<32x128xf32>
    %131 = tpu.matmul %128, %130, %cst_107 {dimension_numbers = #tpu.dot_dimension_numbers<[1], [0], [0], [1], [0, 0, 1, 1], [], []>} : vector<32x128xf32>, vector<128x128xf32>, vector<32x128xf32> -> vector<32x128xf32>
    %132 = arith.addf %126, %131 : vector<32x128xf32>
    %c0_108 = arith.constant 0 : index
    %c0_109 = arith.constant 0 : index
    %133 = vector.load %arg6[%c0_108, %c0_109] : memref<1x128xf32, #tpu.memory_space<vmem>>, vector<1x128xf32>
    %134 = vector.broadcast %133 : vector<1x128xf32> to vector<32x128xf32>
    %135 = arith.addf %132, %134 : vector<32x128xf32>
    %c0_110 = arith.constant 0 : index
    %c0_111 = arith.constant 0 : index
    %136 = vector.load %arg10[%c0_110, %c0_111] : memref<1x128xf32, #tpu.memory_space<vmem>>, vector<1x128xf32>
    %c0_112 = arith.constant 0 : index
    %c0_113 = arith.constant 0 : index
    %137 = vector.load %arg11[%c0_112, %c0_113] : memref<1x128xf32, #tpu.memory_space<vmem>>, vector<1x128xf32>
    %cst_114 = arith.constant dense<0.000000e+00> : vector<128xf32>
    %138 = vector.multi_reduction <add>, %135, %cst_114 [0] : vector<32x128xf32> to vector<128xf32>
    %139 = vector.shape_cast %138 : vector<128xf32> to vector<1x128xf32>
    %140 = arith.mulf %135, %135 : vector<32x128xf32>
    %cst_115 = arith.constant dense<0.000000e+00> : vector<128xf32>
    %141 = vector.multi_reduction <add>, %140, %cst_115 [0] : vector<32x128xf32> to vector<128xf32>
    %142 = vector.shape_cast %141 : vector<128xf32> to vector<1x128xf32>
    %c0_116 = arith.constant 0 : index
    %c0_117 = arith.constant 0 : index
    %143 = vector.load %arg14[%c0_116, %c0_117] : memref<128x8xf32, #tpu.memory_space<vmem>>, vector<128x8xf32>
    %cst_118 = arith.constant dense<0.000000e+00> : vector<1x8xf32>
    %144 = tpu.matmul %139, %143, %cst_118 {dimension_numbers = #tpu.dot_dimension_numbers<[1], [0], [0], [1], [0, 0, 1, 1], [], []>, precision = #tpu.contract_precision<fp32>} : vector<1x128xf32>, vector<128x8xf32>, vector<1x8xf32> -> vector<1x8xf32>
    %cst_119 = arith.constant 0.001953125 : f32
    %145 = vector.broadcast %cst_119 : f32 to vector<1x8xf32>
    %146 = arith.mulf %144, %145 : vector<1x8xf32>
    %c0_120 = arith.constant 0 : index
    %c0_121 = arith.constant 0 : index
    %147 = vector.load %arg14[%c0_120, %c0_121] : memref<128x8xf32, #tpu.memory_space<vmem>>, vector<128x8xf32>
    %cst_122 = arith.constant dense<0.000000e+00> : vector<1x8xf32>
    %148 = tpu.matmul %142, %147, %cst_122 {dimension_numbers = #tpu.dot_dimension_numbers<[1], [0], [0], [1], [0, 0, 1, 1], [], []>, precision = #tpu.contract_precision<fp32>} : vector<1x128xf32>, vector<128x8xf32>, vector<1x8xf32> -> vector<1x8xf32>
    %cst_123 = arith.constant 0.001953125 : f32
    %149 = vector.broadcast %cst_123 : f32 to vector<1x8xf32>
    %150 = arith.mulf %148, %149 : vector<1x8xf32>
    %151 = arith.mulf %146, %146 : vector<1x8xf32>
    %152 = arith.subf %150, %151 : vector<1x8xf32>
    %cst_124 = arith.constant 0.000000e+00 : f32
    %153 = vector.broadcast %cst_124 : f32 to vector<1x8xf32>
    %154 = arith.maximumf %152, %153 : vector<1x8xf32>
    %cst_125 = arith.constant 9.99999974E-6 : f32
    %155 = vector.broadcast %cst_125 : f32 to vector<1x8xf32>
    %156 = arith.addf %154, %155 : vector<1x8xf32>
    %157 = math.rsqrt %156 : vector<1x8xf32>
    %c0_126 = arith.constant 0 : index
    %c0_127 = arith.constant 0 : index
    %158 = vector.load %arg15[%c0_126, %c0_127] : memref<8x128xf32, #tpu.memory_space<vmem>>, vector<8x128xf32>
    %cst_128 = arith.constant dense<0.000000e+00> : vector<1x128xf32>
    %159 = tpu.matmul %146, %158, %cst_128 {dimension_numbers = #tpu.dot_dimension_numbers<[1], [0], [0], [1], [0, 0, 1, 1], [], []>, precision = #tpu.contract_precision<fp32>} : vector<1x8xf32>, vector<8x128xf32>, vector<1x128xf32> -> vector<1x128xf32>
    %c0_129 = arith.constant 0 : index
    %c0_130 = arith.constant 0 : index
    %160 = vector.load %arg15[%c0_129, %c0_130] : memref<8x128xf32, #tpu.memory_space<vmem>>, vector<8x128xf32>
    %cst_131 = arith.constant dense<0.000000e+00> : vector<1x128xf32>
    %161 = tpu.matmul %157, %160, %cst_131 {dimension_numbers = #tpu.dot_dimension_numbers<[1], [0], [0], [1], [0, 0, 1, 1], [], []>, precision = #tpu.contract_precision<fp32>} : vector<1x8xf32>, vector<8x128xf32>, vector<1x128xf32> -> vector<1x128xf32>
    %162 = vector.broadcast %159 : vector<1x128xf32> to vector<32x128xf32>
    %163 = arith.subf %135, %162 : vector<32x128xf32>
    %164 = vector.broadcast %161 : vector<1x128xf32> to vector<32x128xf32>
    %165 = arith.mulf %163, %164 : vector<32x128xf32>
    %166 = vector.broadcast %136 : vector<1x128xf32> to vector<32x128xf32>
    %167 = arith.mulf %165, %166 : vector<32x128xf32>
    %168 = vector.broadcast %137 : vector<1x128xf32> to vector<32x128xf32>
    %169 = arith.addf %167, %168 : vector<32x128xf32>
    %170 = arith.addf %169, %44 : vector<32x128xf32>
    %cst_132 = arith.constant 0.000000e+00 : f32
    %171 = vector.broadcast %cst_132 : f32 to vector<32x128xf32>
    %172 = arith.maximumf %170, %171 : vector<32x128xf32>
    %c0_133 = arith.constant 0 : index
    %c0_134 = arith.constant 0 : index
    %173 = vector.load %arg16[%c0_133, %c0_134] : memref<32x128xf32, #tpu.memory_space<vmem>>, vector<32x128xf32>
    tpu.vector_store %arg16[%c0_133, %c0_134], %172 {strides = array<i32>} : memref<32x128xf32, #tpu.memory_space<vmem>>, vector<32x128xf32>,
    return
  }
  func.func @transform_0(%arg0: i32) -> (i32, i32) {
    %c0_i32 = arith.constant 0 : i32
    %c0_i32_0 = arith.constant 0 : i32
    %c0_i32_1 = arith.constant 0 : i32
    return %c0_i32, %c0_i32_0 : i32, i32
  }
  func.func @transform_1(%arg0: i32) -> (i32, i32, i32) {
    %c0_i32 = arith.constant 0 : i32
    %c0_i32_0 = arith.constant 0 : i32
    %c0_i32_1 = arith.constant 0 : i32
    %c0_i32_2 = arith.constant 0 : i32
    return %c0_i32, %c0_i32_0, %c0_i32_1 : i32, i32, i32
  }
  func.func @transform_2(%arg0: i32) -> (i32, i32, i32) {
    %c0_i32 = arith.constant 0 : i32
    %c0_i32_0 = arith.constant 0 : i32
    %c0_i32_1 = arith.constant 0 : i32
    %c0_i32_2 = arith.constant 0 : i32
    return %c0_i32, %c0_i32_0, %c0_i32_1 : i32, i32, i32
  }
  func.func @transform_3(%arg0: i32) -> (i32, i32) {
    %c0_i32 = arith.constant 0 : i32
    %c0_i32_0 = arith.constant 0 : i32
    %c0_i32_1 = arith.constant 0 : i32
    return %c0_i32, %c0_i32_0 : i32, i32
  }
  func.func @transform_4(%arg0: i32) -> (i32, i32) {
    %c0_i32 = arith.constant 0 : i32
    %c0_i32_0 = arith.constant 0 : i32
    %c0_i32_1 = arith.constant 0 : i32
    return %c0_i32, %c0_i32_0 : i32, i32
  }
  func.func @transform_5(%arg0: i32) -> (i32, i32) {
    %c0_i32 = arith.constant 0 : i32
    %c0_i32_0 = arith.constant 0 : i32
    %c0_i32_1 = arith.constant 0 : i32
    return %c0_i32, %c0_i32_0 : i32, i32
  }
  func.func @transform_6(%arg0: i32) -> (i32, i32) {
    %c0_i32 = arith.constant 0 : i32
    %c0_i32_0 = arith.constant 0 : i32
    %c0_i32_1 = arith.constant 0 : i32
    return %c0_i32, %c0_i32_0 : i32, i32
  }
  func.func @transform_7(%arg0: i32) -> (i32, i32) {
    %c0_i32 = arith.constant 0 : i32
    %c0_i32_0 = arith.constant 0 : i32
    %c0_i32_1 = arith.constant 0 : i32
    return %c0_i32, %c0_i32_0 : i32, i32
  }
  func.func @transform_8(%arg0: i32) -> (i32, i32) {
    %c0_i32 = arith.constant 0 : i32
    %c0_i32_0 = arith.constant 0 : i32
    %c0_i32_1 = arith.constant 0 : i32
    return %c0_i32, %c0_i32_0 : i32, i32
  }
  func.func @transform_9(%arg0: i32) -> (i32, i32) {
    %c0_i32 = arith.constant 0 : i32
    %c0_i32_0 = arith.constant 0 : i32
    %c0_i32_1 = arith.constant 0 : i32
    return %c0_i32, %c0_i32_0 : i32, i32
  }
  func.func @transform_10(%arg0: i32) -> (i32, i32) {
    %c0_i32 = arith.constant 0 : i32
    %c0_i32_0 = arith.constant 0 : i32
    %c0_i32_1 = arith.constant 0 : i32
    return %c0_i32, %c0_i32_0 : i32, i32
  }
  func.func @transform_11(%arg0: i32) -> (i32, i32) {
    %c0_i32 = arith.constant 0 : i32
    %c0_i32_0 = arith.constant 0 : i32
    %c0_i32_1 = arith.constant 0 : i32
    return %c0_i32, %c0_i32_0 : i32, i32
  }
  func.func @transform_12(%arg0: i32) -> (i32, i32) {
    %c0_i32 = arith.constant 0 : i32
    %c0_i32_0 = arith.constant 0 : i32
    %c0_i32_1 = arith.constant 0 : i32
    return %c0_i32, %c0_i32_0 : i32, i32
  }
  func.func @transform_13(%arg0: i32) -> (i32, i32) {
    %c0_i32 = arith.constant 0 : i32
    %c0_i32_0 = arith.constant 0 : i32
    %c0_i32_1 = arith.constant 0 : i32
    return %c0_i32, %c0_i32_0 : i32, i32
  }
  func.func @transform_14(%arg0: i32) -> (i32, i32) {
    %c0_i32 = arith.constant 0 : i32
    %c0_i32_0 = arith.constant 0 : i32
    %c0_i32_1 = arith.constant 0 : i32
    return %c0_i32, %c0_i32_0 : i32, i32
  }
  func.func @transform_15(%arg0: i32) -> (i32, i32) {
    %c0_i32 = arith.constant 0 : i32
    %c0_i32_0 = arith.constant 0 : i32
    %c0_i32_1 = arith.constant 0 : i32
    return %c0_i32, %c0_i32_0 : i32, i32
  }
}

</mosaic_0001>

<bundles_post_ra>
// kernel: conv_block_forward.1
= control target key start
LH: loop header
LB: loop body
LE: loop exit
PB: predicated region body
PF: predicated region fallthrough
CT: control target
= control target key end

     0   :  { %vm69_vm0 = vcmask 523264   ;;  %v13831_v3 = vmov 0.0   ;;  %v13829_v22 = vmov 0.0|0.0   ;;  %vm11382_vm1 = vmmov 0   ;;  %s13797_s3 = inlined_call_operand.vmem [shape: f32[64,128], index: 3, kind: input, shape index: {}]   ;;  %s13798_s0 = inlined_call_operand.vmem [shape: f32[32,64], index: 0, kind: input, shape index: {}]   ;;  %s13799_s13 = inlined_call_operand.vmem [shape: f32[128,8], index: 13, kind: input, shape index: {}]   ;;  %s13800_s6 = inlined_call_operand.vmem [shape: f32[1,128], index: 6, kind: input, shape index: {}]   ;;  %s13801_s14 = inlined_call_operand.vmem [shape: f32[8,128], index: 14, kind: input, shape index: {}]   ;;  %s13802_s1 = inlined_call_operand.vmem [shape: f32[3,64,128], index: 1, kind: input, shape index: {}]   ;;  %s13803_s4 = inlined_call_operand.vmem [shape: f32[1,128], index: 4, kind: input, shape index: {}]   ;;  %s13804_s2 = inlined_call_operand.vmem [shape: f32[3,128,128], index: 2, kind: input, shape index: {}]   ;;  %s13805_s7 = inlined_call_operand.vmem [shape: f32[1,128], index: 7, kind: input, shape index: {}]   ;;  %s13806_s8 = inlined_call_operand.vmem [shape: f32[1,128], index: 8, kind: input, shape index: {}]   ;;  %s13807_s5 = inlined_call_operand.vmem [shape: f32[1,128], index: 5, kind: input, shape index: {}]   ;;  %s13808_s11 = inlined_call_operand.vmem [shape: f32[1,128], index: 11, kind: input, shape index: {}]   ;;  %s13809_s9 = inlined_call_operand.vmem [shape: f32[1,128], index: 9, kind: input, shape index: {}]   ;;  %s13810_s12 = inlined_call_operand.vmem [shape: f32[1,128], index: 12, kind: input, shape index: {}]   ;;  %s13811_s10 = inlined_call_operand.vmem [shape: f32[1,128], index: 10, kind: input, shape index: {}]   ;;  %s13812_s15 = inlined_call_operand.vmem [shape: f32[32,128], index: 15, kind: output, shape index: {}]  }
   0x1   :  { %v54_v0 = vld [vmem:[%s13797_s3] sm:$0xff]  ;;  %v55_v1 = vld [vmem:[%s13797_s3 + $0x8] sm:$0xff]  ;;  %v56_v2 = vld [vmem:[%s13797_s3 + $0x10] sm:$0xff]  ;;  %2445 = vst.msk [vmem:[#allocation2 + $0x8] sm:$0xff] %vm69_vm0, %v13831_v3  ;;  %10224 = vmatprep.subr.bf16.mxu1 %v13829_v22  ;;  %8620 = vmatprep.mubr.msk.f32.mxu1 %vm11382_vm1, %v13831_v3  ;;  %vm2447_vm6 = vcmask 516096   ;;  %vm1509_vm7 = vcmask 64512  }
   0x2   :  { %2444 = vst.msk [vmem:[#allocation2] sm:$0xff] %vm69_vm0, %v13831_v3  ;;  %2446 = vst.msk [vmem:[#allocation2 + $0x10] sm:$0xff] %vm69_vm0, %v13831_v3  ;;  %v10208_v4 = vpack.c.bf16 %v55_v1, %v54_v0  ;;  %v57_v5 = vld [vmem:[%s13797_s3 + $0x18] sm:$0xff]  ;;  %v58_v7 = vld [vmem:[%s13797_s3 + $0x20] sm:$0xff] }
   0x3   :  { %2449 = vst.msk [vmem:[#allocation2 + $0x20] sm:$0xff] %vm69_vm0, %v13831_v3  ;;  %2450 = vst.msk [vmem:[#allocation2 + $0x28] sm:$0xff] %vm69_vm0, %v13831_v3  ;;  %v10212_v6 = vpack.c.bf16 %v57_v5, %v56_v2  ;;  %v59_v8 = vld [vmem:[%s13797_s3 + $0x28] sm:$0xff]  ;;  %v50_v9 = vld [vmem:[%s13798_s0] sm:$0xff] }
   0x4   :  { %2451 = vst.msk [vmem:[#allocation2 + $0x30] sm:$0xff] %vm69_vm0, %v13831_v3  ;;  %5077 = vst [vmem:[#allocation3] sm:$0xff] %v13831_v3  ;;  %10209 = vmatprep.subr.bf16.mxu0 %v10208_v4  ;;  %8582 = vmatprep.mubr.msk.f32.mxu0 %vm69_vm0, %v50_v9  ;;  %v51_v10 = vld [vmem:[%s13798_s0 + $0x8] sm:$0xff]  ;;  %v52_v11 = vld [vmem:[%s13798_s0 + $0x10] sm:$0xff]  ;;  %v10216_v13 = vpack.c.bf16 %v59_v8, %v58_v7 }
   0x5   :  { %5080 = vst [vmem:[#allocation3 + $0x18] sm:$0x1] %v13831_v3  ;;  %5081 = vst [vmem:[#allocation3 + $0x20] sm:$0xff] %v13831_v3  ;;  %v53_v12 = vld [vmem:[%s13798_s0 + $0x18] sm:$0xff]  ;;  %10211 = vmatpush3.bf16.msra.mxu0 %v10208_v4  ;;  %v60_v14 = vld [vmem:[%s13797_s3 + $0x30] sm:$0xff] }
   0x6   :  { %5084 = vst [vmem:[#allocation3 + $0x38] sm:$0x1] %v13831_v3  ;;  %2453 = vst.msk [vmem:[#allocation2 + $0x8] sm:$0xff] %vm69_vm0, %v50_v9  ;;  %10213 = vmatprep.subr.bf16.mxu0 %v10212_v6  ;;  %v61_v15 = vld [vmem:[%s13797_s3 + $0x38] sm:$0xff]  ;;  %v203_v17 = vld [vmem:[%s13799_s13] sm:$0xff] }
   0x7   :  { %2454 = vst.msk [vmem:[#allocation2 + $0x10] sm:$0xff] %vm69_vm0, %v51_v10  ;;  %2455 = vst.msk [vmem:[#allocation2 + $0x28] sm:$0xff] %vm69_vm0, %v52_v11  ;;  %v10220_v16 = vpack.c.bf16 %v61_v15, %v60_v14  ;;  %v204_v18 = vld [vmem:[%s13799_s13 + $0x8] sm:$0xff]  ;;  %v220_v19 = vand.u32 4294901760, %v203_v17  ;;  %v11536_v23 = vld [vmem:[%s13799_s13 + $0x10] sm:$0xff] }
   0x8   :  { %2456 = vst.msk [vmem:[#allocation2 + $0x30] sm:$0xff] %vm69_vm0, %v53_v12  ;;  %v223_v20 = vand.u32 4294901760, %v204_v18  ;;  %v11541_v24 = vld [vmem:[%s13799_s13 + $0x18] sm:$0xff]  ;;  %v226_v25 = vand.u32 4294901760, %v11536_v23  ;;  %v11558_v28 = vld [vmem:[%s13799_s13 + $0x20] sm:$0xff]  ;;  %v11563_v29 = vld [vmem:[%s13799_s13 + $0x28] sm:$0xff] }
   0x9   :  { %10215 = vmatpush3.bf16.msra.mxu0 %v10212_v6  ;;  %v229_v26 = vand.u32 4294901760, %v11541_v24  ;;  %v232_v30 = vand.u32 4294901760, %v11558_v28  ;;  %v235_v31 = vand.u32 4294901760, %v11563_v29  ;;  %v11580_v33 = vld [vmem:[%s13799_s13 + $0x30] sm:$0xff]  ;;  %v11585_v34 = vld [vmem:[%s13799_s13 + $0x38] sm:$0xff]  ;;  %v11602_v38 = vld [vmem:[%s13799_s13 + $0x40] sm:$0xff]  ;;  %v11665_v53 = vsub.f32 %v203_v17, %v220_v19 }
   0xa   :  { %10217 = vmatprep.subr.bf16.mxu0 %v10216_v13  ;;  %v11529_v21 = vpack.c.bf16 %v223_v20, %v220_v19  ;;  %v238_v35 = vand.u32 4294901760, %v11580_v33  ;;  %v241_v36 = vand.u32 4294901760, %v11585_v34  ;;  %v11607_v39 = vld [vmem:[%s13799_s13 + $0x48] sm:$0xff]  ;;  %v244_v40 = vand.u32 4294901760, %v11602_v38  ;;  %v11624_v43 = vld [vmem:[%s13799_s13 + $0x50] sm:$0xff]  ;;  %v11629_v44 = vld [vmem:[%s13799_s13 + $0x58] sm:$0xff] }
   0xb   :  { %v11553_v27 = vpack.c.bf16 %v229_v26, %v226_v25  ;;  %v11575_v32 = vpack.c.bf16 %v235_v31, %v232_v30  ;;  %v247_v41 = vand.u32 4294901760, %v11607_v39  ;;  %v250_v45 = vand.u32 4294901760, %v11624_v43  ;;  %v11646_v48 = vld [vmem:[%s13799_s13 + $0x60] sm:$0xff]  ;;  %v11651_v49 = vld [vmem:[%s13799_s13 + $0x68] sm:$0xff]  ;;  %v11672_v55 = vld [vmem:[%s13799_s13 + $0x70] sm:$0xff] }
   0xc   :  { %10226 = vmatpush3.bf16.msra.mxu1 %v11529_v21  ;;  %v11597_v37 = vpack.c.bf16 %v241_v36, %v238_v35  ;;  %v253_v46 = vand.u32 4294901760, %v11629_v44  ;;  %v256_v50 = vand.u32 4294901760, %v11646_v48  ;;  %v259_v51 = vand.u32 4294901760, %v11651_v49  ;;  %v11677_v56 = vld [vmem:[%s13799_s13 + $0x78] sm:$0xff] }
   0xd   :  { %10219 = vmatpush3.bf16.msra.mxu0 %v10216_v13  ;;  %10227 = vmatprep.subr.bf16.mxu1 %v13829_v22  ;;  %v11619_v42 = vpack.c.bf16 %v247_v41, %v244_v40  ;;  %v11667_v54 = vsub.f32 %v204_v18, %v223_v20  ;;  %v262_v57 = vand.u32 4294901760, %v11672_v55  ;;  %v265_v58 = vand.u32 4294901760, %v11677_v56 }
   0xe   :  { %10221 = vmatprep.subr.bf16.mxu0 %v10220_v16  ;;  %v11641_v47 = vpack.c.bf16 %v253_v46, %v250_v45  ;;  %v11663_v52 = vpack.c.bf16 %v259_v51, %v256_v50  ;;  %v13828_v59 = vand.u32 4294901760, %v11665_v53  ;;  %v11706_v0 = vsub.f32 %v11536_v23, %v226_v25 }
   0xf   :  { %v13827_v60 = vand.u32 4294901760, %v11667_v54  ;;  %v11691_v61 = vpack.c.bf16 %v265_v58, %v262_v57  ;;  %v11711_v1 = vsub.f32 %v11541_v24, %v229_v26  ;;  %v11747_v18 = vsub.f32 %v11580_v33, %v238_v35 }
  0x10   :  { %10229 = vmatpush3.bf16.msra.mxu1 %v11553_v27  ;;  %v314_v62 = vsub.f32 %v11665_v53, %v13828_v59  ;;  %v13826_v5 = vand.u32 4294901760, %v11706_v0  ;;  %v11752_v19 = vsub.f32 %v11585_v34, %v241_v36 }
  0x11   :  { %10223 = vmatpush3.bf16.msra.mxu0 %v10220_v16  ;;  %10230 = vmatprep.subr.bf16.mxu1 %v13829_v22  ;;  %v321_v63 = vsub.f32 %v11667_v54, %v13827_v60  ;;  %v13825_v6 = vand.u32 4294901760, %v11711_v1  ;;  %v13822_v24 = vand.u32 4294901760, %v11747_v18 }
  0x12   :  { %10368 = vmatprep.subr.bf16.mxu0 %v13829_v22  ;;  %v315_v2 = vand.u32 4294901760, %v314_v62  ;;  %v328_v8 = vsub.f32 %v11706_v0, %v13826_v5  ;;  %v13821_v25 = vand.u32 4294901760, %v11752_v19 }
  0x13   :  { %v322_v4 = vand.u32 4294901760, %v321_v63  ;;  %v335_v9 = vsub.f32 %v11711_v1, %v13825_v6 }
  0x14   :  { %8583 = vmatmul.mubr.msk.f32.vlgmr.msra.gmra.mrb[0].mxu0 %vm69_vm0, %v51_v10  ;;  %10232 = vmatpush3.bf16.msra.mxu1 %v11575_v32  ;;  %v11730_v10 = vsub.f32 %v11558_v28, %v232_v30  ;;  %v356_v28 = vsub.f32 %v11747_v18, %v13822_v24  ;;  %v11768_v30 = vsub.f32 %v11602_v38, %v244_v40 }
  0x15   :  { %8585 = vmatprep.mubr.msk.f32.mxu0 %vm69_vm0, %v52_v11  ;;  %10370 = vmatpush3.bf16.msra.mxu0 %v11529_v21  ;;  %v11719_v7 = vpack.c.bf16 %v322_v4, %v315_v2  ;;  %v11735_v11 = vsub.f32 %v11563_v29, %v235_v31  ;;  %v336_v13 = vand.u32 4294901760, %v335_v9  ;;  %v363_v29 = vsub.f32 %v11752_v19, %v13821_v25 }
  0x16   :  { %10371 = vmatprep.subr.bf16.mxu0 %v13829_v22  ;;  %10233 = vmatprep.subr.bf16.mxu1 %v13829_v22  ;;  %v13824_v14 = vand.u32 4294901760, %v11730_v10  ;;  %v11773_v31 = vsub.f32 %v11607_v39, %v247_v41  ;;  %v357_v34 = vand.u32 4294901760, %v356_v28  ;;  %v13820_v36 = vand.u32 4294901760, %v11768_v30 }
  0x17   :  { %v13823_v15 = vand.u32 4294901760, %v11735_v11  ;;  %v364_v35 = vand.u32 4294901760, %v363_v29  ;;  %v11790_v39 = vsub.f32 %v11624_v43, %v250_v45  ;;  %v11795_v41 = vsub.f32 %v11629_v44, %v253_v46 }
  0x18   :  { %8586 = vmatmul.mubr.msk.f32.gmra.mrb[2].mxu0 %vm69_vm0, %v53_v12  ;;  %10235 = vmatpush3.bf16.msra.mxu1 %v11597_v37  ;;  %v329_v12 = vand.u32 4294901760, %v328_v8  ;;  %v342_v17 = vsub.f32 %v11730_v10, %v13824_v14  ;;  %v13819_v62 = vand.u32 4294901760, %v11773_v31  ;;  %v370_v38 = vsub.f32 %v11768_v30, %v13820_v36 }
  0x19   :  { %10373 = vmatpush3.bf16.msra.mxu0 %v11553_v27  ;;  %10236 = vmatprep.subr.bf16.mxu1 %v13829_v22  ;;  %v349_v20 = vsub.f32 %v11735_v11, %v13823_v15  ;;  %v11779_v63 = vpack.c.bf16 %v364_v35, %v357_v34  ;;  %v13818_v8 = vand.u32 4294901760, %v11790_v39  ;;  %v13817_v9 = vand.u32 4294901760, %v11795_v41 }
  0x1a   :  { %10374 = vmatprep.subr.bf16.mxu0 %v13829_v22  ;;  %8830 = vmatprep.mubr.msk.f32.mxu0 %vm11382_vm1, %v13831_v3  ;;  %v11739_v16 = vpack.c.bf16 %v336_v13, %v329_v12  ;;  %v343_v23 = vand.u32 4294901760, %v342_v17  ;;  %v377_v40 = vsub.f32 %v11773_v31, %v13819_v62  ;;  %v371_v2 = vand.u32 4294901760, %v370_v38 }
  0x1b   :  { %v350_v26 = vand.u32 4294901760, %v349_v20  ;;  %v384_v13 = vsub.f32 %v11790_v39, %v13818_v8  ;;  %v11807_v43 = vsub.f32 %v11646_v48, %v256_v50  ;;  %v11812_v44 = vsub.f32 %v11651_v49, %v259_v51 }
  0x1c   :  { %10238 = vmatpush3.bf16.msra.mxu1 %v11619_v42  ;;  %v378_v4 = vand.u32 4294901760, %v377_v40  ;;  %v391_v45 = vsub.f32 %v11795_v41, %v13817_v9  ;;  %v11828_v49 = vsub.f32 %v11672_v55, %v262_v57  ;;  %v11833_v51 = vsub.f32 %v11677_v56, %v265_v58 }
  0x1d   :  { %10376 = vmatpush3.bf16.msra.mxu0 %v11575_v32  ;;  %10239 = vmatprep.subr.bf16.mxu1 %v13829_v22  ;;  %v11775_v33 = vpack.c.bf16 %v350_v26, %v343_v23  ;;  %v385_v46 = vand.u32 4294901760, %v384_v13  ;;  %v13816_v17 = vand.u32 4294901760, %v11807_v43  ;;  %v13815_v20 = vand.u32 4294901760, %v11812_v44 }
  0x1e   :  { %10377 = vmatprep.subr.bf16.mxu0 %v13829_v22  ;;  %v11799_v12 = vpack.c.bf16 %v378_v4, %v371_v2  ;;  %v392_v23 = vand.u32 4294901760, %v391_v45  ;;  %v13814_v34 = vand.u32 4294901760, %v11828_v49  ;;  %v13813_v35 = vand.u32 4294901760, %v11833_v51 }
  0x1f   :  { %v398_v48 = vsub.f32 %v11807_v43, %v13816_v17  ;;  %v405_v50 = vsub.f32 %v11812_v44, %v13815_v20  ;;  %v11851_v2 = vpack.c.bf16 %v11667_v54, %v11665_v53  ;;  %v11855_v4 = vpack.c.bf16 %v11711_v1, %v11706_v0 }
  0x20   :  { %10241 = vmatpush3.bf16.msra.mxu1 %v11641_v47  ;;  %v11835_v26 = vpack.c.bf16 %v392_v23, %v385_v46  ;;  %v412_v55 = vsub.f32 %v11828_v49, %v13814_v34  ;;  %v419_v57 = vsub.f32 %v11833_v51, %v13813_v35  ;;  %v11859_v13 = vpack.c.bf16 %v11735_v11, %v11730_v10 }
  0x21   :  { %10379 = vmatpush3.bf16.msra.mxu0 %v11597_v37  ;;  %10242 = vmatprep.subr.bf16.mxu1 %v13829_v22  ;;  %v399_v28 = vand.u32 4294901760, %v398_v48  ;;  %v406_v29 = vand.u32 4294901760, %v405_v50  ;;  %v11863_v45 = vpack.c.bf16 %v11752_v19, %v11747_v18  ;;  %v11867_v46 = vpack.c.bf16 %v11773_v31, %v11768_v30 }
  0x22   :  { %10380 = vmatprep.subr.bf16.mxu0 %v13829_v22  ;;  %v413_v56 = vand.u32 4294901760, %v412_v55  ;;  %v420_v58 = vand.u32 4294901760, %v419_v57  ;;  %v11871_v23 = vpack.c.bf16 %v11795_v41, %v11790_v39  ;;  %v11875_v48 = vpack.c.bf16 %v11812_v44, %v11807_v43 }
  0x23   :  { %v11839_v38 = vpack.c.bf16 %v406_v29, %v399_v28  ;;  %v11879_v50 = vpack.c.bf16 %v11833_v51, %v11828_v49  ;;  %v7701_v28 = vld [vmem:[%s13800_s6] ss:$0 sm:$0xff] }
  0x24   :  { %10244 = vmatpush3.bf16.msra.mxu1 %v11663_v52  ;;  %v11847_v40 = vpack.c.bf16 %v420_v58, %v413_v56 }
  0x25   :  { %10382 = vmatpush3.bf16.msra.mxu0 %v11619_v42  ;;  %10245 = vmatprep.subr.bf16.mxu1 %v13829_v22 }
  0x26   :  { %10383 = vmatprep.subr.bf16.mxu0 %v13829_v22 }
  0x28   :  { %10247 = vmatpush3.bf16.msra.mxu1 %v11691_v61 }
  0x29   :  { %10385 = vmatpush3.bf16.msra.mxu0 %v11641_v47  ;;  %10248 = vmatprep.subr.bf16.mxu1 %v13829_v22 }
  0x2a   :  { %10386 = vmatprep.subr.bf16.mxu0 %v13829_v22 }
  0x2d   :  { %10388 = vmatpush3.bf16.msra.mxu0 %v11663_v52 }
  0x2e   :  { %10389 = vmatprep.subr.bf16.mxu0 %v13829_v22 }
  0x31   :  { %10391 = vmatpush3.bf16.msra.mxu0 %v11691_v61 }
  0x32   :  { %10392 = vmatprep.subr.bf16.mxu0 %v13829_v22 }
  0xe7   :  { %v8584_v29 = vpop.f32.mrb[0].mxu0 }
  0xe8   :  { %v154_v55 = vadd.f32 %v8584_v29, %v7701_v28  ;;  %v148_v57 = vpop.f32.mrb[1].mxu0 }
  0xe9   :  { %v149_v56 = vadd.f32 %v7701_v28, %v148_v57 }
  0xea   :  { %vm168_vm2 = vcmp.gt.f32.partialorder %v154_v55, 0.0  ;;  %v172_v58 = vmul.f32 0.01, %v154_v55 }
  0xeb   :  { %vm167_vm3 = vcmp.gt.f32.partialorder %v149_v56, 0.0  ;;  %v171_v35 = vmul.f32 0.01, %v149_v56  ;;  %v8587_v34 = vpop.f32.mrb[2].mxu0 }
  0xec   :  { %v11884_v20 = vsel %vm168_vm2, %v154_v55, %v172_v58  ;;  %v164_v17 = vadd.f32 %v8587_v34, %v7701_v28  ;;  %v158_v9 = vpop.f32.mrb[3].mxu0 }
  0xed   :  { %v11886_v8 = vsel %vm167_vm3, %v149_v56, %v171_v35  ;;  %v159_v62 = vadd.f32 %v7701_v28, %v158_v9  ;;  %v191_v36 = vmul.f32 %v11884_v20, %v11884_v20 }
  0xee   :  { %v190_v29 = vmul.f32 %v11886_v8, %v11886_v8  ;;  %vm170_vm4 = vcmp.gt.f32.partialorder %v164_v17, 0.0  ;;  %v174_v57 = vmul.f32 0.01, %v164_v17  ;;  %v181_v24 = vadd.f32 %v11884_v20, %v11886_v8 }
  0xef   :  { %vm169_vm5 = vcmp.gt.f32.partialorder %v159_v62, 0.0  ;;  %v173_v25 = vmul.f32 0.01, %v159_v62 }
  0xf0   :  { %v11894_v55 = vsel %vm170_vm4, %v164_v17, %v174_v57  ;;  %v194_v35 = vadd.f32 %v191_v36, %v190_v29 }
  0xf1   :  { %v11896_v34 = vsel %vm169_vm5, %v159_v62, %v173_v25  ;;  %v193_v56 = vmul.f32 %v11894_v55, %v11894_v55 }
  0xf2   :  { %13875 = vst [vmem:[#allocation4_spill] sm:$0xff] %v11896_v34  ;;  %v182_v9 = vadd.f32 %v181_v24, %v11896_v34  ;;  %v192_v28 = vmul.f32 %v11896_v34, %v11896_v34 }
  0xf4   :  { %v183_v58 = vadd.f32 %v182_v9, %v11894_v55  ;;  %v195_v15 = vadd.f32 %v194_v35, %v192_v28 }
  0xf6   :  { %v184_v14 = vrot.slane %v183_v58, 4  ;;  %v196_v6 = vadd.f32 %v195_v15, %v193_v56 }
  0xf8   :  { %v185_v5 = vadd.f32 %v184_v14, %v183_v58  ;;  %v197_v60 = vrot.slane %v196_v6, 4 }
  0xfa   :  { %v186_v17 = vrot.slane %v185_v5, 2  ;;  %v198_v57 = vadd.f32 %v197_v60, %v196_v6 }
  0xfc   :  { %v199_v25 = vrot.slane %v198_v57, 2  ;;  %v187_v62 = vadd.f32 %v186_v17, %v185_v5 }
  0xfe   :  { %v200_v36 = vadd.f32 %v199_v25, %v198_v57  ;;  %v188_v29 = vrot.slane %v187_v62, 1 }
 0x100   :  { %v201_v24 = vrot.slane %v200_v36, 1  ;;  %v189_v59 = vadd.f32 %v188_v29, %v187_v62 }
 0x102   :  { %v202_v22 = vadd.f32 %v201_v24, %v200_v36  ;;  %v11904_v3 = vand.u32 4294901760, %v189_v59 }
 0x104   :  { %v11906_v34 = vand.u32 4294901760, %v202_v22  ;;  %v11909_v9 = vsub.f32 %v189_v59, %v11904_v3  ;;  %v13876_v59 = vmov 0.0  }
 0x105   :  { %2448 = vst.msk [vmem:[#allocation2 + $0x18] sm:$0x1] %vm2447_vm6, %v13876_v59  ;;  %2452 = vst.msk [vmem:[#allocation2 + $0x38] sm:$0x1] %vm2447_vm6, %v13876_v59 }
 0x106   :  { %v302_v15 = vand.u32 4294901760, %v11909_v9  ;;  %v11913_v14 = vsub.f32 %v202_v22, %v11906_v34  ;;  %v13877_v22 = vmov 0.0|0.0  }
 0x108   :  { %v303_v60 = vsub.f32 %v11909_v9, %v302_v15  ;;  %v944_v5 = vand.u32 4294901760, %v11913_v14 }
 0x10a   :  { %v304_v6 = vand.u32 4294901760, %v303_v60  ;;  %v945_v35 = vsub.f32 %v11913_v14, %v944_v5  ;;  %v2462_v60 = vld [vmem:[%s13802_s1 + $0x8] sm:$0xff] }
 0x10c   :  { %8621 = vmatmul.mubr.f32.vlgmr.msra.gmra.mrb[0].mxu1 %v304_v6  ;;  %v946_v28 = vand.u32 4294901760, %v945_v35  ;;  %v2463_v6 = vld [vmem:[%s13802_s1 + $0x10] sm:$0xff]  ;;  %v2464_v35 = vld [vmem:[%s13802_s1 + $0x18] sm:$0xff] }
 0x10d   :  { %10250 = vmatpush3.bf16.msra.mxu1 %v11719_v7  ;;  %8655 = vmatprep.mubr.msk.f32.mxu1 %vm11382_vm1, %v13876_v59 }
 0x10e   :  { %8831 = vmatmul.mubr.f32.vlgmr.msra.gmra.mrb[4].mxu0 %v946_v28  ;;  %10251 = vmatprep.subr.bf16.mxu1 %v13877_v22  ;;  %v12191_v28 = vld [vmem:[#allocation3] sm:$0xff] }
 0x10f   :  { %10394 = vmatpush3.bf16.msra.mxu0 %v11719_v7  ;;  %8865 = vmatprep.mubr.msk.f32.mxu0 %vm11382_vm1, %v13876_v59  ;;  %v13878_v7 = vand.u32 4294901760, %v11665_v53  ;;  %v13882_v53 = vand.u32 4294901760, %v11730_v10  ;;  %v13886_v10 = vand.u32 4294901760, %v11768_v30  ;;  %v13890_v30 = vand.u32 4294901760, %v11807_v43 }
 0x110   :  { %10395 = vmatprep.subr.bf16.mxu0 %v13877_v22 }
 0x111   :  { %10253 = vmatpush3.bf16.msra.mxu1 %v11739_v16 }
 0x112   :  { %10254 = vmatprep.subr.bf16.mxu1 %v13877_v22 }
 0x113   :  { %10397 = vmatpush3.bf16.msra.mxu0 %v11739_v16  ;;  %v13879_v16 = vand.u32 4294901760, %v11667_v54  ;;  %v13883_v54 = vand.u32 4294901760, %v11735_v11  ;;  %v13887_v11 = vand.u32 4294901760, %v11773_v31  ;;  %v13891_v31 = vand.u32 4294901760, %v11812_v44 }
 0x114   :  { %10398 = vmatprep.subr.bf16.mxu0 %v13877_v22 }
 0x115   :  { %10256 = vmatpush3.bf16.msra.mxu1 %v11775_v33 }
 0x116   :  { %10257 = vmatprep.subr.bf16.mxu1 %v13877_v22 }
 0x117   :  { %10400 = vmatpush3.bf16.msra.mxu0 %v11775_v33  ;;  %v10321_v33 = vpack.c.bf16 %v13879_v16, %v13878_v7  ;;  %v2457_v7 = vld [vmem:[#allocation2 + $0x7] sm:$0xff] }
 0x118   :  { %10401 = vmatprep.subr.bf16.mxu0 %v13877_v22  ;;  %v2465_v16 = vld [vmem:[%s13802_s1 + $0x20] sm:$0xff] }
 0x119   :  { %10259 = vmatpush3.bf16.msra.mxu1 %v11779_v63 }
 0x11a   :  { %10260 = vmatprep.subr.bf16.mxu1 %v13877_v22 }
 0x11b   :  { %10403 = vmatpush3.bf16.msra.mxu0 %v11779_v63  ;;  %v13880_v63 = vand.u32 4294901760, %v11706_v0  ;;  %v10327_v0 = vpack.c.bf16 %v13883_v54, %v13882_v53  ;;  %v7708_v54 = vld [vmem:[%s13802_s1 + $0x40] sm:$0xff] }
 0x11c   :  { %10404 = vmatprep.subr.bf16.mxu0 %v13877_v22 }
 0x11d   :  { %10262 = vmatpush3.bf16.msra.mxu1 %v11799_v12 }
 0x11e   :  { %10263 = vmatprep.subr.bf16.mxu1 %v13877_v22 }
 0x11f   :  { %10406 = vmatpush3.bf16.msra.mxu0 %v11799_v12  ;;  %v13881_v12 = vand.u32 4294901760, %v11711_v1  ;;  %v13884_v1 = vand.u32 4294901760, %v11747_v18  ;;  %v13888_v18 = vand.u32 4294901760, %v11790_v39  ;;  %v13892_v39 = vand.u32 4294901760, %v11828_v49 }
 0x120   :  { %10407 = vmatprep.subr.bf16.mxu0 %v13877_v22 }
 0x121   :  { %10265 = vmatpush3.bf16.msra.mxu1 %v11835_v26 }
 0x122   :  { %10266 = vmatprep.subr.bf16.mxu1 %v13877_v22 }
 0x123   :  { %10409 = vmatpush3.bf16.msra.mxu0 %v11835_v26  ;;  %v10324_v26 = vpack.c.bf16 %v13881_v12, %v13880_v63  ;;  %v2467_v12 = vld [vmem:[%s13802_s1 + $0x30] sm:$0xff] }
 0x124   :  { %10410 = vmatprep.subr.bf16.mxu0 %v13877_v22 }
 0x125   :  { %10268 = vmatpush3.bf16.msra.mxu1 %v11839_v38 }
 0x126   :  { %10269 = vmatprep.subr.bf16.mxu1 %v13877_v22 }
 0x127   :  { %10412 = vmatpush3.bf16.msra.mxu0 %v11839_v38  ;;  %v13885_v38 = vand.u32 4294901760, %v11752_v19  ;;  %v13889_v19 = vand.u32 4294901760, %v11795_v41  ;;  %v13893_v41 = vand.u32 4294901760, %v11833_v51 }
 0x128   :  { %10413 = vmatprep.subr.bf16.mxu0 %v13877_v22 }
 0x129   :  { %10271 = vmatpush3.bf16.msra.mxu1 %v11847_v40 }
 0x12a   :  { %10272 = vmatprep.subr.bf16.mxu1 %v13877_v22 }
 0x12b   :  { %10415 = vmatpush3.bf16.msra.mxu0 %v11847_v40  ;;  %v10330_v40 = vpack.c.bf16 %v13885_v38, %v13884_v1  ;;  %v7724_v1 = vld [vmem:[%s13802_s1 + $0x80] sm:$0xff]  ;;  %v7725_v38 = vld [vmem:[%s13802_s1 + $0x88] sm:$0xff] }
 0x12c   :  { %8656 = vmatmul.mubr.f32.vlgmr.msra.gmra.mrb[0].mxu1 %v11904_v3  ;;  %10416 = vmatprep.subr.bf16.mxu0 %v13877_v22 }
 0x12d   :  { %10274 = vmatpush3.bf16.msra.mxu1 %v11851_v2  ;;  %8690 = vmatprep.mubr.msk.f32.mxu1 %vm11382_vm1, %v13876_v59 }
 0x12e   :  { %8866 = vmatmul.mubr.f32.vlgmr.msra.gmra.mrb[4].mxu0 %v11906_v34  ;;  %10275 = vmatprep.subr.bf16.mxu1 %v13877_v22 }
 0x12f   :  { %10418 = vmatpush3.bf16.msra.mxu0 %v11851_v2  ;;  %8900 = vmatprep.mubr.msk.f32.mxu0 %vm11382_vm1, %v13876_v59  ;;  %v10333_v2 = vpack.c.bf16 %v13887_v11, %v13886_v10  ;;  %v10544_v10 = vpack.c.bf16 %v7725_v38, %v7724_v1  ;;  %v7726_v11 = vld [vmem:[%s13802_s1 + $0x90] sm:$0xff]  ;;  %v12387_v1 = vld [vmem:[%s13799_s13 + $0x58] sm:$0xff] }
 0x130   :  { %10419 = vmatprep.subr.bf16.mxu0 %v13877_v22 }
 0x131   :  { %10277 = vmatpush3.bf16.msra.mxu1 %v11855_v4 }
 0x132   :  { %10278 = vmatprep.subr.bf16.mxu1 %v13877_v22 }
 0x133   :  { %10421 = vmatpush3.bf16.msra.mxu0 %v11855_v4  ;;  %v10336_v4 = vpack.c.bf16 %v13889_v19, %v13888_v18  ;;  %v2458_v18 = vld [vmem:[#allocation2 + $0xf] sm:$0xff] }
 0x134   :  { %10422 = vmatprep.subr.bf16.mxu0 %v13877_v22 }
 0x135   :  { %10280 = vmatpush3.bf16.msra.mxu1 %v11859_v13 }
 0x136   :  { %10281 = vmatprep.subr.bf16.mxu1 %v13877_v22 }
 0x137   :  { %10424 = vmatpush3.bf16.msra.mxu0 %v11859_v13  ;;  %v10339_v13 = vpack.c.bf16 %v13891_v31, %v13890_v30  ;;  %v7711_v30 = vld [vmem:[%s13802_s1 + $0x58] sm:$0xff]  ;;  %v2459_v31 = vld [vmem:[#allocation2 + $0x27] sm:$0xff] }
 0x138   :  { %10425 = vmatprep.subr.bf16.mxu0 %v13877_v22 }
 0x139   :  { %10283 = vmatpush3.bf16.msra.mxu1 %v11863_v45 }
 0x13a   :  { %10284 = vmatprep.subr.bf16.mxu1 %v13877_v22 }
 0x13b   :  { %10427 = vmatpush3.bf16.msra.mxu0 %v11863_v45  ;;  %v10342_v45 = vpack.c.bf16 %v13893_v41, %v13892_v39  ;;  %v7729_v39 = vld [vmem:[%s13802_s1 + $0xa8] sm:$0xff] }
 0x13c   :  { %10428 = vmatprep.subr.bf16.mxu0 %v13877_v22 }
 0x13d   :  { %10286 = vmatpush3.bf16.msra.mxu1 %v11867_v46 }
 0x13e   :  { %10287 = vmatprep.subr.bf16.mxu1 %v13877_v22 }
 0x13f   :  { %10430 = vmatpush3.bf16.msra.mxu0 %v11867_v46 }
 0x140   :  { %10431 = vmatprep.subr.bf16.mxu0 %v13877_v22 }
 0x141   :  { %10289 = vmatpush3.bf16.msra.mxu1 %v11871_v23 }
 0x142   :  { %10290 = vmatprep.subr.bf16.mxu1 %v13877_v22 }
 0x143   :  { %10433 = vmatpush3.bf16.msra.mxu0 %v11871_v23 }
 0x144   :  { %10434 = vmatprep.subr.bf16.mxu0 %v13877_v22 }
 0x145   :  { %10292 = vmatpush3.bf16.msra.mxu1 %v11875_v48 }
 0x146   :  { %10293 = vmatprep.subr.bf16.mxu1 %v13877_v22 }
 0x147   :  { %10436 = vmatpush3.bf16.msra.mxu0 %v11875_v48 }
 0x148   :  { %10437 = vmatprep.subr.bf16.mxu0 %v13877_v22 }
 0x149   :  { %10295 = vmatpush3.bf16.msra.mxu1 %v11879_v50 }
 0x14a   :  { %10296 = vmatprep.subr.bf16.mxu1 %v13877_v22 }
 0x14b   :  { %10439 = vmatpush3.bf16.msra.mxu0 %v11879_v50 }
 0x14c   :  { %8691 = vmatmul.mubr.f32.vlgmr.msra.gmra.mrb[0].mxu1 %v11909_v9  ;;  %10440 = vmatprep.subr.bf16.mxu0 %v13877_v22 }
 0x14d   :  { %10298 = vmatpush3.bf16.msra.mxu1 %v11529_v21  ;;  %8725 = vmatprep.mubr.msk.f32.mxu1 %vm11382_vm1, %v13876_v59 }
 0x14e   :  { %8901 = vmatmul.mubr.f32.vlgmr.msra.gmra.mrb[4].mxu0 %v11913_v14  ;;  %10299 = vmatprep.subr.bf16.mxu1 %v13877_v22  ;;  %v2461_v14 = vld [vmem:[%s13802_s1] sm:$0xff] }
 0x14f   :  { %10442 = vmatpush3.bf16.msra.mxu0 %v11529_v21  ;;  %8935 = vmatprep.mubr.msk.f32.mxu0 %vm11382_vm1, %v13876_v59 }
 0x150   :  { %10443 = vmatprep.subr.bf16.mxu0 %v13877_v22 }
 0x151   :  { %10301 = vmatpush3.bf16.msra.mxu1 %v11553_v27 }
 0x152   :  { %10302 = vmatprep.subr.bf16.mxu1 %v13877_v22 }
 0x153   :  { %10445 = vmatpush3.bf16.msra.mxu0 %v11553_v27 }
 0x154   :  { %10446 = vmatprep.subr.bf16.mxu0 %v13877_v22 }
 0x155   :  { %10304 = vmatpush3.bf16.msra.mxu1 %v11575_v32 }
 0x156   :  { %10305 = vmatprep.subr.bf16.mxu1 %v13877_v22 }
 0x157   :  { %10448 = vmatpush3.bf16.msra.mxu0 %v11575_v32 }
 0x158   :  { %10449 = vmatprep.subr.bf16.mxu0 %v13877_v22 }
 0x159   :  { %10307 = vmatpush3.bf16.msra.mxu1 %v11597_v37 }
 0x15a   :  { %10308 = vmatprep.subr.bf16.mxu1 %v13877_v22 }
 0x15b   :  { %10451 = vmatpush3.bf16.msra.mxu0 %v11597_v37 }
 0x15c   :  { %10452 = vmatprep.subr.bf16.mxu0 %v13877_v22 }
 0x15d   :  { %10310 = vmatpush3.bf16.msra.mxu1 %v11619_v42 }
 0x15e   :  { %10311 = vmatprep.subr.bf16.mxu1 %v13877_v22 }
 0x15f   :  { %10454 = vmatpush3.bf16.msra.mxu0 %v11619_v42 }
 0x160   :  { %10455 = vmatprep.subr.bf16.mxu0 %v13877_v22 }
 0x161   :  { %10313 = vmatpush3.bf16.msra.mxu1 %v11641_v47 }
 0x162   :  { %10314 = vmatprep.subr.bf16.mxu1 %v13877_v22 }
 0x163   :  { %10457 = vmatpush3.bf16.msra.mxu0 %v11641_v47 }
 0x164   :  { %10458 = vmatprep.subr.bf16.mxu0 %v13877_v22 }
 0x165   :  { %10316 = vmatpush3.bf16.msra.mxu1 %v11663_v52 }
 0x166   :  { %10317 = vmatprep.subr.bf16.mxu1 %v13877_v22 }
 0x167   :  { %10460 = vmatpush3.bf16.msra.mxu0 %v11663_v52 }
 0x168   :  { %10461 = vmatprep.subr.bf16.mxu0 %v13877_v22 }
 0x169   :  { %10319 = vmatpush3.bf16.msra.mxu1 %v11691_v61 }
 0x16a   :  { %10320 = vmatprep.subr.bf16.mxu1 %v13877_v22 }
 0x16b   :  { %10463 = vmatpush3.bf16.msra.mxu0 %v11691_v61 }
 0x16c   :  { %8726 = vmatmul.mubr.f32.vlgmr.msra.gmra.mrb[0].mxu1 %v302_v15  ;;  %10464 = vmatprep.subr.bf16.mxu0 %v13877_v22 }
 0x16d   :  { %10322 = vmatpush3.bf16.msra.mxu1 %v10321_v33  ;;  %8760 = vmatprep.mubr.msk.f32.mxu1 %vm11382_vm1, %v13876_v59 }
 0x16e   :  { %8936 = vmatmul.mubr.f32.vlgmr.msra.gmra.mrb[4].mxu0 %v944_v5  ;;  %10323 = vmatprep.subr.bf16.mxu1 %v13877_v22  ;;  %v10528_v5 = vpack.c.bf16 %v2462_v60, %v2461_v14  ;;  %v12321_v14 = vld [vmem:[%s13799_s13 + $0x28] sm:$0xff] }
 0x16f   :  { %10466 = vmatpush3.bf16.msra.mxu0 %v10321_v33  ;;  %8970 = vmatprep.mubr.msk.f32.mxu0 %vm11382_vm1, %v13876_v59  ;;  %v2466_v33 = vld [vmem:[%s13802_s1 + $0x28] sm:$0xff] }
 0x170   :  { %10467 = vmatprep.subr.bf16.mxu0 %v13877_v22  ;;  %v10536_v63 = vpack.c.bf16 %v2466_v33, %v2465_v16 }
 0x171   :  { %10325 = vmatpush3.bf16.msra.mxu1 %v10324_v26 }
 0x172   :  { %10326 = vmatprep.subr.bf16.mxu1 %v13877_v22 }
 0x173   :  { %10469 = vmatpush3.bf16.msra.mxu0 %v10324_v26  ;;  %v2468_v26 = vld [vmem:[%s13802_s1 + $0x38] sm:$0xff] }
 0x174   :  { %10470 = vmatprep.subr.bf16.mxu0 %v13877_v22  ;;  %v10540_v53 = vpack.c.bf16 %v2468_v26, %v2467_v12  ;;  %v12365_v12 = vld [vmem:[%s13799_s13 + $0x48] sm:$0xff] }
 0x175   :  { %10328 = vmatpush3.bf16.msra.mxu1 %v10327_v0 }
 0x176   :  { %10329 = vmatprep.subr.bf16.mxu1 %v13877_v22 }
 0x177   :  { %10472 = vmatpush3.bf16.msra.mxu0 %v10327_v0  ;;  %v7709_v0 = vld [vmem:[%s13802_s1 + $0x48] sm:$0xff] }
 0x178   :  { %10473 = vmatprep.subr.bf16.mxu0 %v13877_v22 }
 0x179   :  { %10331 = vmatpush3.bf16.msra.mxu1 %v10330_v40 }
 0x17a   :  { %10332 = vmatprep.subr.bf16.mxu1 %v13877_v22 }
 0x17b   :  { %10475 = vmatpush3.bf16.msra.mxu0 %v10330_v40  ;;  %v10512_v40 = vpack.c.bf16 %v7709_v0, %v7708_v54  ;;  %v12382_v0 = vld [vmem:[%s13799_s13 + $0x50] sm:$0xff] }
 0x17c   :  { %10476 = vmatprep.subr.bf16.mxu0 %v13877_v22  ;;  %v2884_v38 = vand.u32 4294901760, %v12382_v0 }
 0x17d   :  { %10334 = vmatpush3.bf16.msra.mxu1 %v10333_v2 }
 0x17e   :  { %10335 = vmatprep.subr.bf16.mxu1 %v13877_v22 }
 0x17f   :  { %10478 = vmatpush3.bf16.msra.mxu0 %v10333_v2  ;;  %v7727_v2 = vld [vmem:[%s13802_s1 + $0x98] sm:$0xff] }
 0x180   :  { %10479 = vmatprep.subr.bf16.mxu0 %v13877_v22  ;;  %v10548_v19 = vpack.c.bf16 %v7727_v2, %v7726_v11  ;;  %v12404_v11 = vld [vmem:[%s13799_s13 + $0x60] sm:$0xff]  ;;  %v12409_v2 = vld [vmem:[%s13799_s13 + $0x68] sm:$0xff] }
 0x181   :  { %10337 = vmatpush3.bf16.msra.mxu1 %v10336_v4 }
 0x182   :  { %10338 = vmatprep.subr.bf16.mxu1 %v13877_v22 }
 0x183   :  { %10481 = vmatpush3.bf16.msra.mxu0 %v10336_v4  ;;  %v7710_v4 = vld [vmem:[%s13802_s1 + $0x50] sm:$0xff] }
 0x184   :  { %10482 = vmatprep.subr.bf16.mxu0 %v13877_v22  ;;  %v10516_v41 = vpack.c.bf16 %v7711_v30, %v7710_v4  ;;  %v12426_v30 = vld [vmem:[%s13799_s13 + $0x70] sm:$0xff] }
 0x185   :  { %10340 = vmatpush3.bf16.msra.mxu1 %v10339_v13 }
 0x186   :  { %10341 = vmatprep.subr.bf16.mxu1 %v13877_v22 }
 0x187   :  { %10484 = vmatpush3.bf16.msra.mxu0 %v10339_v13  ;;  %v7728_v13 = vld [vmem:[%s13802_s1 + $0xa0] sm:$0xff] }
 0x188   :  { %10485 = vmatprep.subr.bf16.mxu0 %v13877_v22 }
 0x189   :  { %10343 = vmatpush3.bf16.msra.mxu1 %v10342_v45 }
 0x18a   :  { %10344 = vmatprep.subr.bf16.mxu1 %v13877_v22 }
 0x18b   :  { %10487 = vmatpush3.bf16.msra.mxu0 %v10342_v45  ;;  %v2460_v45 = vld [vmem:[#allocation2 + $0x2f] sm:$0xff] }
 0x18c   :  { %8761 = vmatmul.mubr.f32.vlgmr.msra.gmra.mrb[0].mxu1 %v11904_v3  ;;  %10488 = vmatprep.subr.bf16.mxu0 %v13877_v22 }
 0x18d   :  { %10346 = vmatpush3.bf16.msra.mxu1 %v11529_v21  ;;  %8795 = vmatprep.mubr.msk.f32.mxu1 %vm11382_vm1, %v13876_v59 }
 0x18e   :  { %8971 = vmatmul.mubr.f32.vlgmr.msra.gmra.mrb[4].mxu0 %v11906_v34  ;;  %10347 = vmatprep.subr.bf16.mxu1 %v13877_v22 }
 0x18f   :  { %10490 = vmatpush3.bf16.msra.mxu0 %v11529_v21  ;;  %9005 = vmatprep.mubr.msk.f32.mxu0 %vm11382_vm1, %v13876_v59  ;;  %v1508_v21 = vld [vmem:[%s13801_s14] sm:$0xff] }
 0x190   :  { %10491 = vmatprep.subr.bf16.mxu0 %v13877_v22 }
 0x191   :  { %10349 = vmatpush3.bf16.msra.mxu1 %v11553_v27 }
 0x192   :  { %10350 = vmatprep.subr.bf16.mxu1 %v13877_v22 }
 0x193   :  { %10493 = vmatpush3.bf16.msra.mxu0 %v11553_v27  ;;  %v12137_v27 = vand.u32 4294901760, %v1508_v21 }
 0x194   :  { %10494 = vmatprep.subr.bf16.mxu0 %v13877_v22 }
 0x195   :  { %10352 = vmatpush3.bf16.msra.mxu1 %v11575_v32 }
 0x196   :  { %10353 = vmatprep.subr.bf16.mxu1 %v13877_v22 }
 0x197   :  { %10496 = vmatpush3.bf16.msra.mxu0 %v11575_v32 }
 0x198   :  { %10497 = vmatprep.subr.bf16.mxu0 %v13877_v22 }
 0x199   :  { %10355 = vmatpush3.bf16.msra.mxu1 %v11597_v37 }
 0x19a   :  { %10356 = vmatprep.subr.bf16.mxu1 %v13877_v22 }
 0x19b   :  { %10499 = vmatpush3.bf16.msra.mxu0 %v11597_v37 }
 0x19c   :  { %10500 = vmatprep.subr.bf16.mxu0 %v13877_v22 }
 0x19d   :  { %10358 = vmatpush3.bf16.msra.mxu1 %v11619_v42 }
 0x19e   :  { %10359 = vmatprep.subr.bf16.mxu1 %v13877_v22 }
 0x19f   :  { %10502 = vmatpush3.bf16.msra.mxu0 %v11619_v42 }
 0x1a0   :  { %10503 = vmatprep.subr.bf16.mxu0 %v13877_v22 }
 0x1a1   :  { %10361 = vmatpush3.bf16.msra.mxu1 %v11641_v47 }
 0x1a2   :  { %10362 = vmatprep.subr.bf16.mxu1 %v13877_v22 }
 0x1a3   :  { %10505 = vmatpush3.bf16.msra.mxu0 %v11641_v47 }
 0x1a4   :  { %10506 = vmatprep.subr.bf16.mxu0 %v13877_v22 }
 0x1a5   :  { %10364 = vmatpush3.bf16.msra.mxu1 %v11663_v52 }
 0x1a6   :  { %10365 = vmatprep.subr.bf16.mxu1 %v13877_v22 }
 0x1a7   :  { %10508 = vmatpush3.bf16.msra.mxu0 %v11663_v52 }
 0x1a8   :  { %10509 = vmatprep.subr.bf16.mxu0 %v13877_v22 }
 0x1a9   :  { %10367 = vmatpush3.bf16.msra.mxu1 %v11691_v61 }
 0x1aa   :  { %9008 = vmatprep.subr.mxu1 %v13876_v59 }
 0x1ab   :  { %10511 = vmatpush3.bf16.msra.mxu0 %v11691_v61 }
 0x1ac   :  { %8796 = vmatmul.mubr.f32.vlgmr.msra.gmra.mrb[0].mxu1 %v11904_v3  ;;  %9038 = vmatprep.subr.mxu0 %v13876_v59  ;;  %v1591_v3 = vsub.f32 %v1508_v21, %v12137_v27  ;;  %v10552_v21 = vpack.c.bf16 %v7729_v39, %v7728_v13 }
 0x1ad   :  { %9010 = vmatprep.mubr.msk.f32.mxu1 %vm11382_vm1, %v13876_v59  ;;  %9009 = vmatpush3.msra.mxu1 %v12137_v27 }
 0x1ae   :  { %9006 = vmatmul.mubr.f32.vlgmr.msra.gmra.mrb[4].mxu0 %v11906_v34  ;;  %9013 = vmatprep.subr.mxu1 %v13876_v59  ;;  %v12147_v49 = vand.u32 4294901760, %v1591_v3 }
 0x1af   :  { %9040 = vmatprep.mubr.msk.f32.mxu0 %vm11382_vm1, %v13876_v59  ;;  %9039 = vmatpush3.msra.mxu0 %v12137_v27 }
 0x1b0   :  { %9043 = vmatprep.subr.mxu0 %v13876_v59  ;;  %v1593_v50 = vsub.f32 %v1591_v3, %v12147_v49 }
 0x1b2   :  { %v1594_v17 = vand.u32 4294901760, %v1593_v50  ;;  %v2471_v50 = vld [vmem:[#allocation2 + $0x28] sm:$0xff] }
 0x27f   :  { %v856_v32 = vpop.f32.mrb[0].mxu1 }
 0x280   :  { %v860_v37 = vmul.f32 0.001953125, %v856_v32  ;;  %v8797_v42 = vpop.f32.mrb[1].mxu1  ;;  %v7730_v32 = vld [vmem:[%s13802_s1 + $0xb0] sm:$0xff] }
 0x281   :  { %v1498_v47 = vpop.f32.mrb[4].mxu0  ;;  %v2676_v42 = vld [vmem:[#allocation2 + $0x9] sm:$0xff] }
 0x282   :  { %v1503_v52 = vmul.f32 %v860_v37, %v860_v37  ;;  %v1511_v61 = vsel %vm1509_vm7, %v860_v37, 0  ;;  %v1502_v43 = vmul.f32 0.001953125, %v1498_v47  ;;  %v9007_v44 = vpop.f32.mrb[5].mxu0  ;;  %v7731_v37 = vld [vmem:[%s13802_s1 + $0xb8] sm:$0xff]  ;;  %v2469_v47 = vld [vmem:[#allocation2 + $0x8] sm:$0xff] }
 0x283   :  { %v1579_v51 = vand.u32 4294901760, %v1511_v61  ;;  %v7715_v44 = vld [vmem:[%s13802_s1 + $0x78] sm:$0xff] }
 0x284   :  { %v1504_v46 = vsub.f32 %v1502_v43, %v1503_v52  ;;  %v7714_v43 = vld [vmem:[%s13802_s1 + $0x70] sm:$0xff] }
 0x285   :  { %v1580_v23 = vsub.f32 %v1511_v61, %v1579_v51  ;;  %v10556_v61 = vpack.c.bf16 %v7731_v37, %v7730_v32 }
 0x286   :  { %v1505_v48 = vmax.f32 %v1504_v46, 0.0  ;;  %v2678_v46 = vld [vmem:[#allocation2 + $0x29] sm:$0xff] }
 0x287   :  { %v1581_v34 = vand.u32 4294901760, %v1580_v23 }
 0x288   :  { %v1506_v56 = vadd.f32 1e-05, %v1505_v48  ;;  %v2679_v48 = vld [vmem:[#allocation2 + $0x31] sm:$0xff] }
 0x289   :  { %v1582_v58 = vsub.f32 %v1580_v23, %v1581_v34 }
 0x28a   :  { %11371 = vrsqrt.f32 %v1506_v56  ;;  %v2837_v56 = vld [vmem:[%s13799_s13] sm:$0xff] }
 0x28b   :  { %v1583_v57 = vand.u32 4294901760, %v1582_v58  ;;  %v2838_v58 = vld [vmem:[%s13799_s13 + $0x8] sm:$0xff] }
 0x28d   :  { %9011 = vmatmul.mubr.f32.vlgmr.msra.gmra.mrb[2].mxu1 %v1583_v57  ;;  %v2857_v57 = vand.u32 4294901760, %v2838_v58 }
 0x28e   :  { %9014 = vmatpush3.msra.mxu1 %v1594_v17  ;;  %9015 = vmatprep.mubr.msk.f32.mxu1 %vm11382_vm1, %v13876_v59 }
 0x28f   :  { %9018 = vmatprep.subr.mxu1 %v13876_v59  ;;  %v12435_v39 = vsub.f32 %v2838_v58, %v2857_v57 }
 0x294   :  { %v11372_v25 = vpop.eup %11371 }
 0x295   :  { %9016 = vmatmul.mubr.f32.vlgmr.msra.gmra.mrb[2].mxu1 %v1579_v51  ;;  %v1960_v62 = vsel %vm1509_vm7, %v11372_v25, 0 }
 0x296   :  { %9019 = vmatpush3.msra.mxu1 %v1591_v3  ;;  %9020 = vmatprep.mubr.msk.f32.mxu1 %vm11382_vm1, %v13876_v59  ;;  %v12156_v36 = vand.u32 4294901760, %v1960_v62 }
 0x297   :  { %9023 = vmatprep.subr.mxu1 %v13876_v59 }
 0x298   :  { %v2029_v29 = vsub.f32 %v1960_v62, %v12156_v36  ;;  %v12294_v62 = vld [vmem:[%s13799_s13 + $0x10] sm:$0xff] }
 0x29a   :  { %v2030_v24 = vand.u32 4294901760, %v2029_v29 }
 0x29c   :  { %v2031_v9 = vsub.f32 %v2029_v29, %v2030_v24 }
 0x29d   :  { %9021 = vmatmul.mubr.f32.vlgmr.msra.gmra.mrb[2].mxu1 %v1580_v23  ;;  %v2470_v23 = vld [vmem:[#allocation2 + $0x10] sm:$0xff] }
 0x29e   :  { %9024 = vmatpush3.msra.mxu1 %v12137_v27  ;;  %v2032_v15 = vand.u32 4294901760, %v2031_v9  ;;  %9025 = vmatprep.mubr.msk.f32.mxu1 %vm11382_vm1, %v13876_v59 }
 0x29f   :  { %9028 = vmatprep.subr.mxu1 %v13876_v59 }
 0x2a0   :  { %9041 = vmatmul.mubr.f32.vlgmr.msra.gmra.mrb[6].mxu0 %v2032_v15  ;;  %v12316_v15 = vld [vmem:[%s13799_s13 + $0x20] sm:$0xff] }
 0x2a1   :  { %9044 = vmatpush3.msra.mxu0 %v1594_v17  ;;  %9045 = vmatprep.mubr.msk.f32.mxu0 %vm11382_vm1, %v13876_v59  ;;  %v2854_v17 = vand.u32 4294901760, %v2837_v56  ;;  %v2866_v60 = vand.u32 4294901760, %v12316_v15 }
 0x2a2   :  { %9048 = vmatprep.subr.mxu0 %v13876_v59 }
 0x2a3   :  { %v12289_v25 = vpack.c.bf16 %v2857_v57, %v2854_v17  ;;  %v12433_v13 = vsub.f32 %v2837_v56, %v2854_v17 }
 0x2a5   :  { %9026 = vmatmul.mubr.f32.vlgmr.msra.gmra.mrb[2].mxu1 %v1581_v34  ;;  %v2472_v34 = vld [vmem:[#allocation2 + $0x30] sm:$0xff] }
 0x2a6   :  { %9029 = vmatpush3.msra.mxu1 %v12147_v49  ;;  %9030 = vmatprep.mubr.msk.f32.mxu1 %vm11382_vm1, %v13876_v59 }
 0x2a7   :  { %9033 = vmatprep.subr.mxu1 %v13876_v59 }
 0x2a8   :  { %9046 = vmatmul.mubr.f32.vlgmr.msra.gmra.mrb[6].mxu0 %v12156_v36 }
 0x2a9   :  { %9049 = vmatpush3.msra.mxu0 %v1591_v3  ;;  %9050 = vmatprep.mubr.msk.f32.mxu0 %vm11382_vm1, %v13876_v59  ;;  %v7713_v3 = vld [vmem:[%s13802_s1 + $0x68] sm:$0xff] }
 0x2aa   :  { %9053 = vmatprep.subr.mxu0 %v13876_v59 }
 0x2ad   :  { %9031 = vmatmul.mubr.f32.vlgmr.msra.gmra.mrb[2].mxu1 %v1579_v51 }
 0x2ae   :  { %9034 = vmatpush3.msra.mxu1 %v12137_v27  ;;  %9035 = vmatprep.mubr.msk.f32.mxu1 %vm11382_vm1, %v13876_v59  ;;  %v10532_v59 = vpack.c.bf16 %v2464_v35, %v2463_v6  ;;  %v12338_v35 = vld [vmem:[%s13799_s13 + $0x30] sm:$0xff] }
 0x2af   :  { %10529 = vmatprep.subr.bf16.mxu1 %v10528_v5 }
 0x2b0   :  { %9051 = vmatmul.mubr.f32.vlgmr.msra.gmra.mrb[6].mxu0 %v2029_v29  ;;  %v2860_v29 = vand.u32 4294901760, %v12294_v62 }
 0x2b1   :  { %9054 = vmatpush3.msra.mxu0 %v12137_v27  ;;  %9055 = vmatprep.mubr.msk.f32.mxu0 %vm11382_vm1, %v12191_v28 }
 0x2b2   :  { %9058 = vmatprep.subr.mxu0 %v12191_v28 }
 0x2b5   :  { %9036 = vmatmul.mubr.f32.vlgmr.msra.gmra.mrb[2].mxu1 %v1579_v51  ;;  %v2677_v51 = vld [vmem:[#allocation2 + $0x11] sm:$0xff] }
 0x2b6   :  { %10531 = vmatpush3.bf16.msra.mxu1 %v10528_v5  ;;  %9106 = vmatprep.mubr.msk.f32.mxu1 %vm69_vm0, %v2457_v7  ;;  %v2869_v5 = vand.u32 4294901760, %v12321_v14  ;;  %v2872_v7 = vand.u32 4294901760, %v12338_v35 }
 0x2b7   :  { %10533 = vmatprep.subr.bf16.mxu1 %v10532_v59 }
 0x2b8   :  { %9056 = vmatmul.mubr.f32.vlgmr.msra.gmra.mrb[6].mxu0 %v2030_v24  ;;  %v12333_v6 = vpack.c.bf16 %v2869_v5, %v2866_v60 }
 0x2b9   :  { %9059 = vmatpush3.msra.mxu0 %v12147_v49  ;;  %9060 = vmatprep.mubr.msk.f32.mxu0 %vm11382_vm1, %v12191_v28  ;;  %v10524_v49 = vpack.c.bf16 %v7715_v44, %v7714_v43 }
 0x2ba   :  { %10535 = vmatpush3.bf16.msra.mxu1 %v10532_v59  ;;  %9063 = vmatprep.subr.mxu0 %v12191_v28  ;;  %v12343_v59 = vld [vmem:[%s13799_s13 + $0x38] sm:$0xff] }
 0x2bb   :  { %10537 = vmatprep.subr.bf16.mxu1 %v10536_v63  ;;  %v2875_v16 = vand.u32 4294901760, %v12343_v59 }
 0x2bd   :  { %v12355_v33 = vpack.c.bf16 %v2875_v16, %v2872_v7 }
 0x2be   :  { %10539 = vmatpush3.bf16.msra.mxu1 %v10536_v63  ;;  %v12360_v63 = vld [vmem:[%s13799_s13 + $0x40] sm:$0xff] }
 0x2bf   :  { %10541 = vmatprep.subr.bf16.mxu1 %v10540_v53  ;;  %v2878_v26 = vand.u32 4294901760, %v12360_v63 }
 0x2c0   :  { %9061 = vmatmul.mubr.f32.vlgmr.msra.gmra.mrb[6].mxu0 %v12156_v36 }
 0x2c1   :  { %9064 = vmatpush3.msra.mxu0 %v12137_v27  ;;  %9065 = vmatprep.mubr.msk.f32.mxu0 %vm11382_vm1, %v12191_v28  ;;  %v7712_v27 = vld [vmem:[%s13802_s1 + $0x60] sm:$0xff] }
 0x2c2   :  { %10543 = vmatpush3.bf16.msra.mxu1 %v10540_v53  ;;  %10513 = vmatprep.subr.bf16.mxu0 %v10512_v40  ;;  %v10520_v52 = vpack.c.bf16 %v7713_v3, %v7712_v27  ;;  %v2881_v53 = vand.u32 4294901760, %v12365_v12  ;;  %v13848_v27 = vand.u32 4294901760, %v12435_v39 }
 0x2c3   :  { %10545 = vmatprep.subr.bf16.mxu1 %v10544_v10 }
 0x2c4   :  { %v12377_v54 = vpack.c.bf16 %v2881_v53, %v2878_v26  ;;  %v2955_v37 = vsub.f32 %v12435_v39, %v13848_v27 }
 0x2c5   :  { %9107 = vmatmul.mubr.msk.f32.vlgmr.msra.gmra.mrb[4].mxu1 %vm69_vm0, %v2458_v18  ;;  %v2890_v18 = vand.u32 4294901760, %v12404_v11 }
 0x2c6   :  { %10547 = vmatpush3.bf16.msra.mxu1 %v10544_v10  ;;  %9109 = vmatprep.mubr.msk.f32.mxu1 %vm69_vm0, %v2459_v31  ;;  %v12431_v31 = vld [vmem:[%s13799_s13 + $0x78] sm:$0xff] }
 0x2c7   :  { %10549 = vmatprep.subr.bf16.mxu1 %v10548_v19 }
 0x2c8   :  { %9066 = vmatmul.mubr.f32.vlgmr.msra.gmra.mrb[6].mxu0 %v12156_v36  ;;  %v12299_v36 = vld [vmem:[%s13799_s13 + $0x18] sm:$0xff] }
 0x2c9   :  { %10515 = vmatpush3.bf16.msra.mxu0 %v10512_v40  ;;  %9110 = vmatmul.mubr.msk.f32.gmra.mrb[6].mxu1 %vm69_vm0, %v2460_v45  ;;  %v2863_v24 = vand.u32 4294901760, %v12299_v36  ;;  %v2887_v40 = vand.u32 4294901760, %v12387_v1  ;;  %v2899_v45 = vand.u32 4294901760, %v12431_v31 }
 0x2ca   :  { %10551 = vmatpush3.bf16.msra.mxu1 %v10548_v19  ;;  %10517 = vmatprep.subr.bf16.mxu0 %v10516_v41  ;;  %v2893_v19 = vand.u32 4294901760, %v12409_v2 }
 0x2cb   :  { %10553 = vmatprep.subr.bf16.mxu1 %v10552_v21  ;;  %9128 = vmatprep.mubr.msk.f32.mxu1 %vm69_vm0, %v2676_v42  ;;  %v12311_v9 = vpack.c.bf16 %v2863_v24, %v2860_v29  ;;  %v12399_v10 = vpack.c.bf16 %v2887_v40, %v2884_v38  ;;  %v12460_v42 = vsub.f32 %v12294_v62, %v2860_v29 }
 0x2cc   :  { %9084 = vmatprep.mubr.msk.f32.mxu0 %vm69_vm0, %v2469_v47  ;;  %v12421_v4 = vpack.c.bf16 %v2893_v19, %v2890_v18  ;;  %v12465_v47 = vsub.f32 %v12299_v36, %v2863_v24  ;;  %v12504_v36 = vsub.f32 %v12338_v35, %v2872_v7  ;;  %v12509_v29 = vsub.f32 %v12343_v59, %v2875_v16 }
 0x2cd   :  { %10519 = vmatpush3.bf16.msra.mxu0 %v10516_v41  ;;  %v2896_v41 = vand.u32 4294901760, %v12426_v30  ;;  %v13847_v43 = vand.u32 4294901760, %v12460_v42  ;;  %v12521_v35 = vsub.f32 %v12360_v63, %v2878_v26  ;;  %v12526_v59 = vsub.f32 %v12365_v12, %v2881_v53 }
 0x2ce   :  { %10555 = vmatpush3.bf16.msra.mxu1 %v10552_v21  ;;  %10521 = vmatprep.subr.bf16.mxu0 %v10520_v52  ;;  %v13849_v21 = vand.u32 4294901760, %v12433_v13  ;;  %v13846_v44 = vand.u32 4294901760, %v12465_v47  ;;  %v12542_v12 = vsub.f32 %v12382_v0, %v2884_v38  ;;  %v12547_v53 = vsub.f32 %v12387_v1, %v2887_v40 }
 0x2cf   :  { %10557 = vmatprep.subr.bf16.mxu1 %v10556_v61  ;;  %v12448_v3 = vpack.c.bf16 %v2899_v45, %v2896_v41  ;;  %v12564_v1 = vsub.f32 %v12404_v11, %v2890_v18  ;;  %v12569_v40 = vsub.f32 %v12409_v2, %v2893_v19  ;;  %v12581_v11 = vsub.f32 %v12426_v30, %v2896_v41 }
 0x2d0   :  { %v2948_v32 = vsub.f32 %v12433_v13, %v13849_v21  ;;  %v12586_v2 = vsub.f32 %v12431_v31, %v2899_v45 }
 0x2d1   :  { %10523 = vmatpush3.bf16.msra.mxu0 %v10520_v52 }
 0x2d2   :  { %10559 = vmatpush3.bf16.msra.mxu1 %v10556_v61  ;;  %10525 = vmatprep.subr.bf16.mxu0 %v10524_v49  ;;  %v2949_v52 = vand.u32 4294901760, %v2948_v32  ;;  %v2956_v61 = vand.u32 4294901760, %v2955_v37  ;;  %v13841_v37 = vand.u32 4294901760, %v12521_v35 }
 0x2d3   :  { %10704 = vmatprep.subr.bf16.mxu1 %v13877_v22 }
 0x2d4   :  { %v3004_v63 = vsub.f32 %v12521_v35, %v13841_v37 }
 0x2d5   :  { %10527 = vmatpush3.bf16.msra.mxu0 %v10524_v49  ;;  %9129 = vmatmul.mubr.msk.f32.vlgmr.msra.gmra.mrb[4].mxu1 %vm69_vm0, %v2677_v51  ;;  %v12473_v49 = vpack.c.bf16 %v2956_v61, %v2949_v52  ;;  %v2962_v51 = vsub.f32 %v12460_v42, %v13847_v43  ;;  %v13840_v52 = vand.u32 4294901760, %v12526_v59 }
 0x2d6   :  { %9131 = vmatprep.mubr.msk.f32.mxu1 %vm69_vm0, %v2678_v46  ;;  %10560 = vmatprep.subr.bf16.mxu0 %v13877_v22  ;;  %v2969_v46 = vsub.f32 %v12465_v47, %v13846_v44 }
 0x2d7   :  { %10706 = vmatpush3.bf16.msra.mxu1 %v12289_v25  ;;  %v3011_v26 = vsub.f32 %v12526_v59, %v13840_v52 }
 0x2d8   :  { %9085 = vmatmul.mubr.msk.f32.vlgmr.msra.gmra.mrb[8].mxu0 %vm69_vm0, %v2470_v23  ;;  %10707 = vmatprep.subr.bf16.mxu1 %v13877_v22  ;;  %v12484_v23 = vsub.f32 %v12316_v15, %v2866_v60  ;;  %v13842_v60 = vand.u32 4294901760, %v12509_v29 }
 0x2d9   :  { %9132 = vmatmul.mubr.msk.f32.gmra.mrb[6].mxu1 %vm69_vm0, %v2679_v48  ;;  %9087 = vmatprep.mubr.msk.f32.mxu0 %vm69_vm0, %v2471_v50  ;;  %v12489_v48 = vsub.f32 %v12321_v14, %v2869_v5  ;;  %v2963_v50 = vand.u32 4294901760, %v2962_v51  ;;  %v13843_v14 = vand.u32 4294901760, %v12504_v36 }
 0x2da   :  { %9376 = vmatprep.mubr.msk.f32.mxu1 %vm11382_vm1, %v12191_v28  ;;  %10562 = vmatpush3.bf16.msra.mxu0 %v12289_v25  ;;  %v13845_v56 = vand.u32 4294901760, %v12484_v23  ;;  %v2997_v7 = vsub.f32 %v12509_v29, %v13842_v60 }
 0x2db   :  { %10563 = vmatprep.subr.bf16.mxu0 %v13877_v22  ;;  %10709 = vmatpush3.bf16.msra.mxu1 %v12311_v9  ;;  %v13844_v58 = vand.u32 4294901760, %v12489_v48  ;;  %v2990_v32 = vsub.f32 %v12504_v36, %v13843_v14 }
 0x2dc   :  { %9088 = vmatmul.mubr.msk.f32.gmra.mrb[10].mxu0 %vm69_vm0, %v2472_v34  ;;  %10710 = vmatprep.subr.bf16.mxu1 %v13877_v22  ;;  %v2970_v34 = vand.u32 4294901760, %v2969_v46  ;;  %v2976_v57 = vsub.f32 %v12484_v23, %v13845_v56  ;;  %v2998_v61 = vand.u32 4294901760, %v2997_v7  ;;  %v3005_v46 = vand.u32 4294901760, %v3004_v63 }
 0x2dd   :  { %9166 = vmatprep.mubr.msk.f32.mxu0 %vm11382_vm1, %v12191_v28  ;;  %v2983_v62 = vsub.f32 %v12489_v48, %v13844_v58  ;;  %v2991_v16 = vand.u32 4294901760, %v2990_v32  ;;  %v13837_v32 = vand.u32 4294901760, %v12564_v1  ;;  %v13836_v7 = vand.u32 4294901760, %v12569_v40 }
 0x2de   :  { %10565 = vmatpush3.bf16.msra.mxu0 %v12311_v9  ;;  %v12493_v17 = vpack.c.bf16 %v2970_v34, %v2963_v50  ;;  %v2977_v24 = vand.u32 4294901760, %v2976_v57  ;;  %v3012_v50 = vand.u32 4294901760, %v3011_v26  ;;  %v13839_v34 = vand.u32 4294901760, %v12542_v12 }
 0x2df   :  { %10566 = vmatprep.subr.bf16.mxu0 %v13877_v22  ;;  %10712 = vmatpush3.bf16.msra.mxu1 %v12333_v6  ;;  %v2984_v15 = vand.u32 4294901760, %v2983_v62  ;;  %v12549_v51 = vpack.c.bf16 %v2998_v61, %v2991_v16  ;;  %v13838_v57 = vand.u32 4294901760, %v12547_v53  ;;  %v3032_v61 = vsub.f32 %v12564_v1, %v13837_v32 }
 0x2e0   :  { %10713 = vmatprep.subr.bf16.mxu1 %v13877_v22  ;;  %v12553_v62 = vpack.c.bf16 %v3012_v50, %v3005_v46  ;;  %v3018_v0 = vsub.f32 %v12542_v12, %v13839_v34  ;;  %v3039_v18 = vsub.f32 %v12569_v40, %v13836_v7  ;;  %v13835_v63 = vand.u32 4294901760, %v12581_v11 }
 0x2e1   :  { %v12513_v5 = vpack.c.bf16 %v2984_v15, %v2977_v24  ;;  %v3025_v38 = vsub.f32 %v12547_v53, %v13838_v57  ;;  %v3033_v19 = vand.u32 4294901760, %v3032_v61  ;;  %v13834_v26 = vand.u32 4294901760, %v12586_v2 }
 0x2e2   :  { %10568 = vmatpush3.bf16.msra.mxu0 %v12333_v6  ;;  %v3019_v24 = vand.u32 4294901760, %v3018_v0  ;;  %v3040_v46 = vand.u32 4294901760, %v3039_v18  ;;  %v3046_v30 = vsub.f32 %v12581_v11, %v13835_v63  ;;  %v12617_v61 = vpack.c.bf16 %v12509_v29, %v12504_v36 }
 0x2e3   :  { %10569 = vmatprep.subr.bf16.mxu0 %v13877_v22  ;;  %10715 = vmatpush3.bf16.msra.mxu1 %v12355_v33  ;;  %v3026_v15 = vand.u32 4294901760, %v3025_v38  ;;  %v3053_v41 = vsub.f32 %v12586_v2, %v13834_v26  ;;  %v12605_v38 = vpack.c.bf16 %v12435_v39, %v12433_v13  ;;  %v12621_v18 = vpack.c.bf16 %v12526_v59, %v12521_v35 }
 0x2e4   :  { %10716 = vmatprep.subr.bf16.mxu1 %v13877_v22  ;;  %v12599_v31 = vpack.c.bf16 %v3040_v46, %v3033_v19  ;;  %v3047_v45 = vand.u32 4294901760, %v3046_v30  ;;  %v12625_v19 = vpack.c.bf16 %v12547_v53, %v12542_v12 }
 0x2e5   :  { %v12573_v16 = vpack.c.bf16 %v3026_v15, %v3019_v24  ;;  %v3054_v50 = vand.u32 4294901760, %v3053_v41  ;;  %v12609_v24 = vpack.c.bf16 %v12465_v47, %v12460_v42  ;;  %v12613_v15 = vpack.c.bf16 %v12489_v48, %v12484_v23 }
 0x2e6   :  { %10571 = vmatpush3.bf16.msra.mxu0 %v12355_v33  ;;  %v12629_v41 = vpack.c.bf16 %v12569_v40, %v12564_v1 }
 0x2e7   :  { %10572 = vmatprep.subr.bf16.mxu0 %v13877_v22  ;;  %10718 = vmatpush3.bf16.msra.mxu1 %v12377_v54  ;;  %v12601_v0 = vpack.c.bf16 %v3054_v50, %v3047_v45  ;;  %v2408_v45 = vlaneseq  ;;  %v12633_v50 = vpack.c.bf16 %v12586_v2, %v12581_v11 }
 0x2e8   :  { %10719 = vmatprep.subr.bf16.mxu1 %v13877_v22 }
 0x2e9   :  { %v2409_v26 = vshrl.u32 %v2408_v45, 7 }
 0x2ea   :  { %10574 = vmatpush3.bf16.msra.mxu0 %v12377_v54 }
 0x2eb   :  { %10575 = vmatprep.subr.bf16.mxu0 %v13877_v22  ;;  %10721 = vmatpush3.bf16.msra.mxu1 %v12399_v10  ;;  %v12635_v63 = vsub.s32 0, %v2409_v26 }
 0x2ec   :  { %10722 = vmatprep.subr.bf16.mxu1 %v13877_v22 }
 0x2ed   :  { %13894 = vst [vmem:[#allocation5_spill] sm:$0xff] %v12635_v63 }
 0x2ee   :  { %10577 = vmatpush3.bf16.msra.mxu0 %v12399_v10 }
 0x2ef   :  { %10578 = vmatprep.subr.bf16.mxu0 %v13877_v22  ;;  %10724 = vmatpush3.bf16.msra.mxu1 %v12421_v4 }
 0x2f0   :  { %10725 = vmatprep.subr.bf16.mxu1 %v13877_v22 }
 0x2f2   :  { %10580 = vmatpush3.bf16.msra.mxu0 %v12421_v4 }
 0x2f3   :  { %10581 = vmatprep.subr.bf16.mxu0 %v13877_v22  ;;  %10727 = vmatpush3.bf16.msra.mxu1 %v12448_v3 }
 0x2f4   :  { %10728 = vmatprep.subr.bf16.mxu1 %v13877_v22 }
 0x2f6   :  { %10583 = vmatpush3.bf16.msra.mxu0 %v12448_v3 }
 0x2f7   :  { %10584 = vmatprep.subr.bf16.mxu0 %v13877_v22 }
 0x388   :  { %v1955_v46 = vpop.f32.mrb[2].mxu1 }
 0x389   :  { %v9037_v30 = vpop.f32.mrb[3].mxu1  ;;  %v2411_v7 = vrot.slane %v1955_v46, %v12635_v63 }
 0x38a   :  { %v13895_v30 = vld [vmem:[#allocation4_spill] sm:$0xff] }
 0x38b   :  { %v2412_v32 = vsub.f32 %v11886_v8, %v2411_v7  ;;  %v2413_v34 = vsub.f32 %v11884_v20, %v2411_v7  ;;  %v2414_v52 = vsub.f32 %v13895_v30, %v2411_v7  ;;  %v2415_v37 = vsub.f32 %v11894_v55, %v2411_v7  ;;  %v7736_v20 = vld [vmem:[%s13803_s4] ss:$0 sm:$0xff] }
 0x39b   :  { %v2404_v57 = vpop.f32.mrb[6].mxu0 }
 0x39c   :  { %v2419_v60 = vrot.slane %v2404_v57, %v12635_v63  ;;  %v9067_v14 = vpop.f32.mrb[7].mxu0 }
 0x39e   :  { %v12643_v58 = vmul.f32 %v2419_v60, %v2412_v32  ;;  %v12645_v56 = vmul.f32 %v2419_v60, %v2413_v34  ;;  %v12647_v26 = vmul.f32 %v2419_v60, %v2414_v52  ;;  %v12649_v45 = vmul.f32 %v2419_v60, %v2415_v37 }
 0x3a0   :  { %13896 = vst [vmem:[#allocation4_spill] sm:$0xff] %v12643_v58  ;;  %13897 = vst [vmem:[#allocation6_spill] sm:$0xff] %v12645_v56 }
 0x3a1   :  { %13898 = vst [vmem:[#allocation7_spill] sm:$0xff] %v12647_v26  ;;  %13899 = vst [vmem:[#allocation8_spill] sm:$0xff] %v12649_v45 }
 0x3a8   :  { %v9130_v46 = vpop.f32.mrb[4].mxu1 }
 0x3a9   :  { %v2767_v8 = vpop.f32.mrb[5].mxu1 }
 0x3ab   :  { %v9086_v44 = vpop.f32.mrb[8].mxu0 }
 0x3ac   :  { %v11232_v30 = vadd.f32 %v9130_v46, %v9086_v44  ;;  %v2560_v55 = vpop.f32.mrb[9].mxu0  ;;  %v9133_v7 = vpop.f32.mrb[6].mxu1 }
 0x3ad   :  { %v11233_v57 = vadd.f32 %v2767_v8, %v2560_v55  ;;  %v2777_v14 = vpop.f32.mrb[7].mxu1 }
 0x3ae   :  { %v2798_v32 = vadd.f32 %v11232_v30, %v7736_v20 }
 0x3af   :  { %v2797_v43 = vadd.f32 %v11233_v57, %v7736_v20  ;;  %v9089_v34 = vpop.f32.mrb[10].mxu0 }
 0x3b0   :  { %vm2802_vm8 = vcmp.gt.f32.partialorder %v2798_v32, 0.0  ;;  %v2806_v52 = vmul.f32 0.01, %v2798_v32  ;;  %v11234_v27 = vadd.f32 %v9133_v7, %v9089_v34  ;;  %v2570_v60 = vpop.f32.mrb[11].mxu0 }
 0x3b1   :  { %vm2801_vm9 = vcmp.gt.f32.partialorder %v2797_v43, 0.0  ;;  %v2805_v37 = vmul.f32 0.01, %v2797_v43  ;;  %v11235_v21 = vadd.f32 %v2777_v14, %v2570_v60 }
 0x3b2   :  { %v12654_v45 = vsel %vm2802_vm8, %v2798_v32, %v2806_v52  ;;  %v2800_v26 = vadd.f32 %v11234_v27, %v7736_v20 }
 0x3b3   :  { %13900 = vst [vmem:[#allocation9_spill] sm:$0xff] %v12654_v45  ;;  %v12656_v56 = vsel %vm2801_vm9, %v2797_v43, %v2805_v37  ;;  %v2799_v44 = vadd.f32 %v11235_v21, %v7736_v20  ;;  %v2825_v46 = vmul.f32 %v12654_v45, %v12654_v45 }
 0x3b4   :  { %13901 = vst [vmem:[#allocation10_spill] sm:$0xff] %v12656_v56  ;;  %v2824_v8 = vmul.f32 %v12656_v56, %v12656_v56  ;;  %vm2804_vm10 = vcmp.gt.f32.partialorder %v2800_v26, 0.0  ;;  %v2808_v30 = vmul.f32 0.01, %v2800_v26  ;;  %v2815_v7 = vadd.f32 %v12654_v45, %v12656_v56 }
 0x3b5   :  { %vm2803_vm11 = vcmp.gt.f32.partialorder %v2799_v44, 0.0  ;;  %v2807_v55 = vmul.f32 0.01, %v2799_v44 }
 0x3b6   :  { %v12664_v57 = vsel %vm2804_vm10, %v2800_v26, %v2808_v30  ;;  %v2828_v27 = vadd.f32 %v2825_v46, %v2824_v8 }
 0x3b7   :  { %v12666_v14 = vsel %vm2803_vm11, %v2799_v44, %v2807_v55  ;;  %v2827_v20 = vmul.f32 %v12664_v57, %v12664_v57 }
 0x3b8   :  { %13902 = vst [vmem:[#allocation11_spill] sm:$0xff] %v12666_v14  ;;  %v2816_v21 = vadd.f32 %v2815_v7, %v12666_v14  ;;  %v2826_v43 = vmul.f32 %v12666_v14, %v12666_v14 }
 0x3ba   :  { %v2817_v32 = vadd.f32 %v2816_v21, %v12664_v57  ;;  %v2829_v34 = vadd.f32 %v2828_v27, %v2826_v43 }
 0x3bc   :  { %v2818_v52 = vrot.slane %v2817_v32, 4  ;;  %v2830_v60 = vadd.f32 %v2829_v34, %v2827_v20 }
 0x3be   :  { %v2819_v37 = vadd.f32 %v2818_v52, %v2817_v32  ;;  %v2831_v58 = vrot.slane %v2830_v60, 4 }
 0x3c0   :  { %v2820_v26 = vrot.slane %v2819_v37, 2  ;;  %v2832_v30 = vadd.f32 %v2831_v58, %v2830_v60 }
 0x3c2   :  { %v2821_v44 = vadd.f32 %v2820_v26, %v2819_v37  ;;  %v2833_v55 = vrot.slane %v2832_v30, 2 }
 0x3c4   :  { %v2822_v46 = vrot.slane %v2821_v44, 1  ;;  %v2834_v8 = vadd.f32 %v2833_v55, %v2832_v30 }
 0x3c6   :  { %v2823_v7 = vadd.f32 %v2822_v46, %v2821_v44  ;;  %v2835_v45 = vrot.slane %v2834_v8, 1 }
 0x3c8   :  { %v12674_v56 = vand.u32 4294901760, %v2823_v7  ;;  %v2836_v14 = vadd.f32 %v2835_v45, %v2834_v8 }
 0x3ca   :  { %v12677_v63 = vsub.f32 %v2823_v7, %v12674_v56  ;;  %v12679_v21 = vand.u32 4294901760, %v2836_v14 }
 0x3cc   :  { %v2936_v27 = vand.u32 4294901760, %v12677_v63  ;;  %v12683_v43 = vsub.f32 %v2836_v14, %v12679_v21 }
 0x3ce   :  { %v2937_v58 = vsub.f32 %v12677_v63, %v2936_v27  ;;  %v3578_v20 = vand.u32 4294901760, %v12683_v43 }
 0x3d0   :  { %v2938_v32 = vand.u32 4294901760, %v2937_v58  ;;  %v3579_v45 = vsub.f32 %v12683_v43, %v3578_v20 }
 0x3d2   :  { %9167 = vmatmul.mubr.f32.vlgmr.msra.gmra.mrb[12].mxu0 %v2938_v32  ;;  %v3580_v34 = vand.u32 4294901760, %v3579_v45  ;;  %v7743_v45 = vld [vmem:[%s13804_s2 + $0xa0] sm:$0xff] }
 0x3d3   :  { %10586 = vmatpush3.bf16.msra.mxu0 %v12473_v49  ;;  %9201 = vmatprep.mubr.msk.f32.mxu0 %vm11382_vm1, %v12191_v28 }
 0x3d4   :  { %9377 = vmatmul.mubr.f32.vlgmr.msra.gmra.mrb[8].mxu1 %v3580_v34  ;;  %10587 = vmatprep.subr.bf16.mxu0 %v13877_v22  ;;  %v7744_v34 = vld [vmem:[%s13804_s2 + $0xa8] sm:$0xff] }
 0x3d5   :  { %10730 = vmatpush3.bf16.msra.mxu1 %v12473_v49  ;;  %9411 = vmatprep.mubr.msk.f32.mxu1 %vm11382_vm1, %v12191_v28  ;;  %v13903_v49 = vand.u32 4294901760, %v12433_v13  ;;  %v13907_v13 = vand.u32 4294901760, %v12484_v23  ;;  %v13911_v23 = vand.u32 4294901760, %v12521_v35  ;;  %v13915_v35 = vand.u32 4294901760, %v12564_v1 }
 0x3d6   :  { %10731 = vmatprep.subr.bf16.mxu1 %v13877_v22 }
 0x3d7   :  { %10589 = vmatpush3.bf16.msra.mxu0 %v12493_v17 }
 0x3d8   :  { %10590 = vmatprep.subr.bf16.mxu0 %v13877_v22 }
 0x3d9   :  { %10733 = vmatpush3.bf16.msra.mxu1 %v12493_v17  ;;  %v13904_v17 = vand.u32 4294901760, %v12435_v39  ;;  %v13908_v39 = vand.u32 4294901760, %v12489_v48  ;;  %v13912_v48 = vand.u32 4294901760, %v12526_v59  ;;  %v13916_v59 = vand.u32 4294901760, %v12569_v40 }
 0x3da   :  { %10734 = vmatprep.subr.bf16.mxu1 %v13877_v22 }
 0x3db   :  { %10592 = vmatpush3.bf16.msra.mxu0 %v12513_v5 }
 0x3dc   :  { %10593 = vmatprep.subr.bf16.mxu0 %v13877_v22 }
 0x3dd   :  { %10736 = vmatpush3.bf16.msra.mxu1 %v12513_v5  ;;  %v10657_v5 = vpack.c.bf16 %v13904_v17, %v13903_v49  ;;  %v10856_v49 = vpack.c.bf16 %v7744_v34, %v7743_v45  ;;  %v7745_v17 = vld [vmem:[%s13804_s2 + $0xb0] sm:$0xff]  ;;  %v5104_v34 = vld [vmem:[%s13804_s2 + $0x58] sm:$0xff] }
 0x3de   :  { %10737 = vmatprep.subr.bf16.mxu1 %v13877_v22  ;;  %v5103_v45 = vld [vmem:[%s13804_s2 + $0x50] sm:$0xff] }
 0x3df   :  { %10595 = vmatpush3.bf16.msra.mxu0 %v12549_v51 }
 0x3e0   :  { %10596 = vmatprep.subr.bf16.mxu0 %v13877_v22 }
 0x3e1   :  { %10739 = vmatpush3.bf16.msra.mxu1 %v12549_v51  ;;  %v13905_v51 = vand.u32 4294901760, %v12460_v42  ;;  %v10663_v42 = vpack.c.bf16 %v13908_v39, %v13907_v13  ;;  %v7749_v39 = vld [vmem:[%s13804_s2 + $0xd0] sm:$0xff] }
 0x3e2   :  { %10740 = vmatprep.subr.bf16.mxu1 %v13877_v22 }
 0x3e3   :  { %10598 = vmatpush3.bf16.msra.mxu0 %v12553_v62 }
 0x3e4   :  { %10599 = vmatprep.subr.bf16.mxu0 %v13877_v22 }
 0x3e5   :  { %10742 = vmatpush3.bf16.msra.mxu1 %v12553_v62  ;;  %v13906_v62 = vand.u32 4294901760, %v12465_v47  ;;  %v13909_v47 = vand.u32 4294901760, %v12504_v36  ;;  %v13913_v36 = vand.u32 4294901760, %v12542_v12  ;;  %v13917_v12 = vand.u32 4294901760, %v12581_v11 }
 0x3e6   :  { %10743 = vmatprep.subr.bf16.mxu1 %v13877_v22 }
 0x3e7   :  { %10601 = vmatpush3.bf16.msra.mxu0 %v12573_v16 }
 0x3e8   :  { %10602 = vmatprep.subr.bf16.mxu0 %v13877_v22 }
 0x3e9   :  { %10745 = vmatpush3.bf16.msra.mxu1 %v12573_v16  ;;  %v10660_v16 = vpack.c.bf16 %v13906_v62, %v13905_v51  ;;  %v7747_v62 = vld [vmem:[%s13804_s2 + $0xc0] sm:$0xff] }
 0x3ea   :  { %10746 = vmatprep.subr.bf16.mxu1 %v13877_v22 }
 0x3eb   :  { %10604 = vmatpush3.bf16.msra.mxu0 %v12599_v31 }
 0x3ec   :  { %10605 = vmatprep.subr.bf16.mxu0 %v13877_v22 }
 0x3ed   :  { %10748 = vmatpush3.bf16.msra.mxu1 %v12599_v31 }
 0x3ee   :  { %10749 = vmatprep.subr.bf16.mxu1 %v13877_v22 }
 0x3ef   :  { %10607 = vmatpush3.bf16.msra.mxu0 %v12601_v0 }
 0x3f0   :  { %10608 = vmatprep.subr.bf16.mxu0 %v13877_v22 }
 0x3f1   :  { %10751 = vmatpush3.bf16.msra.mxu1 %v12601_v0  ;;  %v10669_v0 = vpack.c.bf16 %v13912_v48, %v13911_v23  ;;  %v7753_v48 = vld [vmem:[%s13804_s2 + $0xf0] sm:$0xff] }
 0x3f2   :  { %9202 = vmatmul.mubr.f32.vlgmr.msra.gmra.mrb[12].mxu0 %v12674_v56  ;;  %10752 = vmatprep.subr.bf16.mxu1 %v13877_v22 }
 0x3f3   :  { %10610 = vmatpush3.bf16.msra.mxu0 %v12605_v38  ;;  %9236 = vmatprep.mubr.msk.f32.mxu0 %vm11382_vm1, %v12191_v28 }
 0x3f4   :  { %9412 = vmatmul.mubr.f32.vlgmr.msra.gmra.mrb[8].mxu1 %v12679_v21  ;;  %10611 = vmatprep.subr.bf16.mxu0 %v13877_v22 }
 0x3f5   :  { %10754 = vmatpush3.bf16.msra.mxu1 %v12605_v38  ;;  %9446 = vmatprep.mubr.msk.f32.mxu1 %vm11382_vm1, %v12191_v28 }
 0x3f6   :  { %10755 = vmatprep.subr.bf16.mxu1 %v13877_v22 }
 0x3f7   :  { %10613 = vmatpush3.bf16.msra.mxu0 %v12609_v24 }
 0x3f8   :  { %10614 = vmatprep.subr.bf16.mxu0 %v13877_v22 }
 0x3f9   :  { %10757 = vmatpush3.bf16.msra.mxu1 %v12609_v24  ;;  %v10675_v24 = vpack.c.bf16 %v13916_v59, %v13915_v35 }
 0x3fa   :  { %10758 = vmatprep.subr.bf16.mxu1 %v13877_v22 }
 0x3fb   :  { %10616 = vmatpush3.bf16.msra.mxu0 %v12613_v15 }
 0x3fc   :  { %10617 = vmatprep.subr.bf16.mxu0 %v13877_v22 }
 0x3fd   :  { %10760 = vmatpush3.bf16.msra.mxu1 %v12613_v15 }
 0x3fe   :  { %10761 = vmatprep.subr.bf16.mxu1 %v13877_v22 }
 0x3ff   :  { %10619 = vmatpush3.bf16.msra.mxu0 %v12617_v61 }
 0x400   :  { %10620 = vmatprep.subr.bf16.mxu0 %v13877_v22 }
 0x401   :  { %10763 = vmatpush3.bf16.msra.mxu1 %v12617_v61 }
 0x402   :  { %10764 = vmatprep.subr.bf16.mxu1 %v13877_v22 }
 0x403   :  { %10622 = vmatpush3.bf16.msra.mxu0 %v12621_v18 }
 0x404   :  { %10623 = vmatprep.subr.bf16.mxu0 %v13877_v22 }
 0x405   :  { %10766 = vmatpush3.bf16.msra.mxu1 %v12621_v18 }
 0x406   :  { %10767 = vmatprep.subr.bf16.mxu1 %v13877_v22 }
 0x407   :  { %10625 = vmatpush3.bf16.msra.mxu0 %v12625_v19 }
 0x408   :  { %10626 = vmatprep.subr.bf16.mxu0 %v13877_v22 }
 0x409   :  { %10769 = vmatpush3.bf16.msra.mxu1 %v12625_v19 }
 0x40a   :  { %10770 = vmatprep.subr.bf16.mxu1 %v13877_v22 }
 0x40b   :  { %10628 = vmatpush3.bf16.msra.mxu0 %v12629_v41 }
 0x40c   :  { %10629 = vmatprep.subr.bf16.mxu0 %v13877_v22 }
 0x40d   :  { %10772 = vmatpush3.bf16.msra.mxu1 %v12629_v41 }
 0x40e   :  { %10773 = vmatprep.subr.bf16.mxu1 %v13877_v22 }
 0x40f   :  { %10631 = vmatpush3.bf16.msra.mxu0 %v12633_v50 }
 0x410   :  { %10632 = vmatprep.subr.bf16.mxu0 %v13877_v22 }
 0x411   :  { %10775 = vmatpush3.bf16.msra.mxu1 %v12633_v50 }
 0x412   :  { %9237 = vmatmul.mubr.f32.vlgmr.msra.gmra.mrb[12].mxu0 %v12677_v63  ;;  %10776 = vmatprep.subr.bf16.mxu1 %v13877_v22  ;;  %v13910_v63 = vand.u32 4294901760, %v12509_v29  ;;  %v13914_v29 = vand.u32 4294901760, %v12547_v53  ;;  %v13918_v53 = vand.u32 4294901760, %v12586_v2 }
 0x413   :  { %10634 = vmatpush3.bf16.msra.mxu0 %v12289_v25  ;;  %9271 = vmatprep.mubr.msk.f32.mxu0 %vm11382_vm1, %v12191_v28 }
 0x414   :  { %9447 = vmatmul.mubr.f32.vlgmr.msra.gmra.mrb[8].mxu1 %v12683_v43  ;;  %10635 = vmatprep.subr.bf16.mxu0 %v13877_v22  ;;  %v10666_v31 = vpack.c.bf16 %v13910_v63, %v13909_v47  ;;  %v10672_v38 = vpack.c.bf16 %v13914_v29, %v13913_v36  ;;  %v10678_v15 = vpack.c.bf16 %v13918_v53, %v13917_v12  ;;  %v7741_v43 = vld [vmem:[%s13804_s2 + $0x90] sm:$0xff]  ;;  %v7751_v63 = vld [vmem:[%s13804_s2 + $0xe0] sm:$0xff]  ;;  %v13919_v12 = vld [vmem:[#allocation5_spill] sm:$0xff] }
 0x415   :  { %10778 = vmatpush3.bf16.msra.mxu1 %v12289_v25  ;;  %9481 = vmatprep.mubr.msk.f32.mxu1 %vm11382_vm1, %v12191_v28  ;;  %v5093_v29 = vld [vmem:[%s13804_s2] sm:$0xff] }
 0x416   :  { %10779 = vmatprep.subr.bf16.mxu1 %v13877_v22 }
 0x417   :  { %10637 = vmatpush3.bf16.msra.mxu0 %v12311_v9 }
 0x418   :  { %10638 = vmatprep.subr.bf16.mxu0 %v13877_v22 }
 0x419   :  { %10781 = vmatpush3.bf16.msra.mxu1 %v12311_v9 }
 0x41a   :  { %10782 = vmatprep.subr.bf16.mxu1 %v13877_v22 }
 0x41b   :  { %10640 = vmatpush3.bf16.msra.mxu0 %v12333_v6 }
 0x41c   :  { %10641 = vmatprep.subr.bf16.mxu0 %v13877_v22 }
 0x41d   :  { %10784 = vmatpush3.bf16.msra.mxu1 %v12333_v6 }
 0x41e   :  { %10785 = vmatprep.subr.bf16.mxu1 %v13877_v22 }
 0x41f   :  { %10643 = vmatpush3.bf16.msra.mxu0 %v12355_v33 }
 0x420   :  { %10644 = vmatprep.subr.bf16.mxu0 %v13877_v22 }
 0x421   :  { %10787 = vmatpush3.bf16.msra.mxu1 %v12355_v33 }
 0x422   :  { %10788 = vmatprep.subr.bf16.mxu1 %v13877_v22 }
 0x423   :  { %10646 = vmatpush3.bf16.msra.mxu0 %v12377_v54 }
 0x424   :  { %10647 = vmatprep.subr.bf16.mxu0 %v13877_v22 }
 0x425   :  { %10790 = vmatpush3.bf16.msra.mxu1 %v12377_v54 }
 0x426   :  { %10791 = vmatprep.subr.bf16.mxu1 %v13877_v22 }
 0x427   :  { %10649 = vmatpush3.bf16.msra.mxu0 %v12399_v10 }
 0x428   :  { %10650 = vmatprep.subr.bf16.mxu0 %v13877_v22 }
 0x429   :  { %10793 = vmatpush3.bf16.msra.mxu1 %v12399_v10 }
 0x42a   :  { %10794 = vmatprep.subr.bf16.mxu1 %v13877_v22 }
 0x42b   :  { %10652 = vmatpush3.bf16.msra.mxu0 %v12421_v4 }
 0x42c   :  { %10653 = vmatprep.subr.bf16.mxu0 %v13877_v22 }
 0x42d   :  { %10796 = vmatpush3.bf16.msra.mxu1 %v12421_v4 }
 0x42e   :  { %10797 = vmatprep.subr.bf16.mxu1 %v13877_v22 }
 0x42f   :  { %10655 = vmatpush3.bf16.msra.mxu0 %v12448_v3 }
 0x430   :  { %10656 = vmatprep.subr.bf16.mxu0 %v13877_v22 }
 0x431   :  { %10799 = vmatpush3.bf16.msra.mxu1 %v12448_v3 }
 0x432   :  { %9272 = vmatmul.mubr.f32.vlgmr.msra.gmra.mrb[12].mxu0 %v2936_v27  ;;  %10800 = vmatprep.subr.bf16.mxu1 %v13877_v22  ;;  %v7740_v27 = vld [vmem:[%s13804_s2 + $0x88] sm:$0xff] }
 0x433   :  { %10658 = vmatpush3.bf16.msra.mxu0 %v10657_v5  ;;  %9306 = vmatprep.mubr.msk.f32.mxu0 %vm11382_vm1, %v12191_v28 }
 0x434   :  { %9482 = vmatmul.mubr.f32.vlgmr.msra.gmra.mrb[8].mxu1 %v3578_v20  ;;  %10659 = vmatprep.subr.bf16.mxu0 %v13877_v22  ;;  %v7742_v20 = vld [vmem:[%s13804_s2 + $0x98] sm:$0xff] }
 0x435   :  { %10802 = vmatpush3.bf16.msra.mxu1 %v10657_v5  ;;  %9516 = vmatprep.mubr.msk.f32.mxu1 %vm11382_vm1, %v12191_v28  ;;  %v10852_v32 = vpack.c.bf16 %v7742_v20, %v7741_v43  ;;  %v7746_v5 = vld [vmem:[%s13804_s2 + $0xb8] sm:$0xff]  ;;  %v5102_v20 = vld [vmem:[%s13804_s2 + $0x48] sm:$0xff] }
 0x436   :  { %10803 = vmatprep.subr.bf16.mxu1 %v13877_v22  ;;  %v10860_v51 = vpack.c.bf16 %v7746_v5, %v7745_v17  ;;  %v5105_v17 = vld [vmem:[%s13804_s2 + $0x60] sm:$0xff]  ;;  %v5106_v5 = vld [vmem:[%s13804_s2 + $0x68] sm:$0xff] }
 0x437   :  { %10661 = vmatpush3.bf16.msra.mxu0 %v10660_v16 }
 0x438   :  { %10662 = vmatprep.subr.bf16.mxu0 %v13877_v22 }
 0x439   :  { %10805 = vmatpush3.bf16.msra.mxu1 %v10660_v16  ;;  %v7748_v16 = vld [vmem:[%s13804_s2 + $0xc8] sm:$0xff] }
 0x43a   :  { %10806 = vmatprep.subr.bf16.mxu1 %v13877_v22  ;;  %v10864_v13 = vpack.c.bf16 %v7748_v16, %v7747_v62  ;;  %v5107_v62 = vld [vmem:[%s13804_s2 + $0x70] sm:$0xff]  ;;  %v5108_v16 = vld [vmem:[%s13804_s2 + $0x78] sm:$0xff] }
 0x43b   :  { %10664 = vmatpush3.bf16.msra.mxu0 %v10663_v42 }
 0x43c   :  { %10665 = vmatprep.subr.bf16.mxu0 %v13877_v22 }
 0x43d   :  { %10808 = vmatpush3.bf16.msra.mxu1 %v10663_v42  ;;  %v7750_v42 = vld [vmem:[%s13804_s2 + $0xd8] sm:$0xff] }
 0x43e   :  { %10809 = vmatprep.subr.bf16.mxu1 %v13877_v22  ;;  %v10868_v47 = vpack.c.bf16 %v7750_v42, %v7749_v39  ;;  %v7755_v39 = vld [vmem:[%s13804_s2 + $0x100] sm:$0xff]  ;;  %v7756_v42 = vld [vmem:[%s13804_s2 + $0x108] sm:$0xff] }
 0x43f   :  { %10667 = vmatpush3.bf16.msra.mxu0 %v10666_v31 }
 0x440   :  { %10668 = vmatprep.subr.bf16.mxu0 %v13877_v22 }
 0x441   :  { %10811 = vmatpush3.bf16.msra.mxu1 %v10666_v31  ;;  %v7752_v31 = vld [vmem:[%s13804_s2 + $0xe8] sm:$0xff] }
 0x442   :  { %10812 = vmatprep.subr.bf16.mxu1 %v13877_v22  ;;  %v10872_v23 = vpack.c.bf16 %v7752_v31, %v7751_v63  ;;  %v7757_v63 = vld [vmem:[%s13804_s2 + $0x110] sm:$0xff]  ;;  %v7758_v31 = vld [vmem:[%s13804_s2 + $0x118] sm:$0xff] }
 0x443   :  { %10670 = vmatpush3.bf16.msra.mxu0 %v10669_v0 }
 0x444   :  { %10671 = vmatprep.subr.bf16.mxu0 %v13877_v22 }
 0x445   :  { %10814 = vmatpush3.bf16.msra.mxu1 %v10669_v0  ;;  %v7754_v0 = vld [vmem:[%s13804_s2 + $0xf8] sm:$0xff] }
 0x446   :  { %10815 = vmatprep.subr.bf16.mxu1 %v13877_v22  ;;  %v10876_v36 = vpack.c.bf16 %v7754_v0, %v7753_v48  ;;  %v7759_v0 = vld [vmem:[%s13804_s2 + $0x120] sm:$0xff] }
 0x447   :  { %10673 = vmatpush3.bf16.msra.mxu0 %v10672_v38 }
 0x448   :  { %10674 = vmatprep.subr.bf16.mxu0 %v13877_v22 }
 0x449   :  { %10817 = vmatpush3.bf16.msra.mxu1 %v10672_v38  ;;  %v5094_v38 = vld [vmem:[%s13804_s2 + $0x8] sm:$0xff] }
 0x44a   :  { %10818 = vmatprep.subr.bf16.mxu1 %v13877_v22  ;;  %v10880_v35 = vpack.c.bf16 %v5094_v38, %v5093_v29 }
 0x44b   :  { %10676 = vmatpush3.bf16.msra.mxu0 %v10675_v24 }
 0x44c   :  { %10677 = vmatprep.subr.bf16.mxu0 %v13877_v22 }
 0x44d   :  { %10820 = vmatpush3.bf16.msra.mxu1 %v10675_v24 }
 0x44e   :  { %10821 = vmatprep.subr.bf16.mxu1 %v13877_v22 }
 0x44f   :  { %10679 = vmatpush3.bf16.msra.mxu0 %v10678_v15 }
 0x450   :  { %10680 = vmatprep.subr.bf16.mxu0 %v13877_v22 }
 0x451   :  { %10823 = vmatpush3.bf16.msra.mxu1 %v10678_v15  ;;  %v13920_v15 = vld [vmem:[#allocation10_spill] sm:$0xff] }
 0x452   :  { %9307 = vmatmul.mubr.f32.vlgmr.msra.gmra.mrb[12].mxu0 %v12674_v56  ;;  %10824 = vmatprep.subr.bf16.mxu1 %v13877_v22 }
 0x453   :  { %10682 = vmatpush3.bf16.msra.mxu0 %v12289_v25  ;;  %9341 = vmatprep.mubr.msk.f32.mxu0 %vm11382_vm1, %v12191_v28 }
 0x454   :  { %9517 = vmatmul.mubr.f32.vlgmr.msra.gmra.mrb[8].mxu1 %v12679_v21  ;;  %10683 = vmatprep.subr.bf16.mxu0 %v13877_v22 }
 0x455   :  { %10826 = vmatpush3.bf16.msra.mxu1 %v12289_v25  ;;  %9551 = vmatprep.mubr.msk.f32.mxu1 %vm11382_vm1, %v12191_v28  ;;  %v12898_v25 = vld [vmem:[#allocation3] sm:$0xff] }
 0x456   :  { %10827 = vmatprep.subr.bf16.mxu1 %v13877_v22 }
 0x457   :  { %10685 = vmatpush3.bf16.msra.mxu0 %v12311_v9 }
 0x458   :  { %10686 = vmatprep.subr.bf16.mxu0 %v13877_v22 }
 0x459   :  { %10829 = vmatpush3.bf16.msra.mxu1 %v12311_v9  ;;  %v4142_v9 = vld [vmem:[%s13801_s14] sm:$0xff] }
 0x45a   :  { %10830 = vmatprep.subr.bf16.mxu1 %v13877_v22 }
 0x45b   :  { %10688 = vmatpush3.bf16.msra.mxu0 %v12333_v6 }
 0x45c   :  { %10689 = vmatprep.subr.bf16.mxu0 %v13877_v22 }
 0x45d   :  { %10832 = vmatpush3.bf16.msra.mxu1 %v12333_v6  ;;  %v12906_v6 = vand.u32 4294901760, %v4142_v9 }
 0x45e   :  { %10833 = vmatprep.subr.bf16.mxu1 %v13877_v22 }
 0x45f   :  { %10691 = vmatpush3.bf16.msra.mxu0 %v12355_v33 }
 0x460   :  { %10692 = vmatprep.subr.bf16.mxu0 %v13877_v22 }
 0x461   :  { %10835 = vmatpush3.bf16.msra.mxu1 %v12355_v33 }
 0x462   :  { %10836 = vmatprep.subr.bf16.mxu1 %v13877_v22 }
 0x463   :  { %10694 = vmatpush3.bf16.msra.mxu0 %v12377_v54 }
 0x464   :  { %10695 = vmatprep.subr.bf16.mxu0 %v13877_v22 }
 0x465   :  { %10838 = vmatpush3.bf16.msra.mxu1 %v12377_v54 }
 0x466   :  { %10839 = vmatprep.subr.bf16.mxu1 %v13877_v22 }
 0x467   :  { %10697 = vmatpush3.bf16.msra.mxu0 %v12399_v10 }
 0x468   :  { %10698 = vmatprep.subr.bf16.mxu0 %v13877_v22 }
 0x469   :  { %10841 = vmatpush3.bf16.msra.mxu1 %v12399_v10 }
 0x46a   :  { %10842 = vmatprep.subr.bf16.mxu1 %v13877_v22 }
 0x46b   :  { %10700 = vmatpush3.bf16.msra.mxu0 %v12421_v4 }
 0x46c   :  { %10701 = vmatprep.subr.bf16.mxu0 %v13877_v22 }
 0x46d   :  { %10844 = vmatpush3.bf16.msra.mxu1 %v12421_v4 }
 0x46e   :  { %10845 = vmatprep.subr.bf16.mxu1 %v13877_v22 }
 0x46f   :  { %10703 = vmatpush3.bf16.msra.mxu0 %v12448_v3 }
 0x470   :  { %9554 = vmatprep.subr.mxu0 %v12191_v28  ;;  %v4224_v28 = vsub.f32 %v4142_v9, %v12906_v6 }
 0x471   :  { %10847 = vmatpush3.bf16.msra.mxu1 %v12448_v3 }
 0x472   :  { %9342 = vmatmul.mubr.f32.vlgmr.msra.gmra.mrb[12].mxu0 %v12674_v56  ;;  %v4225_v11 = vand.u32 4294901760, %v4224_v28 }
 0x473   :  { %9556 = vmatprep.mubr.msk.f32.mxu0 %vm11382_vm1, %v12898_v25  ;;  %9555 = vmatpush3.msra.mxu0 %v12906_v6 }
 0x474   :  { %9552 = vmatmul.mubr.f32.vlgmr.msra.gmra.mrb[8].mxu1 %v12679_v21  ;;  %9559 = vmatprep.subr.mxu0 %v12898_v25  ;;  %v4226_v19 = vsub.f32 %v4224_v28, %v4225_v11  ;;  %v7739_v21 = vld [vmem:[%s13804_s2 + $0x80] sm:$0xff] }
 0x475   :  { %v10848_v58 = vpack.c.bf16 %v7740_v27, %v7739_v21  ;;  %v5100_v21 = vld [vmem:[%s13804_s2 + $0x38] sm:$0xff] }
 0x476   :  { %v4227_v14 = vand.u32 4294901760, %v4226_v19 }
 0x477   :  { %10849 = vmatprep.subr.bf16.mxu1 %v10848_v58 }
 0x478   :  { %10851 = vmatpush3.bf16.msra.mxu1 %v10848_v58  ;;  %v5101_v58 = vld [vmem:[%s13804_s2 + $0x40] sm:$0xff] }
 0x479   :  { %10853 = vmatprep.subr.bf16.mxu1 %v10852_v32 }
 0x47c   :  { %10855 = vmatpush3.bf16.msra.mxu1 %v10852_v32  ;;  %v10896_v32 = vpack.c.bf16 %v5102_v20, %v5101_v58 }
 0x47d   :  { %10857 = vmatprep.subr.bf16.mxu1 %v10856_v49 }
 0x480   :  { %10859 = vmatpush3.bf16.msra.mxu1 %v10856_v49  ;;  %v10900_v49 = vpack.c.bf16 %v5104_v34, %v5103_v45  ;;  %v13194_v45 = vld [vmem:[%s13799_s13 + $0x48] sm:$0xff] }
 0x481   :  { %10861 = vmatprep.subr.bf16.mxu1 %v10860_v51 }
 0x484   :  { %10863 = vmatpush3.bf16.msra.mxu1 %v10860_v51  ;;  %v10904_v51 = vpack.c.bf16 %v5106_v5, %v5105_v17  ;;  %v13211_v5 = vld [vmem:[%s13799_s13 + $0x50] sm:$0xff] }
 0x485   :  { %10865 = vmatprep.subr.bf16.mxu1 %v10864_v13 }
 0x488   :  { %10867 = vmatpush3.bf16.msra.mxu1 %v10864_v13  ;;  %v10908_v13 = vpack.c.bf16 %v5108_v16, %v5107_v62  ;;  %v5492_v62 = vand.u32 4294901760, %v13211_v5 }
 0x489   :  { %10869 = vmatprep.subr.bf16.mxu1 %v10868_v47 }
 0x48c   :  { %10871 = vmatpush3.bf16.msra.mxu1 %v10868_v47  ;;  %v10912_v47 = vpack.c.bf16 %v7756_v42, %v7755_v39  ;;  %v13233_v39 = vld [vmem:[%s13799_s13 + $0x60] sm:$0xff]  ;;  %v13238_v42 = vld [vmem:[%s13799_s13 + $0x68] sm:$0xff] }
 0x48d   :  { %10873 = vmatprep.subr.bf16.mxu1 %v10872_v23 }
 0x490   :  { %10875 = vmatpush3.bf16.msra.mxu1 %v10872_v23  ;;  %v10916_v23 = vpack.c.bf16 %v7758_v31, %v7757_v63  ;;  %v5501_v63 = vand.u32 4294901760, %v13238_v42 }
 0x491   :  { %10877 = vmatprep.subr.bf16.mxu1 %v10876_v36 }
 0x494   :  { %10879 = vmatpush3.bf16.msra.mxu1 %v10876_v36  ;;  %v7760_v36 = vld [vmem:[%s13804_s2 + $0x128] sm:$0xff] }
 0x495   :  { %10881 = vmatprep.subr.bf16.mxu1 %v10880_v35  ;;  %v10920_v38 = vpack.c.bf16 %v7760_v36, %v7759_v0  ;;  %v13259_v0 = vld [vmem:[%s13799_s13 + $0x70] sm:$0xff]  ;;  %v13264_v36 = vld [vmem:[%s13799_s13 + $0x78] sm:$0xff] }
 0x545   :  { %v3490_v33 = vpop.f32.mrb[12].mxu0 }
 0x546   :  { %v3494_v54 = vmul.f32 0.001953125, %v3490_v33  ;;  %v9343_v10 = vpop.f32.mrb[13].mxu0 }
 0x547   :  { %v4132_v4 = vpop.f32.mrb[8].mxu1 }
 0x548   :  { %v4137_v3 = vmul.f32 %v3494_v54, %v3494_v54  ;;  %v4144_v56 = vsel %vm1509_vm7, %v3494_v54, 0  ;;  %v4136_v1 = vmul.f32 0.001953125, %v4132_v4  ;;  %v9553_v40 = vpop.f32.mrb[9].mxu1  ;;  %v13922_v54 = vld [vmem:[#allocation11_spill] sm:$0xff] }
 0x549   :  { %v4212_v2 = vand.u32 4294901760, %v4144_v56 }
 0x54a   :  { %v4138_v61 = vsub.f32 %v4136_v1, %v4137_v3  ;;  %v7737_v1 = vld [vmem:[%s13805_s7] ss:$0 sm:$0xff] }
 0x54b   :  { %v4213_v18 = vsub.f32 %v4144_v56, %v4212_v2 }
 0x54c   :  { %v4139_v60 = vmax.f32 %v4138_v61, 0.0 }
 0x54d   :  { %v4214_v41 = vand.u32 4294901760, %v4213_v18 }
 0x54e   :  { %v4140_v37 = vadd.f32 1e-05, %v4139_v60 }
 0x54f   :  { %v4215_v50 = vsub.f32 %v4213_v18, %v4214_v41 }
 0x550   :  { %11373 = vrsqrt.f32 %v4140_v37 }
 0x551   :  { %v4216_v52 = vand.u32 4294901760, %v4215_v50 }
 0x553   :  { %9557 = vmatmul.mubr.f32.vlgmr.msra.gmra.mrb[14].mxu0 %v4216_v52  ;;  %v5096_v52 = vld [vmem:[%s13804_s2 + $0x18] sm:$0xff] }
 0x554   :  { %9560 = vmatpush3.msra.mxu0 %v4227_v14  ;;  %9561 = vmatprep.mubr.msk.f32.mxu0 %vm11382_vm1, %v12898_v25 }
 0x555   :  { %9564 = vmatprep.subr.mxu0 %v12898_v25 }
 0x55a   :  { %v11374_v26 = vpop.eup %11373 }
 0x55b   :  { %9562 = vmatmul.mubr.f32.vlgmr.msra.gmra.mrb[14].mxu0 %v4212_v2  ;;  %v4593_v30 = vsel %vm1509_vm7, %v11374_v26, 0 }
 0x55c   :  { %9565 = vmatpush3.msra.mxu0 %v4224_v28  ;;  %9566 = vmatprep.mubr.msk.f32.mxu0 %vm11382_vm1, %v12898_v25  ;;  %v4661_v44 = vand.u32 4294901760, %v4593_v30 }
 0x55d   :  { %9569 = vmatprep.subr.mxu0 %v12898_v25 }
 0x55e   :  { %v4662_v55 = vsub.f32 %v4593_v30, %v4661_v44 }
 0x560   :  { %v4663_v46 = vand.u32 4294901760, %v4662_v55 }
 0x562   :  { %v4664_v8 = vsub.f32 %v4662_v55, %v4663_v46 }
 0x563   :  { %9567 = vmatmul.mubr.f32.vlgmr.msra.gmra.mrb[14].mxu0 %v4213_v18  ;;  %v7738_v18 = vld [vmem:[%s13806_s8] ss:$0 sm:$0xff] }
 0x564   :  { %9570 = vmatpush3.msra.mxu0 %v12906_v6  ;;  %9571 = vmatprep.mubr.msk.f32.mxu0 %vm11382_vm1, %v12898_v25  ;;  %v4665_v7 = vand.u32 4294901760, %v4664_v8 }
 0x565   :  { %9574 = vmatprep.subr.mxu0 %v12898_v25 }
 0x56b   :  { %9572 = vmatmul.mubr.f32.vlgmr.msra.gmra.mrb[14].mxu0 %v4214_v41 }
 0x56c   :  { %9575 = vmatpush3.msra.mxu0 %v4225_v11  ;;  %9576 = vmatprep.mubr.msk.f32.mxu0 %vm11382_vm1, %v12898_v25 }
 0x56d   :  { %9579 = vmatprep.subr.mxu0 %v12898_v25 }
 0x573   :  { %9577 = vmatmul.mubr.f32.vlgmr.msra.gmra.mrb[14].mxu0 %v4212_v2 }
 0x574   :  { %9580 = vmatpush3.msra.mxu0 %v12906_v6  ;;  %9581 = vmatprep.mubr.msk.f32.mxu0 %vm11382_vm1, %v12898_v25 }
 0x575   :  { %9584 = vmatprep.subr.mxu0 %v12898_v25 }
 0x57b   :  { %9582 = vmatmul.mubr.f32.vlgmr.msra.gmra.mrb[14].mxu0 %v4212_v2 }
 0x57c   :  { %9585 = vmatpush3.msra.mxu0 %v12906_v6  ;;  %9586 = vmatprep.mubr.msk.f32.mxu0 %vm11382_vm1, %v12898_v25 }
 0x57d   :  { %9589 = vmatprep.subr.mxu0 %v12898_v25 }
 0x57f   :  { %9587 = vmatmul.mubr.f32.vlgmr.msra.gmra.mrb[16].mxu0 %v4665_v7  ;;  %v5099_v7 = vld [vmem:[%s13804_s2 + $0x30] sm:$0xff] }
 0x580   :  { %9590 = vmatpush3.msra.mxu0 %v4227_v14  ;;  %9591 = vmatprep.mubr.msk.f32.mxu0 %vm11382_vm1, %v12898_v25  ;;  %v10892_v43 = vpack.c.bf16 %v5100_v21, %v5099_v7  ;;  %v13167_v21 = vld [vmem:[%s13799_s13 + $0x30] sm:$0xff] }
 0x581   :  { %9594 = vmatprep.subr.mxu0 %v12898_v25 }
 0x587   :  { %9592 = vmatmul.mubr.f32.vlgmr.msra.gmra.mrb[16].mxu0 %v4661_v44 }
 0x588   :  { %9595 = vmatpush3.msra.mxu0 %v4224_v28  ;;  %9596 = vmatprep.mubr.msk.f32.mxu0 %vm11382_vm1, %v12898_v25  ;;  %v13921_v28 = vld [vmem:[#allocation9_spill] sm:$0xff] }
 0x589   :  { %9599 = vmatprep.subr.mxu0 %v12898_v25 }
 0x58f   :  { %9597 = vmatmul.mubr.f32.vlgmr.msra.gmra.mrb[16].mxu0 %v4662_v55  ;;  %v5097_v55 = vld [vmem:[%s13804_s2 + $0x20] sm:$0xff] }
 0x590   :  { %9600 = vmatpush3.msra.mxu0 %v12906_v6  ;;  %9601 = vmatprep.mubr.msk.f32.mxu0 %vm11382_vm1, %v12898_v25 }
 0x591   :  { %9604 = vmatprep.subr.mxu0 %v12898_v25 }
 0x597   :  { %9602 = vmatmul.mubr.f32.vlgmr.msra.gmra.mrb[16].mxu0 %v4663_v46  ;;  %v5098_v46 = vld [vmem:[%s13804_s2 + $0x28] sm:$0xff] }
 0x598   :  { %9605 = vmatpush3.msra.mxu0 %v4225_v11  ;;  %9606 = vmatprep.mubr.msk.f32.mxu0 %vm11382_vm1, %v12898_v25  ;;  %v10888_v8 = vpack.c.bf16 %v5098_v46, %v5097_v55  ;;  %v13150_v55 = vld [vmem:[%s13799_s13 + $0x28] sm:$0xff] }
 0x599   :  { %9609 = vmatprep.subr.mxu0 %v12898_v25 }
 0x59f   :  { %9607 = vmatmul.mubr.f32.vlgmr.msra.gmra.mrb[16].mxu0 %v4661_v44 }
 0x5a0   :  { %9610 = vmatpush3.msra.mxu0 %v12906_v6  ;;  %9611 = vmatprep.mubr.msk.f32.mxu0 %vm11382_vm1, %v12898_v25 }
 0x5a1   :  { %10944 = vmatprep.subr.bf16.mxu0 %v13877_v22 }
 0x5a7   :  { %9612 = vmatmul.mubr.f32.vlgmr.msra.gmra.mrb[16].mxu0 %v4661_v44 }
 0x5a8   :  { %9760 = vmatprep.mubr.msk.f32.mxu0 %vm11382_vm1, %v12898_v25 }
 0x64e   :  { %v4588_v59 = vpop.f32.mrb[14].mxu0 }
 0x64f   :  { %v9583_v24 = vpop.f32.mrb[15].mxu0  ;;  %v5044_v53 = vrot.slane %v4588_v59, %v13919_v12  ;;  %v7761_v59 = vld [vmem:[%s13804_s2 + $0x130] sm:$0xff] }
 0x650   :  { %v7762_v24 = vld [vmem:[%s13804_s2 + $0x138] sm:$0xff] }
 0x651   :  { %v5045_v9 = vsub.f32 %v13920_v15, %v5044_v53  ;;  %v5046_v33 = vsub.f32 %v13921_v28, %v5044_v53  ;;  %v5047_v10 = vsub.f32 %v13922_v54, %v5044_v53  ;;  %v5048_v4 = vsub.f32 %v12664_v57, %v5044_v53  ;;  %v5095_v57 = vld [vmem:[%s13804_s2 + $0x10] sm:$0xff]  ;;  %v7766_v54 = vld [vmem:[%s13804_s2 + $0x158] sm:$0xff] }
 0x652   :  { %v10884_v44 = vpack.c.bf16 %v5096_v52, %v5095_v57  ;;  %v10924_v15 = vpack.c.bf16 %v7762_v24, %v7761_v59  ;;  %v13123_v52 = vld [vmem:[%s13799_s13 + $0x10] sm:$0xff] }
 0x67a   :  { %v5037_v6 = vpop.f32.mrb[16].mxu0 }
 0x67b   :  { %v5052_v3 = vrot.slane %v5037_v6, %v13919_v12  ;;  %v9613_v56 = vpop.f32.mrb[17].mxu0  ;;  %v7764_v6 = vld [vmem:[%s13804_s2 + $0x148] sm:$0xff] }
 0x67d   :  { %v5053_v40 = vmul.f32 %v5052_v3, %v5045_v9  ;;  %v5054_v11 = vmul.f32 %v5052_v3, %v5046_v33  ;;  %v5055_v2 = vmul.f32 %v5052_v3, %v5047_v10  ;;  %v5056_v61 = vmul.f32 %v5052_v3, %v5048_v4  ;;  %v7763_v9 = vld [vmem:[%s13804_s2 + $0x140] sm:$0xff]  ;;  %v7765_v33 = vld [vmem:[%s13804_s2 + $0x150] sm:$0xff]  ;;  %v7768_v3 = vld [vmem:[%s13804_s2 + $0x168] sm:$0xff] }
 0x67e   :  { %v10928_v28 = vpack.c.bf16 %v7764_v6, %v7763_v9  ;;  %v10932_v10 = vpack.c.bf16 %v7766_v54, %v7765_v33  ;;  %v7767_v4 = vld [vmem:[%s13804_s2 + $0x160] sm:$0xff] }
 0x67f   :  { %v5063_v19 = vmul.f32 %v7737_v1, %v5053_v40  ;;  %v5064_v41 = vmul.f32 %v7737_v1, %v5054_v11  ;;  %v5065_v50 = vmul.f32 %v7737_v1, %v5055_v2  ;;  %v5066_v14 = vmul.f32 %v7737_v1, %v5056_v61  ;;  %v7769_v1 = vld [vmem:[%s13804_s2 + $0x170] sm:$0xff]  ;;  %v7770_v40 = vld [vmem:[%s13804_s2 + $0x178] sm:$0xff] }
 0x680   :  { %v10936_v56 = vpack.c.bf16 %v7768_v3, %v7767_v4  ;;  %v10940_v11 = vpack.c.bf16 %v7770_v40, %v7769_v1 }
 0x681   :  { %v5073_v60 = vadd.f32 %v7738_v18, %v5063_v19  ;;  %v5074_v37 = vadd.f32 %v7738_v18, %v5064_v41  ;;  %v5075_v26 = vadd.f32 %v7738_v18, %v5065_v50  ;;  %v5076_v30 = vadd.f32 %v7738_v18, %v5066_v14  ;;  %v5445_v19 = vld [vmem:[%s13799_s13] sm:$0xff]  ;;  %v5446_v41 = vld [vmem:[%s13799_s13 + $0x8] sm:$0xff] }
 0x682   :  { %v5462_v50 = vand.u32 4294901760, %v5445_v19  ;;  %v5465_v14 = vand.u32 4294901760, %v5446_v41 }
 0x683   :  { %5085 = vst [vmem:[#allocation3 + $0x8] sm:$0xff] %v5073_v60  ;;  %5086 = vst [vmem:[#allocation3 + $0x10] sm:$0xff] %v5074_v37  ;;  %9646 = vmatprep.mubr.f32.mxu1 %v5073_v60  ;;  %v13128_v60 = vld [vmem:[%s13799_s13 + $0x18] sm:$0xff] }
 0x684   :  { %5087 = vst [vmem:[#allocation3 + $0x28] sm:$0xff] %v5075_v26  ;;  %5088 = vst [vmem:[#allocation3 + $0x30] sm:$0xff] %v5076_v30  ;;  %9647 = vmatmul.mubr.f32.vlgmr.msra.gmra.mrb[10].mxu1 %v5074_v37  ;;  %v13118_v57 = vpack.c.bf16 %v5465_v14, %v5462_v50  ;;  %v5468_v37 = vand.u32 4294901760, %v13123_v52 }
 0x685   :  { %10883 = vmatpush3.bf16.msra.mxu1 %v10880_v35  ;;  %9649 = vmatprep.mubr.f32.mxu1 %v5075_v26  ;;  %v5471_v26 = vand.u32 4294901760, %v13128_v60 }
 0x686   :  { %10885 = vmatprep.subr.bf16.mxu1 %v10884_v44  ;;  %10946 = vmatpush3.bf16.msra.mxu0 %v13118_v57  ;;  %v13289_v9 = vsub.f32 %v13123_v52, %v5468_v37 }
 0x687   :  { %10947 = vmatprep.subr.bf16.mxu0 %v13877_v22  ;;  %v13294_v6 = vsub.f32 %v13128_v60, %v5471_v26 }
 0x688   :  { %9650 = vmatmul.mubr.f32.gmra.mrb[12].mxu1 %v5076_v30  ;;  %v13140_v30 = vpack.c.bf16 %v5471_v26, %v5468_v37  ;;  %v13868_v54 = vand.u32 4294901760, %v13289_v9 }
 0x689   :  { %10887 = vmatpush3.bf16.msra.mxu1 %v10884_v44  ;;  %v13145_v44 = vld [vmem:[%s13799_s13 + $0x20] sm:$0xff] }
 0x68a   :  { %v5089_v27 = vld [vmem:[#allocation3 + $0x7] sm:$0xff]  ;;  %10889 = vmatprep.subr.bf16.mxu1 %v10888_v8  ;;  %v5090_v48 = vld [vmem:[#allocation3 + $0xf] sm:$0xff]  ;;  %10949 = vmatpush3.bf16.msra.mxu0 %v13140_v30  ;;  %v5474_v46 = vand.u32 4294901760, %v13145_v44  ;;  %v5570_v3 = vsub.f32 %v13289_v9, %v13868_v54 }
 0x68b   :  { %9684 = vmatprep.mubr.f32.mxu1 %v5089_v27  ;;  %v5091_v29 = vld [vmem:[#allocation3 + $0x27] sm:$0xff]  ;;  %v5092_v35 = vld [vmem:[#allocation3 + $0x2f] sm:$0xff]  ;;  %10950 = vmatprep.subr.bf16.mxu0 %v13877_v22  ;;  %v13172_v27 = vld [vmem:[%s13799_s13 + $0x38] sm:$0xff] }
 0x68c   :  { %v5300_v53 = vld [vmem:[#allocation3 + $0x9] sm:$0xff]  ;;  %v5301_v2 = vld [vmem:[#allocation3 + $0x11] sm:$0xff]  ;;  %v5483_v58 = vand.u32 4294901760, %v13172_v27 }
 0x68d   :  { %10891 = vmatpush3.bf16.msra.mxu1 %v10888_v8  ;;  %v5302_v61 = vld [vmem:[#allocation3 + $0x29] sm:$0xff]  ;;  %v5303_v18 = vld [vmem:[#allocation3 + $0x31] sm:$0xff]  ;;  %v5477_v8 = vand.u32 4294901760, %v13150_v55 }
 0x68e   :  { %10893 = vmatprep.subr.bf16.mxu1 %v10892_v43 }
 0x68f   :  { %v13162_v7 = vpack.c.bf16 %v5477_v8, %v5474_v46  ;;  %v13315_v1 = vsub.f32 %v13150_v55, %v5477_v8 }
 0x691   :  { %10895 = vmatpush3.bf16.msra.mxu1 %v10892_v43  ;;  %10952 = vmatpush3.bf16.msra.mxu0 %v13162_v7  ;;  %v5480_v43 = vand.u32 4294901760, %v13167_v21 }
 0x692   :  { %10897 = vmatprep.subr.bf16.mxu1 %v10896_v32  ;;  %10953 = vmatprep.subr.bf16.mxu0 %v13877_v22 }
 0x693   :  { %v13184_v20 = vpack.c.bf16 %v5483_v58, %v5480_v43 }
 0x695   :  { %10899 = vmatpush3.bf16.msra.mxu1 %v10896_v32  ;;  %v13189_v32 = vld [vmem:[%s13799_s13 + $0x40] sm:$0xff]  ;;  %10955 = vmatpush3.bf16.msra.mxu0 %v13184_v20 }
 0x696   :  { %10901 = vmatprep.subr.bf16.mxu1 %v10900_v49  ;;  %v5486_v34 = vand.u32 4294901760, %v13189_v32  ;;  %10956 = vmatprep.subr.bf16.mxu0 %v13877_v22 }
 0x699   :  { %10903 = vmatpush3.bf16.msra.mxu1 %v10900_v49  ;;  %v5489_v49 = vand.u32 4294901760, %v13194_v45 }
 0x69a   :  { %10905 = vmatprep.subr.bf16.mxu1 %v10904_v51 }
 0x69b   :  { %v13206_v17 = vpack.c.bf16 %v5489_v49, %v5486_v34 }
 0x69d   :  { %10907 = vmatpush3.bf16.msra.mxu1 %v10904_v51  ;;  %v13216_v51 = vld [vmem:[%s13799_s13 + $0x58] sm:$0xff]  ;;  %10958 = vmatpush3.bf16.msra.mxu0 %v13206_v17 }
 0x69e   :  { %10909 = vmatprep.subr.bf16.mxu1 %v10908_v13  ;;  %v5495_v16 = vand.u32 4294901760, %v13216_v51  ;;  %10959 = vmatprep.subr.bf16.mxu0 %v13877_v22 }
 0x6a1   :  { %10911 = vmatpush3.bf16.msra.mxu1 %v10908_v13  ;;  %v13228_v13 = vpack.c.bf16 %v5495_v16, %v5492_v62 }
 0x6a2   :  { %10913 = vmatprep.subr.bf16.mxu1 %v10912_v47 }
 0x6a3   :  { %10961 = vmatpush3.bf16.msra.mxu0 %v13228_v13 }
 0x6a4   :  { %9685 = vmatmul.mubr.f32.vlgmr.msra.gmra.mrb[10].mxu1 %v5090_v48  ;;  %10962 = vmatprep.subr.bf16.mxu0 %v13877_v22  ;;  %v13254_v48 = vsub.f32 %v5446_v41, %v5465_v14  ;;  %v13336_v14 = vsub.f32 %v13172_v27, %v5483_v58  ;;  %v13358_v27 = vsub.f32 %v13194_v45, %v5489_v49 }
 0x6a5   :  { %9687 = vmatprep.mubr.f32.mxu1 %v5091_v29  ;;  %10915 = vmatpush3.bf16.msra.mxu1 %v10912_v47  ;;  %v5498_v47 = vand.u32 4294901760, %v13233_v39  ;;  %v5504_v29 = vand.u32 4294901760, %v13259_v0  ;;  %v13375_v45 = vsub.f32 %v13216_v51, %v5495_v16  ;;  %v13396_v16 = vsub.f32 %v13238_v42, %v5501_v63 }
 0x6a6   :  { %10917 = vmatprep.subr.bf16.mxu1 %v10916_v23  ;;  %v13869_v59 = vand.u32 4294901760, %v13254_v48 }
 0x6a7   :  { %v13250_v31 = vpack.c.bf16 %v5501_v63, %v5498_v47  ;;  %v13391_v51 = vsub.f32 %v13233_v39, %v5498_v47  ;;  %v13413_v42 = vsub.f32 %v13259_v0, %v5504_v29 }
 0x6a8   :  { %9688 = vmatmul.mubr.f32.gmra.mrb[12].mxu1 %v5092_v35 }
 0x6a9   :  { %10919 = vmatpush3.bf16.msra.mxu1 %v10916_v23  ;;  %9722 = vmatprep.mubr.f32.mxu1 %v5300_v53  ;;  %v13252_v23 = vsub.f32 %v5445_v19, %v5462_v50  ;;  %v13331_v50 = vsub.f32 %v13167_v21, %v5480_v43  ;;  %v13353_v21 = vsub.f32 %v13189_v32, %v5486_v34 }
 0x6aa   :  { %10921 = vmatprep.subr.bf16.mxu1 %v10920_v38  ;;  %10964 = vmatpush3.bf16.msra.mxu0 %v13250_v31  ;;  %v13370_v32 = vsub.f32 %v13211_v5, %v5492_v62 }
 0x6ab   :  { %v13870_v35 = vand.u32 4294901760, %v13252_v23  ;;  %10965 = vmatprep.subr.bf16.mxu0 %v13877_v22  ;;  %v13864_v26 = vand.u32 4294901760, %v13331_v50 }
 0x6ad   :  { %10923 = vmatpush3.bf16.msra.mxu1 %v10920_v38  ;;  %v5507_v38 = vand.u32 4294901760, %v13264_v36  ;;  %v5556_v53 = vsub.f32 %v13252_v23, %v13870_v35 }
 0x6ae   :  { %10925 = vmatprep.subr.bf16.mxu1 %v10924_v15 }
 0x6af   :  { %v13278_v24 = vpack.c.bf16 %v5507_v38, %v5504_v29  ;;  %v13418_v63 = vsub.f32 %v13264_v36, %v5507_v38  ;;  %v13434_v38 = vpack.c.bf16 %v13254_v48, %v13252_v23 }
 0x6b1   :  { %10927 = vmatpush3.bf16.msra.mxu1 %v10924_v15  ;;  %v5563_v15 = vsub.f32 %v13254_v48, %v13869_v59  ;;  %10967 = vmatpush3.bf16.msra.mxu0 %v13278_v24 }
 0x6b2   :  { %10929 = vmatprep.subr.bf16.mxu1 %v10928_v28  ;;  %10968 = vmatprep.subr.bf16.mxu0 %v13877_v22 }
 0x6b3   :  { %v5564_v33 = vand.u32 4294901760, %v5563_v15  ;;  %v13861_v15 = vand.u32 4294901760, %v13358_v27 }
 0x6b5   :  { %10931 = vmatpush3.bf16.msra.mxu1 %v10928_v28  ;;  %v5557_v28 = vand.u32 4294901760, %v5556_v53  ;;  %v13862_v53 = vand.u32 4294901760, %v13353_v21  ;;  %v5619_v34 = vsub.f32 %v13358_v27, %v13861_v15 }
 0x6b6   :  { %10933 = vmatprep.subr.bf16.mxu1 %v10932_v10 }
 0x6b7   :  { %v13302_v4 = vpack.c.bf16 %v5564_v33, %v5557_v28  ;;  %v5612_v33 = vsub.f32 %v13353_v21, %v13862_v53 }
 0x6b9   :  { %10935 = vmatpush3.bf16.msra.mxu1 %v10932_v10  ;;  %v13867_v10 = vand.u32 4294901760, %v13294_v6  ;;  %v5613_v49 = vand.u32 4294901760, %v5612_v33  ;;  %v13855_v33 = vand.u32 4294901760, %v13418_v63 }
 0x6ba   :  { %10937 = vmatprep.subr.bf16.mxu1 %v10936_v56 }
 0x6bb   :  { %v5577_v40 = vsub.f32 %v13294_v6, %v13867_v10  ;;  %v5661_v0 = vsub.f32 %v13418_v63, %v13855_v33 }
 0x6bd   :  { %10939 = vmatpush3.bf16.msra.mxu1 %v10936_v56  ;;  %v13310_v56 = vsub.f32 %v13145_v44, %v5474_v46  ;;  %v13863_v44 = vand.u32 4294901760, %v13336_v14  ;;  %v5598_v46 = vsub.f32 %v13331_v50, %v13864_v26 }
 0x6be   :  { %10941 = vmatprep.subr.bf16.mxu1 %v10940_v11 }
 0x6bf   :  { %v5605_v8 = vsub.f32 %v13336_v14, %v13863_v44  ;;  %v5599_v43 = vand.u32 4294901760, %v5598_v46 }
 0x6c1   :  { %10943 = vmatpush3.bf16.msra.mxu1 %v10940_v11  ;;  %v5571_v11 = vand.u32 4294901760, %v5570_v3  ;;  %v5606_v58 = vand.u32 4294901760, %v5605_v8  ;;  %v13860_v3 = vand.u32 4294901760, %v13370_v32 }
 0x6c2   :  { %11088 = vmatprep.subr.bf16.mxu1 %v13877_v22 }
 0x6c3   :  { %v13362_v28 = vpack.c.bf16 %v5606_v58, %v5599_v43  ;;  %v5626_v5 = vsub.f32 %v13370_v32, %v13860_v3  ;;  %v13856_v58 = vand.u32 4294901760, %v13413_v42 }
 0x6c4   :  { %9723 = vmatmul.mubr.f32.vlgmr.msra.gmra.mrb[10].mxu1 %v5301_v2  ;;  %v13866_v2 = vand.u32 4294901760, %v13310_v56 }
 0x6c5   :  { %9725 = vmatprep.mubr.f32.mxu1 %v5302_v61  ;;  %11090 = vmatpush3.bf16.msra.mxu1 %v13118_v57  ;;  %v13865_v61 = vand.u32 4294901760, %v13315_v1 }
 0x6c6   :  { %11091 = vmatprep.subr.bf16.mxu1 %v13877_v22  ;;  %v5584_v19 = vsub.f32 %v13310_v56, %v13866_v2 }
 0x6c7   :  { %v5591_v41 = vsub.f32 %v13315_v1, %v13865_v61 }
 0x6c8   :  { %9726 = vmatmul.mubr.f32.gmra.mrb[12].mxu1 %v5303_v18  ;;  %v5578_v18 = vand.u32 4294901760, %v5577_v40  ;;  %v5585_v60 = vand.u32 4294901760, %v5584_v19  ;;  %v13859_v40 = vand.u32 4294901760, %v13375_v45  ;;  %v5627_v19 = vand.u32 4294901760, %v5626_v5 }
 0x6c9   :  { %9970 = vmatprep.mubr.msk.f32.mxu1 %vm11382_vm1, %v12898_v25  ;;  %11093 = vmatpush3.bf16.msra.mxu1 %v13140_v30  ;;  %v5592_v37 = vand.u32 4294901760, %v5591_v41  ;;  %v13438_v5 = vpack.c.bf16 %v13294_v6, %v13289_v9 }
 0x6ca   :  { %11094 = vmatprep.subr.bf16.mxu1 %v13877_v22  ;;  %v13338_v52 = vpack.c.bf16 %v5578_v18, %v5571_v11  ;;  %v5620_v11 = vand.u32 4294901760, %v5619_v34  ;;  %v5633_v62 = vsub.f32 %v13375_v45, %v13859_v40 }
 0x6cb   :  { %v13342_v55 = vpack.c.bf16 %v5592_v37, %v5585_v60  ;;  %v13858_v60 = vand.u32 4294901760, %v13391_v51  ;;  %v13857_v37 = vand.u32 4294901760, %v13396_v16 }
 0x6cc   :  { %v13398_v18 = vpack.c.bf16 %v5620_v11, %v5613_v49  ;;  %v5634_v41 = vand.u32 4294901760, %v5633_v62  ;;  %v5654_v49 = vsub.f32 %v13413_v42, %v13856_v58  ;;  %v5662_v11 = vand.u32 4294901760, %v5661_v0 }
 0x6cd   :  { %11096 = vmatpush3.bf16.msra.mxu1 %v13162_v7  ;;  %v5640_v39 = vsub.f32 %v13391_v51, %v13858_v60  ;;  %v5647_v47 = vsub.f32 %v13396_v16, %v13857_v37  ;;  %v13442_v62 = vpack.c.bf16 %v13315_v1, %v13310_v56 }
 0x6ce   :  { %11097 = vmatprep.subr.bf16.mxu1 %v13877_v22  ;;  %v13402_v46 = vpack.c.bf16 %v5634_v41, %v5627_v19  ;;  %v5655_v29 = vand.u32 4294901760, %v5654_v49  ;;  %v13446_v19 = vpack.c.bf16 %v13336_v14, %v13331_v50  ;;  %v13450_v41 = vpack.c.bf16 %v13358_v27, %v13353_v21 }
 0x6cf   :  { %v5641_v8 = vand.u32 4294901760, %v5640_v39  ;;  %v5648_v43 = vand.u32 4294901760, %v5647_v47  ;;  %v13454_v39 = vpack.c.bf16 %v13375_v45, %v13370_v32  ;;  %v13458_v47 = vpack.c.bf16 %v13396_v16, %v13391_v51 }
 0x6d0   :  { %v13430_v36 = vpack.c.bf16 %v5662_v11, %v5655_v29 }
 0x6d1   :  { %11099 = vmatpush3.bf16.msra.mxu1 %v13184_v20  ;;  %v13422_v34 = vpack.c.bf16 %v5648_v43, %v5641_v8  ;;  %v13462_v8 = vpack.c.bf16 %v13418_v63, %v13413_v42  ;;  %v7771_v43 = vld [vmem:[%s13807_s5] ss:$0 sm:$0xff] }
 0x6d2   :  { %11100 = vmatprep.subr.bf16.mxu1 %v13877_v22 }
 0x6d5   :  { %11102 = vmatpush3.bf16.msra.mxu1 %v13206_v17 }
 0x6d6   :  { %11103 = vmatprep.subr.bf16.mxu1 %v13877_v22 }
 0x6d9   :  { %11105 = vmatpush3.bf16.msra.mxu1 %v13228_v13 }
 0x6da   :  { %11106 = vmatprep.subr.bf16.mxu1 %v13877_v22 }
 0x6dd   :  { %11108 = vmatpush3.bf16.msra.mxu1 %v13250_v31 }
 0x6de   :  { %11109 = vmatprep.subr.bf16.mxu1 %v13877_v22 }
 0x6e1   :  { %11111 = vmatpush3.bf16.msra.mxu1 %v13278_v24 }
 0x6e2   :  { %11112 = vmatprep.subr.bf16.mxu1 %v13877_v22 }
 0x797   :  { %v9724_v49 = vpop.f32.mrb[10].mxu1 }
 0x798   :  { %v13467_v0 = vadd.f32 %v9724_v49, %v7771_v43  ;;  %v5387_v29 = vpop.f32.mrb[11].mxu1 }
 0x799   :  { %v13469_v11 = vadd.f32 %v7771_v43, %v5387_v29 }
 0x79a   :  { %13923 = vst [vmem:[#allocation10_spill] sm:$0xff] %v13467_v0  ;;  %v5433_v33 = vmul.f32 %v13467_v0, %v13467_v0 }
 0x79b   :  { %13924 = vst [vmem:[#allocation9_spill] sm:$0xff] %v13469_v11  ;;  %v5432_v58 = vmul.f32 %v13469_v11, %v13469_v11  ;;  %v9727_v37 = vpop.f32.mrb[12].mxu1  ;;  %v5423_v40 = vadd.f32 %v13467_v0, %v13469_v11 }
 0x79c   :  { %v5397_v60 = vpop.f32.mrb[13].mxu1  ;;  %v13477_v3 = vadd.f32 %v9727_v37, %v7771_v43 }
 0x79d   :  { %v13479_v15 = vadd.f32 %v7771_v43, %v5397_v60  ;;  %v5436_v49 = vadd.f32 %v5433_v33, %v5432_v58 }
 0x79e   :  { %v5435_v44 = vmul.f32 %v13477_v3, %v13477_v3 }
 0x79f   :  { %13925 = vst [vmem:[#allocation11_spill] sm:$0xff] %v13479_v15  ;;  %v5424_v53 = vadd.f32 %v5423_v40, %v13479_v15  ;;  %v5434_v29 = vmul.f32 %v13479_v15, %v13479_v15 }
 0x7a1   :  { %v5425_v26 = vadd.f32 %v5424_v53, %v13477_v3  ;;  %v5437_v61 = vadd.f32 %v5436_v49, %v5434_v29 }
 0x7a3   :  { %v5426_v2 = vrot.slane %v5425_v26, 4  ;;  %v5438_v10 = vadd.f32 %v5437_v61, %v5435_v44 }
 0x7a5   :  { %v5427_v54 = vadd.f32 %v5426_v2, %v5425_v26  ;;  %v5439_v59 = vrot.slane %v5438_v10, 4 }
 0x7a7   :  { %v5428_v37 = vrot.slane %v5427_v54, 2  ;;  %v5440_v35 = vadd.f32 %v5439_v59, %v5438_v10 }
 0x7a9   :  { %v5429_v60 = vadd.f32 %v5428_v37, %v5427_v54  ;;  %v5441_v43 = vrot.slane %v5440_v35, 2 }
 0x7ab   :  { %v5430_v58 = vrot.slane %v5429_v60, 1  ;;  %v5442_v33 = vadd.f32 %v5441_v43, %v5440_v35 }
 0x7ad   :  { %v5431_v40 = vadd.f32 %v5430_v58, %v5429_v60  ;;  %v5443_v0 = vrot.slane %v5442_v33, 1 }
 0x7af   :  { %v5444_v11 = vadd.f32 %v5443_v0, %v5442_v33  ;;  %v13487_v15 = vand.u32 4294901760, %v5431_v40 }
 0x7b1   :  { %v13489_v12 = vand.u32 4294901760, %v5444_v11  ;;  %v13492_v53 = vsub.f32 %v5431_v40, %v13487_v15 }
 0x7b3   :  { %v5544_v61 = vand.u32 4294901760, %v13492_v53  ;;  %v13496_v2 = vsub.f32 %v5444_v11, %v13489_v12 }
 0x7b5   :  { %v5545_v59 = vsub.f32 %v13492_v53, %v5544_v61  ;;  %v6186_v35 = vand.u32 4294901760, %v13496_v2 }
 0x7b7   :  { %v5546_v54 = vand.u32 4294901760, %v5545_v59  ;;  %v6187_v10 = vsub.f32 %v13496_v2, %v6186_v35  ;;  %v7706_v59 = vld [vmem:[%s13808_s11] ss:$0 sm:$0xff] }
 0x7b9   :  { %9761 = vmatmul.mubr.f32.vlgmr.msra.gmra.mrb[18].mxu0 %v5546_v54  ;;  %v6188_v26 = vand.u32 4294901760, %v6187_v10 }
 0x7ba   :  { %10970 = vmatpush3.bf16.msra.mxu0 %v13302_v4  ;;  %9795 = vmatprep.mubr.msk.f32.mxu0 %vm11382_vm1, %v12898_v25 }
 0x7bb   :  { %9971 = vmatmul.mubr.f32.vlgmr.msra.gmra.mrb[14].mxu1 %v6188_v26  ;;  %10971 = vmatprep.subr.bf16.mxu0 %v13877_v22  ;;  %v13944_v26 = vld [vmem:[#allocation10_spill] sm:$0xff] }
 0x7bc   :  { %11114 = vmatpush3.bf16.msra.mxu1 %v13302_v4  ;;  %10005 = vmatprep.mubr.msk.f32.mxu1 %vm11382_vm1, %v12898_v25  ;;  %v13926_v4 = vand.u32 4294901760, %v13252_v23  ;;  %v13930_v23 = vand.u32 4294901760, %v13310_v56  ;;  %v13934_v56 = vand.u32 4294901760, %v13353_v21  ;;  %v13938_v21 = vand.u32 4294901760, %v13391_v51 }
 0x7bd   :  { %11115 = vmatprep.subr.bf16.mxu1 %v13877_v22 }
 0x7be   :  { %10973 = vmatpush3.bf16.msra.mxu0 %v13338_v52 }
 0x7bf   :  { %10974 = vmatprep.subr.bf16.mxu0 %v13877_v22 }
 0x7c0   :  { %11117 = vmatpush3.bf16.msra.mxu1 %v13338_v52  ;;  %v13927_v52 = vand.u32 4294901760, %v13254_v48  ;;  %v13931_v48 = vand.u32 4294901760, %v13315_v1  ;;  %v13935_v1 = vand.u32 4294901760, %v13358_v27  ;;  %v13939_v27 = vand.u32 4294901760, %v13396_v16 }
 0x7c1   :  { %11118 = vmatprep.subr.bf16.mxu1 %v13877_v22 }
 0x7c2   :  { %10976 = vmatpush3.bf16.msra.mxu0 %v13342_v55  ;;  %v11041_v44 = vpack.c.bf16 %v13927_v52, %v13926_v4  ;;  %v13945_v52 = vld [vmem:[#allocation11_spill] sm:$0xff] }
 0x7c3   :  { %10977 = vmatprep.subr.bf16.mxu0 %v13877_v22 }
 0x7c4   :  { %11120 = vmatpush3.bf16.msra.mxu1 %v13342_v55  ;;  %v13928_v55 = vand.u32 4294901760, %v13289_v9  ;;  %v11047_v9 = vpack.c.bf16 %v13931_v48, %v13930_v23  ;;  %v13947_v48 = vld [vmem:[#allocation6_spill] sm:$0xff] }
 0x7c5   :  { %11121 = vmatprep.subr.bf16.mxu1 %v13877_v22 }
 0x7c6   :  { %10979 = vmatpush3.bf16.msra.mxu0 %v13362_v28 }
 0x7c7   :  { %10980 = vmatprep.subr.bf16.mxu0 %v13877_v22 }
 0x7c8   :  { %11123 = vmatpush3.bf16.msra.mxu1 %v13362_v28  ;;  %v13929_v28 = vand.u32 4294901760, %v13294_v6  ;;  %v13932_v6 = vand.u32 4294901760, %v13331_v50  ;;  %v13936_v50 = vand.u32 4294901760, %v13370_v32  ;;  %v13940_v32 = vand.u32 4294901760, %v13413_v42 }
 0x7c9   :  { %11124 = vmatprep.subr.bf16.mxu1 %v13877_v22 }
 0x7ca   :  { %10982 = vmatpush3.bf16.msra.mxu0 %v13398_v18 }
 0x7cb   :  { %10983 = vmatprep.subr.bf16.mxu0 %v13877_v22 }
 0x7cc   :  { %11126 = vmatpush3.bf16.msra.mxu1 %v13398_v18  ;;  %v11044_v18 = vpack.c.bf16 %v13929_v28, %v13928_v55 }
 0x7cd   :  { %11127 = vmatprep.subr.bf16.mxu1 %v13877_v22 }
 0x7ce   :  { %10985 = vmatpush3.bf16.msra.mxu0 %v13402_v46 }
 0x7cf   :  { %10986 = vmatprep.subr.bf16.mxu0 %v13877_v22 }
 0x7d0   :  { %11129 = vmatpush3.bf16.msra.mxu1 %v13402_v46  ;;  %v13933_v46 = vand.u32 4294901760, %v13336_v14  ;;  %v13937_v14 = vand.u32 4294901760, %v13375_v45  ;;  %v13941_v45 = vand.u32 4294901760, %v13418_v63 }
 0x7d1   :  { %11130 = vmatprep.subr.bf16.mxu1 %v13877_v22 }
 0x7d2   :  { %10988 = vmatpush3.bf16.msra.mxu0 %v13422_v34 }
 0x7d3   :  { %10989 = vmatprep.subr.bf16.mxu0 %v13877_v22 }
 0x7d4   :  { %11132 = vmatpush3.bf16.msra.mxu1 %v13422_v34  ;;  %v11050_v34 = vpack.c.bf16 %v13933_v46, %v13932_v6  ;;  %v13948_v6 = vld [vmem:[#allocation7_spill] sm:$0xff] }
 0x7d5   :  { %11133 = vmatprep.subr.bf16.mxu1 %v13877_v22  ;;  %v2432_v46 = vmul.f32 %v7706_v59, %v13948_v6 }
 0x7d6   :  { %10991 = vmatpush3.bf16.msra.mxu0 %v13430_v36 }
 0x7d7   :  { %10992 = vmatprep.subr.bf16.mxu0 %v13877_v22 }
 0x7d8   :  { %11135 = vmatpush3.bf16.msra.mxu1 %v13430_v36  ;;  %v11053_v36 = vpack.c.bf16 %v13935_v1, %v13934_v56  ;;  %v7772_v1 = vld [vmem:[%s13809_s9] ss:$0 sm:$0xff] }
 0x7d9   :  { %9796 = vmatmul.mubr.f32.vlgmr.msra.gmra.mrb[18].mxu0 %v13487_v15  ;;  %11136 = vmatprep.subr.bf16.mxu1 %v13877_v22 }
 0x7da   :  { %10994 = vmatpush3.bf16.msra.mxu0 %v13434_v38  ;;  %9830 = vmatprep.mubr.msk.f32.mxu0 %vm11382_vm1, %v12898_v25 }
 0x7db   :  { %10006 = vmatmul.mubr.f32.vlgmr.msra.gmra.mrb[14].mxu1 %v13489_v12  ;;  %10995 = vmatprep.subr.bf16.mxu0 %v13877_v22 }
 0x7dc   :  { %11138 = vmatpush3.bf16.msra.mxu1 %v13434_v38  ;;  %10040 = vmatprep.mubr.msk.f32.mxu1 %vm11382_vm1, %v12898_v25  ;;  %v13581_v25 = vld [vmem:[#allocation3] sm:$0xff]  ;;  %v11056_v38 = vpack.c.bf16 %v13937_v14, %v13936_v50 }
 0x7dd   :  { %11139 = vmatprep.subr.bf16.mxu1 %v13877_v22 }
 0x7de   :  { %10997 = vmatpush3.bf16.msra.mxu0 %v13438_v5 }
 0x7df   :  { %10998 = vmatprep.subr.bf16.mxu0 %v13877_v22 }
 0x7e0   :  { %11141 = vmatpush3.bf16.msra.mxu1 %v13438_v5  ;;  %v11059_v5 = vpack.c.bf16 %v13939_v27, %v13938_v21  ;;  %v7773_v21 = vld [vmem:[%s13811_s10] ss:$0 sm:$0xff] }
 0x7e1   :  { %11142 = vmatprep.subr.bf16.mxu1 %v13877_v22 }
 0x7e2   :  { %11000 = vmatpush3.bf16.msra.mxu0 %v13442_v62 }
 0x7e3   :  { %11001 = vmatprep.subr.bf16.mxu0 %v13877_v22 }
 0x7e4   :  { %11144 = vmatpush3.bf16.msra.mxu1 %v13442_v62  ;;  %v11062_v62 = vpack.c.bf16 %v13941_v45, %v13940_v32 }
 0x7e5   :  { %11145 = vmatprep.subr.bf16.mxu1 %v13877_v22 }
 0x7e6   :  { %11003 = vmatpush3.bf16.msra.mxu0 %v13446_v19 }
 0x7e7   :  { %11004 = vmatprep.subr.bf16.mxu0 %v13877_v22 }
 0x7e8   :  { %11147 = vmatpush3.bf16.msra.mxu1 %v13446_v19 }
 0x7e9   :  { %11148 = vmatprep.subr.bf16.mxu1 %v13877_v22 }
 0x7ea   :  { %11006 = vmatpush3.bf16.msra.mxu0 %v13450_v41 }
 0x7eb   :  { %11007 = vmatprep.subr.bf16.mxu0 %v13877_v22 }
 0x7ec   :  { %11150 = vmatpush3.bf16.msra.mxu1 %v13450_v41 }
 0x7ed   :  { %11151 = vmatprep.subr.bf16.mxu1 %v13877_v22 }
 0x7ee   :  { %11009 = vmatpush3.bf16.msra.mxu0 %v13454_v39 }
 0x7ef   :  { %11010 = vmatprep.subr.bf16.mxu0 %v13877_v22 }
 0x7f0   :  { %11153 = vmatpush3.bf16.msra.mxu1 %v13454_v39 }
 0x7f1   :  { %11154 = vmatprep.subr.bf16.mxu1 %v13877_v22 }
 0x7f2   :  { %11012 = vmatpush3.bf16.msra.mxu0 %v13458_v47 }
 0x7f3   :  { %11013 = vmatprep.subr.bf16.mxu0 %v13877_v22 }
 0x7f4   :  { %11156 = vmatpush3.bf16.msra.mxu1 %v13458_v47 }
 0x7f5   :  { %11157 = vmatprep.subr.bf16.mxu1 %v13877_v22 }
 0x7f6   :  { %11015 = vmatpush3.bf16.msra.mxu0 %v13462_v8 }
 0x7f7   :  { %11016 = vmatprep.subr.bf16.mxu0 %v13877_v22 }
 0x7f8   :  { %11159 = vmatpush3.bf16.msra.mxu1 %v13462_v8 }
 0x7f9   :  { %9831 = vmatmul.mubr.f32.vlgmr.msra.gmra.mrb[18].mxu0 %v13492_v53  ;;  %11160 = vmatprep.subr.bf16.mxu1 %v13877_v22 }
 0x7fa   :  { %11018 = vmatpush3.bf16.msra.mxu0 %v13118_v57  ;;  %9865 = vmatprep.mubr.msk.f32.mxu0 %vm11382_vm1, %v13581_v25 }
 0x7fb   :  { %10041 = vmatmul.mubr.f32.vlgmr.msra.gmra.mrb[14].mxu1 %v13496_v2  ;;  %11019 = vmatprep.subr.bf16.mxu0 %v13877_v22 }
 0x7fc   :  { %11162 = vmatpush3.bf16.msra.mxu1 %v13118_v57  ;;  %10075 = vmatprep.mubr.msk.f32.mxu1 %vm11382_vm1, %v13581_v25 }
 0x7fd   :  { %11163 = vmatprep.subr.bf16.mxu1 %v13877_v22 }
 0x7fe   :  { %11021 = vmatpush3.bf16.msra.mxu0 %v13140_v30 }
 0x7ff   :  { %11022 = vmatprep.subr.bf16.mxu0 %v13877_v22 }
 0x800   :  { %11165 = vmatpush3.bf16.msra.mxu1 %v13140_v30 }
 0x801   :  { %11166 = vmatprep.subr.bf16.mxu1 %v13877_v22 }
 0x802   :  { %11024 = vmatpush3.bf16.msra.mxu0 %v13162_v7 }
 0x803   :  { %11025 = vmatprep.subr.bf16.mxu0 %v13877_v22 }
 0x804   :  { %11168 = vmatpush3.bf16.msra.mxu1 %v13162_v7 }
 0x805   :  { %11169 = vmatprep.subr.bf16.mxu1 %v13877_v22 }
 0x806   :  { %11027 = vmatpush3.bf16.msra.mxu0 %v13184_v20 }
 0x807   :  { %11028 = vmatprep.subr.bf16.mxu0 %v13877_v22 }
 0x808   :  { %11171 = vmatpush3.bf16.msra.mxu1 %v13184_v20 }
 0x809   :  { %11172 = vmatprep.subr.bf16.mxu1 %v13877_v22 }
 0x80a   :  { %11030 = vmatpush3.bf16.msra.mxu0 %v13206_v17 }
 0x80b   :  { %11031 = vmatprep.subr.bf16.mxu0 %v13877_v22 }
 0x80c   :  { %11174 = vmatpush3.bf16.msra.mxu1 %v13206_v17 }
 0x80d   :  { %11175 = vmatprep.subr.bf16.mxu1 %v13877_v22 }
 0x80e   :  { %11033 = vmatpush3.bf16.msra.mxu0 %v13228_v13 }
 0x80f   :  { %11034 = vmatprep.subr.bf16.mxu0 %v13877_v22 }
 0x810   :  { %11177 = vmatpush3.bf16.msra.mxu1 %v13228_v13 }
 0x811   :  { %11178 = vmatprep.subr.bf16.mxu1 %v13877_v22 }
 0x812   :  { %11036 = vmatpush3.bf16.msra.mxu0 %v13250_v31 }
 0x813   :  { %11037 = vmatprep.subr.bf16.mxu0 %v13877_v22 }
 0x814   :  { %11180 = vmatpush3.bf16.msra.mxu1 %v13250_v31 }
 0x815   :  { %11181 = vmatprep.subr.bf16.mxu1 %v13877_v22 }
 0x816   :  { %11039 = vmatpush3.bf16.msra.mxu0 %v13278_v24 }
 0x817   :  { %11040 = vmatprep.subr.bf16.mxu0 %v13877_v22 }
 0x818   :  { %11183 = vmatpush3.bf16.msra.mxu1 %v13278_v24 }
 0x819   :  { %9866 = vmatmul.mubr.f32.vlgmr.msra.gmra.mrb[18].mxu0 %v5544_v61  ;;  %11184 = vmatprep.subr.bf16.mxu1 %v13877_v22  ;;  %v13942_v61 = vld [vmem:[#allocation5_spill] sm:$0xff] }
 0x81a   :  { %11042 = vmatpush3.bf16.msra.mxu0 %v11041_v44  ;;  %9900 = vmatprep.mubr.msk.f32.mxu0 %vm11382_vm1, %v13581_v25 }
 0x81b   :  { %10076 = vmatmul.mubr.f32.vlgmr.msra.gmra.mrb[14].mxu1 %v6186_v35  ;;  %11043 = vmatprep.subr.bf16.mxu0 %v13877_v22  ;;  %v13943_v35 = vld [vmem:[#allocation9_spill] sm:$0xff] }
 0x81c   :  { %11186 = vmatpush3.bf16.msra.mxu1 %v11041_v44  ;;  %10110 = vmatprep.mubr.msk.f32.mxu1 %vm11382_vm1, %v13581_v25 }
 0x81d   :  { %11187 = vmatprep.subr.bf16.mxu1 %v13877_v22 }
 0x81e   :  { %11045 = vmatpush3.bf16.msra.mxu0 %v11044_v18 }
 0x81f   :  { %11046 = vmatprep.subr.bf16.mxu0 %v13877_v22 }
 0x820   :  { %11189 = vmatpush3.bf16.msra.mxu1 %v11044_v18  ;;  %v13946_v18 = vld [vmem:[#allocation4_spill] sm:$0xff] }
 0x821   :  { %11190 = vmatprep.subr.bf16.mxu1 %v13877_v22  ;;  %v2430_v23 = vmul.f32 %v7706_v59, %v13946_v18 }
 0x822   :  { %11048 = vmatpush3.bf16.msra.mxu0 %v11047_v9 }
 0x823   :  { %11049 = vmatprep.subr.bf16.mxu0 %v13877_v22 }
 0x824   :  { %11192 = vmatpush3.bf16.msra.mxu1 %v11047_v9  ;;  %v2431_v9 = vmul.f32 %v7706_v59, %v13947_v48 }
 0x825   :  { %11193 = vmatprep.subr.bf16.mxu1 %v13877_v22 }
 0x826   :  { %11051 = vmatpush3.bf16.msra.mxu0 %v11050_v34 }
 0x827   :  { %11052 = vmatprep.subr.bf16.mxu0 %v13877_v22 }
 0x828   :  { %11195 = vmatpush3.bf16.msra.mxu1 %v11050_v34  ;;  %v13949_v34 = vld [vmem:[#allocation8_spill] sm:$0xff] }
 0x829   :  { %11196 = vmatprep.subr.bf16.mxu1 %v13877_v22  ;;  %v2433_v56 = vmul.f32 %v7706_v59, %v13949_v34 }
 0x82a   :  { %11054 = vmatpush3.bf16.msra.mxu0 %v11053_v36 }
 0x82b   :  { %11055 = vmatprep.subr.bf16.mxu0 %v13877_v22 }
 0x82c   :  { %11198 = vmatpush3.bf16.msra.mxu1 %v11053_v36  ;;  %v7707_v36 = vld [vmem:[%s13810_s12] ss:$0 sm:$0xff] }
 0x82d   :  { %11199 = vmatprep.subr.bf16.mxu1 %v13877_v22 }
 0x82e   :  { %11057 = vmatpush3.bf16.msra.mxu0 %v11056_v38 }
 0x82f   :  { %11058 = vmatprep.subr.bf16.mxu0 %v13877_v22 }
 0x830   :  { %11201 = vmatpush3.bf16.msra.mxu1 %v11056_v38 }
 0x831   :  { %11202 = vmatprep.subr.bf16.mxu1 %v13877_v22 }
 0x832   :  { %11060 = vmatpush3.bf16.msra.mxu0 %v11059_v5 }
 0x833   :  { %11061 = vmatprep.subr.bf16.mxu0 %v13877_v22 }
 0x834   :  { %11204 = vmatpush3.bf16.msra.mxu1 %v11059_v5 }
 0x835   :  { %11205 = vmatprep.subr.bf16.mxu1 %v13877_v22 }
 0x836   :  { %11063 = vmatpush3.bf16.msra.mxu0 %v11062_v62 }
 0x837   :  { %11064 = vmatprep.subr.bf16.mxu0 %v13877_v22 }
 0x838   :  { %11207 = vmatpush3.bf16.msra.mxu1 %v11062_v62  ;;  %v2440_v62 = vadd.f32 %v7707_v36, %v2430_v23 }
 0x839   :  { %9901 = vmatmul.mubr.f32.vlgmr.msra.gmra.mrb[18].mxu0 %v13487_v15  ;;  %11208 = vmatprep.subr.bf16.mxu1 %v13877_v22 }
 0x83a   :  { %11066 = vmatpush3.bf16.msra.mxu0 %v13118_v57  ;;  %9935 = vmatprep.mubr.msk.f32.mxu0 %vm11382_vm1, %v13581_v25 }
 0x83b   :  { %10111 = vmatmul.mubr.f32.vlgmr.msra.gmra.mrb[14].mxu1 %v13489_v12  ;;  %11067 = vmatprep.subr.bf16.mxu0 %v13877_v22 }
 0x83c   :  { %11210 = vmatpush3.bf16.msra.mxu1 %v13118_v57  ;;  %10145 = vmatprep.mubr.msk.f32.mxu1 %vm11382_vm1, %v13581_v25  ;;  %v6750_v57 = vld [vmem:[%s13801_s14] sm:$0xff] }
 0x83d   :  { %11211 = vmatprep.subr.bf16.mxu1 %v13877_v22 }
 0x83e   :  { %11069 = vmatpush3.bf16.msra.mxu0 %v13140_v30 }
 0x83f   :  { %11070 = vmatprep.subr.bf16.mxu0 %v13877_v22 }
 0x840   :  { %11213 = vmatpush3.bf16.msra.mxu1 %v13140_v30  ;;  %v13719_v30 = vand.u32 4294901760, %v6750_v57 }
 0x841   :  { %11214 = vmatprep.subr.bf16.mxu1 %v13877_v22 }
 0x842   :  { %11072 = vmatpush3.bf16.msra.mxu0 %v13162_v7 }
 0x843   :  { %11073 = vmatprep.subr.bf16.mxu0 %v13877_v22 }
 0x844   :  { %11216 = vmatpush3.bf16.msra.mxu1 %v13162_v7 }
 0x845   :  { %11217 = vmatprep.subr.bf16.mxu1 %v13877_v22 }
 0x846   :  { %11075 = vmatpush3.bf16.msra.mxu0 %v13184_v20 }
 0x847   :  { %11076 = vmatprep.subr.bf16.mxu0 %v13877_v22 }
 0x848   :  { %11219 = vmatpush3.bf16.msra.mxu1 %v13184_v20 }
 0x849   :  { %11220 = vmatprep.subr.bf16.mxu1 %v13877_v22 }
 0x84a   :  { %11078 = vmatpush3.bf16.msra.mxu0 %v13206_v17 }
 0x84b   :  { %11079 = vmatprep.subr.bf16.mxu0 %v13877_v22 }
 0x84c   :  { %11222 = vmatpush3.bf16.msra.mxu1 %v13206_v17 }
 0x84d   :  { %11223 = vmatprep.subr.bf16.mxu1 %v13877_v22 }
 0x84e   :  { %11081 = vmatpush3.bf16.msra.mxu0 %v13228_v13 }
 0x84f   :  { %11082 = vmatprep.subr.bf16.mxu0 %v13877_v22 }
 0x850   :  { %11225 = vmatpush3.bf16.msra.mxu1 %v13228_v13 }
 0x851   :  { %11226 = vmatprep.subr.bf16.mxu1 %v13877_v22 }
 0x852   :  { %11084 = vmatpush3.bf16.msra.mxu0 %v13250_v31 }
 0x853   :  { %11085 = vmatprep.subr.bf16.mxu0 %v13877_v22 }
 0x854   :  { %11228 = vmatpush3.bf16.msra.mxu1 %v13250_v31 }
 0x855   :  { %11229 = vmatprep.subr.bf16.mxu1 %v13877_v22  ;;  %v6832_v22 = vsub.f32 %v6750_v57, %v13719_v30  ;;  %v2441_v57 = vadd.f32 %v7707_v36, %v2431_v9 }
 0x856   :  { %11087 = vmatpush3.bf16.msra.mxu0 %v13278_v24 }
 0x857   :  { %10148 = vmatprep.subr.mxu0 %v13581_v25  ;;  %v6833_v51 = vand.u32 4294901760, %v6832_v22 }
 0x858   :  { %11231 = vmatpush3.bf16.msra.mxu1 %v13278_v24 }
 0x859   :  { %9936 = vmatmul.mubr.f32.vlgmr.msra.gmra.mrb[18].mxu0 %v13487_v15  ;;  %v6834_v19 = vsub.f32 %v6832_v22, %v6833_v51 }
 0x85a   :  { %10150 = vmatprep.mubr.msk.f32.mxu0 %vm11382_vm1, %v13581_v25  ;;  %10149 = vmatpush3.msra.mxu0 %v13719_v30 }
 0x85b   :  { %10146 = vmatmul.mubr.f32.vlgmr.msra.gmra.mrb[14].mxu1 %v13489_v12  ;;  %10153 = vmatprep.subr.mxu0 %v13581_v25  ;;  %v6835_v47 = vand.u32 4294901760, %v6834_v19 }
 0x92c   :  { %v6098_v7 = vpop.f32.mrb[18].mxu0 }
 0x92d   :  { %v6102_v20 = vmul.f32 0.001953125, %v6098_v7  ;;  %v9937_v17 = vpop.f32.mrb[19].mxu0 }
 0x92e   :  { %v6740_v13 = vpop.f32.mrb[14].mxu1 }
 0x92f   :  { %v6745_v31 = vmul.f32 %v6102_v20, %v6102_v20  ;;  %v6752_v24 = vsel %vm1509_vm7, %v6102_v20, 0  ;;  %v6744_v12 = vmul.f32 0.001953125, %v6740_v13  ;;  %v10147_v15 = vpop.f32.mrb[15].mxu1 }
 0x930   :  { %v6820_v16 = vand.u32 4294901760, %v6752_v24 }
 0x931   :  { %v6746_v42 = vsub.f32 %v6744_v12, %v6745_v31 }
 0x932   :  { %v6821_v63 = vsub.f32 %v6752_v24, %v6820_v16 }
 0x933   :  { %v6747_v0 = vmax.f32 %v6746_v42, 0.0 }
 0x934   :  { %v6822_v41 = vand.u32 4294901760, %v6821_v63 }
 0x935   :  { %v6748_v11 = vadd.f32 1e-05, %v6747_v0 }
 0x936   :  { %v6823_v39 = vsub.f32 %v6821_v63, %v6822_v41 }
 0x937   :  { %11375 = vrsqrt.f32 %v6748_v11 }
 0x938   :  { %v6824_v8 = vand.u32 4294901760, %v6823_v39 }
 0x93a   :  { %10151 = vmatmul.mubr.f32.vlgmr.msra.gmra.mrb[20].mxu0 %v6824_v8 }
 0x93b   :  { %10154 = vmatpush3.msra.mxu0 %v6835_v47  ;;  %10155 = vmatprep.mubr.msk.f32.mxu0 %vm11382_vm1, %v13581_v25 }
 0x93c   :  { %10158 = vmatprep.subr.mxu0 %v13581_v25 }
 0x941   :  { %v11376_v49 = vpop.eup %11375 }
 0x942   :  { %10156 = vmatmul.mubr.f32.vlgmr.msra.gmra.mrb[20].mxu0 %v6820_v16  ;;  %v7201_v29 = vsel %vm1509_vm7, %v11376_v49, 0 }
 0x943   :  { %10159 = vmatpush3.msra.mxu0 %v6832_v22  ;;  %10160 = vmatprep.mubr.msk.f32.mxu0 %vm11382_vm1, %v13581_v25  ;;  %v7269_v37 = vand.u32 4294901760, %v7201_v29 }
 0x944   :  { %10163 = vmatprep.subr.mxu0 %v13581_v25 }
 0x945   :  { %v7270_v60 = vsub.f32 %v7201_v29, %v7269_v37 }
 0x947   :  { %v7271_v43 = vand.u32 4294901760, %v7270_v60 }
 0x949   :  { %v7272_v58 = vsub.f32 %v7270_v60, %v7271_v43 }
 0x94a   :  { %10161 = vmatmul.mubr.f32.vlgmr.msra.gmra.mrb[20].mxu0 %v6821_v63 }
 0x94b   :  { %10164 = vmatpush3.msra.mxu0 %v13719_v30  ;;  %10165 = vmatprep.mubr.msk.f32.mxu0 %vm11382_vm1, %v13581_v25  ;;  %v7273_v33 = vand.u32 4294901760, %v7272_v58 }
 0x94c   :  { %10168 = vmatprep.subr.mxu0 %v13581_v25 }
 0x952   :  { %10166 = vmatmul.mubr.f32.vlgmr.msra.gmra.mrb[20].mxu0 %v6822_v41 }
 0x953   :  { %10169 = vmatpush3.msra.mxu0 %v6833_v51  ;;  %10170 = vmatprep.mubr.msk.f32.mxu0 %vm11382_vm1, %v13581_v25 }
 0x954   :  { %10173 = vmatprep.subr.mxu0 %v13581_v25 }
 0x95a   :  { %10171 = vmatmul.mubr.f32.vlgmr.msra.gmra.mrb[20].mxu0 %v6820_v16 }
 0x95b   :  { %10174 = vmatpush3.msra.mxu0 %v13719_v30  ;;  %10175 = vmatprep.mubr.msk.f32.mxu0 %vm11382_vm1, %v13581_v25 }
 0x95c   :  { %10178 = vmatprep.subr.mxu0 %v13581_v25 }
 0x962   :  { %10176 = vmatmul.mubr.f32.vlgmr.msra.gmra.mrb[20].mxu0 %v6820_v16 }
 0x963   :  { %10179 = vmatpush3.msra.mxu0 %v13719_v30  ;;  %10180 = vmatprep.mubr.msk.f32.mxu0 %vm11382_vm1, %v13581_v25 }
 0x964   :  { %10183 = vmatprep.subr.mxu0 %v13581_v25 }
 0x966   :  { %10181 = vmatmul.mubr.f32.vlgmr.msra.gmra.mrb[22].mxu0 %v7273_v33 }
 0x967   :  { %10184 = vmatpush3.msra.mxu0 %v6835_v47  ;;  %10185 = vmatprep.mubr.msk.f32.mxu0 %vm11382_vm1, %v13581_v25 }
 0x968   :  { %10188 = vmatprep.subr.mxu0 %v13581_v25 }
 0x96e   :  { %10186 = vmatmul.mubr.f32.vlgmr.msra.gmra.mrb[22].mxu0 %v7269_v37 }
 0x96f   :  { %10189 = vmatpush3.msra.mxu0 %v6832_v22  ;;  %10190 = vmatprep.mubr.msk.f32.mxu0 %vm11382_vm1, %v13581_v25  ;;  %v2443_v22 = vadd.f32 %v7707_v36, %v2433_v56 }
 0x970   :  { %10193 = vmatprep.subr.mxu0 %v13581_v25 }
 0x976   :  { %10191 = vmatmul.mubr.f32.vlgmr.msra.gmra.mrb[22].mxu0 %v7270_v60 }
 0x977   :  { %10194 = vmatpush3.msra.mxu0 %v13719_v30  ;;  %10195 = vmatprep.mubr.msk.f32.mxu0 %vm11382_vm1, %v13581_v25 }
 0x978   :  { %10198 = vmatprep.subr.mxu0 %v13581_v25 }
 0x97e   :  { %10196 = vmatmul.mubr.f32.vlgmr.msra.gmra.mrb[22].mxu0 %v7271_v43 }
 0x97f   :  { %10199 = vmatpush3.msra.mxu0 %v6833_v51  ;;  %10200 = vmatprep.mubr.msk.f32.mxu0 %vm11382_vm1, %v13581_v25 }
 0x980   :  { %10203 = vmatprep.subr.mxu0 %v13581_v25 }
 0x986   :  { %10201 = vmatmul.mubr.f32.vlgmr.msra.gmra.mrb[22].mxu0 %v7269_v37 }
 0x987   :  { %10204 = vmatpush3.msra.mxu0 %v13719_v30  ;;  %10205 = vmatprep.mubr.msk.f32.mxu0 %vm11382_vm1, %v13581_v25  ;;  %v2442_v30 = vadd.f32 %v7707_v36, %v2432_v46 }
 0x98e   :  { %10206 = vmatmul.mubr.f32.vlgmr.msra.gmra.mrb[22].mxu0 %v7269_v37 }
 0xa35   :  { %v7196_v40 = vpop.f32.mrb[20].mxu0 }
 0xa36   :  { %v10177_v53 = vpop.f32.mrb[21].mxu0  ;;  %v7652_v2 = vrot.slane %v7196_v40, %v13942_v61 }
 0xa38   :  { %v7653_v54 = vsub.f32 %v13943_v35, %v7652_v2  ;;  %v7654_v4 = vsub.f32 %v13944_v26, %v7652_v2  ;;  %v7655_v44 = vsub.f32 %v13945_v52, %v7652_v2  ;;  %v7656_v55 = vsub.f32 %v13477_v3, %v7652_v2 }
 0xa61   :  { %v7645_v10 = vpop.f32.mrb[22].mxu0 }
 0xa62   :  { %v7660_v25 = vrot.slane %v7645_v10, %v13942_v61  ;;  %v10207_v28 = vpop.f32.mrb[23].mxu0 }
 0xa64   :  { %v7661_v3 = vmul.f32 %v7660_v25, %v7653_v54  ;;  %v7662_v50 = vmul.f32 %v7660_v25, %v7654_v4  ;;  %v7663_v14 = vmul.f32 %v7660_v25, %v7655_v44  ;;  %v7664_v38 = vmul.f32 %v7660_v25, %v7656_v55 }
 0xa66   :  { %v7671_v27 = vmul.f32 %v7772_v1, %v7661_v3  ;;  %v7672_v5 = vmul.f32 %v7772_v1, %v7662_v50  ;;  %v7673_v32 = vmul.f32 %v7772_v1, %v7663_v14  ;;  %v7674_v45 = vmul.f32 %v7772_v1, %v7664_v38 }
 0xa68   :  { %v7681_v7 = vadd.f32 %v7773_v21, %v7671_v27  ;;  %v7682_v20 = vadd.f32 %v7773_v21, %v7672_v5  ;;  %v7683_v17 = vadd.f32 %v7773_v21, %v7673_v32  ;;  %v7684_v13 = vadd.f32 %v7773_v21, %v7674_v45 }
 0xa6a   :  { %v7685_v31 = vadd.f32 %v7681_v7, %v2440_v62  ;;  %v7686_v24 = vadd.f32 %v7682_v20, %v2441_v57  ;;  %v7687_v12 = vadd.f32 %v7683_v17, %v2442_v30  ;;  %v7688_v15 = vadd.f32 %v7684_v13, %v2443_v22 }
 0xa6c   :  { %v7689_v51 = vmax.f32 %v7685_v31, 0.0  ;;  %v7690_v16 = vmax.f32 %v7686_v24, 0.0  ;;  %v7691_v42 = vmax.f32 %v7687_v12, 0.0  ;;  %v7692_v63 = vmax.f32 %v7688_v15, 0.0 }
 0xa6e   :  { %7693 = vst [vmem:[%s13812_s15] sm:$0xff] %v7689_v51  ;;  %7694 = vst [vmem:[%s13812_s15 + $0x8] sm:$0xff] %v7690_v16 }
 0xa6f   :  { %7695 = vst [vmem:[%s13812_s15 + $0x10] sm:$0xff] %v7691_v42  ;;  %7696 = vst [vmem:[%s13812_s15 + $0x18] sm:$0xff] %v7692_v63 }

</bundles_post_ra>
